<compile_context>
chip_gen: v7x
topology: tpu7x:2x2x1
jax: 0.10.0
libtpu: 0.0.40
codegen_flags: <defaults>
</compile_context>

<pallas_src>
import jax
import jax.numpy as jnp
from jax import lax
from jax.experimental import pallas as pl
from jax.experimental.pallas import tpu as pltpu

HIDDEN_DIM = 32
INPUT_DIM = 1
NUM_LAYERS = 3
OUTPUT_DIM = 1

H = HIDDEN_DIM

# Sequence lengths up to this are fully unrolled at trace time (short fixed
# trip count -> maximum scheduler visibility); longer sequences use a
# fori_loop with unroll=4.
_UNROLL_T = 32


def gru_kernel(x_ref, wih0_ref, wih12_ref, whh_ref, bih_ref, bhh_ref,
               wfc_ref, bfc_ref, out_ref):
    """Whole sequence in one invocation; layer-skewed wavefront recurrence."""
    B = x_ref.shape[0]
    T = x_ref.shape[1]

    # ---- hoist loop-invariant weight / bias loads out of the recurrence ----
    wih0 = wih0_ref[...]        # (1, 3H)   (INPUT_DIM == 1)
    wih1 = wih12_ref[0]         # (H, 3H)
    wih2 = wih12_ref[1]
    whh0 = whh_ref[0]           # (H, 3H)
    whh1 = whh_ref[1]
    whh2 = whh_ref[2]
    bih0 = bih_ref[0]           # (1, 3H)
    bih1 = bih_ref[1]
    bih2 = bih_ref[2]
    bhh0 = bhh_ref[0]
    bhh1 = bhh_ref[1]
    bhh2 = bhh_ref[2]

    def gi0_at(t):
        # Layer-0 input projection.  With INPUT_DIM == 1 this is a pure VPU
        # broadcast multiply (no MXU push on the chain).
        if isinstance(t, int):
            xt = x_ref[:, t, :]                         # (B, 1), static slice
        else:
            xt = x_ref[:, pl.ds(t, 1), :][:, 0, :]      # (B, 1), dynamic slice
        return xt * wih0 + bih0                         # (B, 3H)

    def cell(gi, gh, h_prev):
        """One GRU cell; gi includes b_ih, gh includes b_hh (b_hn stays inside
        the r-multiplied term, matching torch.nn.GRU)."""
        pre = gi + gh                                   # (B, 3H)
        rz = jax.nn.sigmoid(pre[:, :2 * H])             # fused r/z: one EUP pass
        r = rz[:, :H]
        z = rz[:, H:]
        n = jnp.tanh(gi[:, 2 * H:] + r * gh[:, 2 * H:])
        return (1.0 - z) * n + z * h_prev

    def l0(h0, t):
        gh0 = jnp.dot(h0, whh0, preferred_element_type=jnp.float32) + bhh0
        return cell(gi0_at(t), gh0, h0)

    def l1(h0_prev, h1):
        gi1 = jnp.dot(h0_prev, wih1, preferred_element_type=jnp.float32) + bih1
        gh1 = jnp.dot(h1, whh1, preferred_element_type=jnp.float32) + bhh1
        return cell(gi1, gh1, h1)

    def l2(h1_prev, h2):
        gi2 = jnp.dot(h1_prev, wih2, preferred_element_type=jnp.float32) + bih2
        gh2 = jnp.dot(h2, whh2, preferred_element_type=jnp.float32) + bhh2
        return cell(gi2, gh2, h2)

    h_zero = jnp.zeros((B, H), jnp.float32)   # h0 = zeros, as in the PyTorch module
    n_wave = T + NUM_LAYERS - 1               # wavefront steps

    # Wavefront validity: layer 0 active for s in [0, T-1], layer 1 for
    # [1, T], layer 2 for [2, T+1].  Within a step every layer reads only the
    # carry values entering the step, so the three cells are independent.
    if T <= _UNROLL_T:
        h0 = h1 = h2 = h_zero
        for s in range(n_wave):               # static unroll, no scf loop at all
            h0_old, h1_old = h0, h1
            if s <= T - 1:
                h0 = l0(h0_old, s)
            if 1 <= s <= T:
                h1 = l1(h0_old, h1)
            if s >= 2:                        # s <= T+1 holds by construction
                h2 = l2(h1_old, h2)
        h_top = h2
    else:
        def wstep(s, carry):
            h0, h1, h2 = carry
            t0 = jnp.minimum(s, T - 1)        # clamp x index; result masked below
            h0n = l0(h0, t0)
            h1n = l1(h0, h1)
            h2n = l2(h1, h2)
            h0n = jnp.where(s <= T - 1, h0n, h0)
            h1n = jnp.where((s >= 1) & (s <= T), h1n, h1)
            h2n = jnp.where(s >= 2, h2n, h2)
            return (h0n, h1n, h2n)

        _, _, h_top = lax.fori_loop(0, n_wave, wstep, (h_zero, h_zero, h_zero),
                                    unroll=4)

    # fc(out[:, -1, :]) : last timestep of the top layer.
    out_ref[...] = (jnp.dot(h_top, wfc_ref[...], preferred_element_type=jnp.float32)
                    + bfc_ref[...])


@jax.jit
def gru_forward(x, wih0, wih12, whh, bih, bhh, wfc, bfc):
    B, T, D_in = x.shape
    assert D_in == INPUT_DIM == 1, "kernel folds the layer-0 projection assuming input_dim == 1"

    vmem = pl.BlockSpec(memory_space=pltpu.MemorySpace.VMEM)
    # Everything (weights + the tiny input) is VMEM-resident for the whole
    # kernel; no grid -> single invocation, recurrence fully in-kernel.
    # For very long sequences gi0/x chunking over a T grid axis would be
    # needed to bound VMEM, but at these sizes it is a few KB total.
    return pl.pallas_call(
        gru_kernel,
        out_shape=jax.ShapeDtypeStruct((B, OUTPUT_DIM), jnp.float32),
        in_specs=[vmem] * 8,
        out_specs=vmem,
    )(x, wih0, wih12, whh, bih, bhh, wfc, bfc)


def init_params(key):
    """Deterministic synthetic params, PyTorch-style uniform(-1/sqrt(H), 1/sqrt(H))."""
    k = 1.0 / jnp.sqrt(jnp.float32(HIDDEN_DIM))
    keys = jax.random.split(key, 7)
    u = lambda kk, shape: jax.random.uniform(kk, shape, jnp.float32, -k, k)
    wih0 = u(keys[0], (INPUT_DIM, 3 * H))                      # layer 0 input weights
    wih12 = u(keys[1], (NUM_LAYERS - 1, H, 3 * H))             # layers 1..L-1 input weights
    whh = u(keys[2], (NUM_LAYERS, H, 3 * H))                   # hidden weights
    bih = u(keys[3], (NUM_LAYERS, 1, 3 * H))                   # input biases
    bhh = u(keys[4], (NUM_LAYERS, 1, 3 * H))                   # hidden biases
    wfc = u(keys[5], (H, OUTPUT_DIM))                          # fc weight
    bfc = u(keys[6], (1, OUTPUT_DIM))                          # fc bias
    return wih0, wih12, whh, bih, bhh, wfc, bfc


def gru_reference(x, wih0, wih12, whh, bih, bhh, wfc, bfc):
    """Pure-JAX reference matching torch.nn.GRU semantics."""
    B, T, _ = x.shape
    h = jnp.zeros((NUM_LAYERS, B, H), jnp.float32)
    for t in range(T):
        inp = x[:, t, :]
        new_h = []
        for l in range(NUM_LAYERS):
            w_ih = wih0 if l == 0 else wih12[l - 1]
            gi = inp @ w_ih + bih[l]
            gh = h[l] @ whh[l] + bhh[l]
            r = jax.nn.sigmoid(gi[:, :H] + gh[:, :H])
            z = jax.nn.sigmoid(gi[:, H:2 * H] + gh[:, H:2 * H])
            n = jnp.tanh(gi[:, 2 * H:] + r * gh[:, 2 * H:])
            hl = (1.0 - z) * n + z * h[l]
            new_h.append(hl)
            inp = hl
        h = jnp.stack(new_h)
    return h[-1] @ wfc + bfc


if __name__ == "__main__":
    key = jax.random.PRNGKey(0)
    k_x, k_p = jax.random.split(key)

    B, T = 2, 8
    x = jax.random.normal(k_x, (B, T, INPUT_DIM), jnp.float32)
    params = init_params(k_p)

    out = gru_forward(x, *params)
    out = jax.block_until_ready(out)

    ref = gru_reference(x, *params)
    assert out.shape == (B, OUTPUT_DIM)
    assert jnp.allclose(out, ref, atol=1e-3, rtol=1e-3), (out, ref)

    print("KERNEL_OK")
</pallas_src>

<mosaic_0001>
module attributes {stable_mosaic.version = 11 : i64} {
  func.func @gru_kernel(%arg0: memref<2x8x1xf32, #tpu.memory_space<vmem>>, %arg1: memref<1x96xf32, #tpu.memory_space<vmem>>, %arg2: memref<2x32x96xf32, #tpu.memory_space<vmem>>, %arg3: memref<3x32x96xf32, #tpu.memory_space<vmem>>, %arg4: memref<3x1x96xf32, #tpu.memory_space<vmem>>, %arg5: memref<3x1x96xf32, #tpu.memory_space<vmem>>, %arg6: memref<32x1xf32, #tpu.memory_space<vmem>>, %arg7: memref<1x1xf32, #tpu.memory_space<vmem>>, %arg8: memref<2x1xf32, #tpu.memory_space<vmem>>) attributes {dimension_semantics = [], scalar_prefetch = 0 : i64, scratch_operands = 0 : i64, tpu.core_type = #tpu.core_type<tc>} {
    %c0 = arith.constant 0 : index
    %c0_0 = arith.constant 0 : index
    %0 = vector.load %arg1[%c0, %c0_0] : memref<1x96xf32, #tpu.memory_space<vmem>>, vector<1x96xf32>
    %c0_1 = arith.constant 0 : index
    %c0_2 = arith.constant 0 : index
    %c0_3 = arith.constant 0 : index
    %1 = vector.load %arg2[%c0_1, %c0_2, %c0_3] : memref<2x32x96xf32, #tpu.memory_space<vmem>>, vector<1x32x96xf32>
    %2 = vector.shape_cast %1 : vector<1x32x96xf32> to vector<32x96xf32>
    %c1 = arith.constant 1 : index
    %c0_4 = arith.constant 0 : index
    %c0_5 = arith.constant 0 : index
    %3 = vector.load %arg2[%c1, %c0_4, %c0_5] : memref<2x32x96xf32, #tpu.memory_space<vmem>>, vector<1x32x96xf32>
    %4 = vector.shape_cast %3 : vector<1x32x96xf32> to vector<32x96xf32>
    %c0_6 = arith.constant 0 : index
    %c0_7 = arith.constant 0 : index
    %c0_8 = arith.constant 0 : index
    %5 = vector.load %arg3[%c0_6, %c0_7, %c0_8] : memref<3x32x96xf32, #tpu.memory_space<vmem>>, vector<1x32x96xf32>
    %6 = vector.shape_cast %5 : vector<1x32x96xf32> to vector<32x96xf32>
    %c1_9 = arith.constant 1 : index
    %c0_10 = arith.constant 0 : index
    %c0_11 = arith.constant 0 : index
    %7 = vector.load %arg3[%c1_9, %c0_10, %c0_11] : memref<3x32x96xf32, #tpu.memory_space<vmem>>, vector<1x32x96xf32>
    %8 = vector.shape_cast %7 : vector<1x32x96xf32> to vector<32x96xf32>
    %c2 = arith.constant 2 : index
    %c0_12 = arith.constant 0 : index
    %c0_13 = arith.constant 0 : index
    %9 = vector.load %arg3[%c2, %c0_12, %c0_13] : memref<3x32x96xf32, #tpu.memory_space<vmem>>, vector<1x32x96xf32>
    %10 = vector.shape_cast %9 : vector<1x32x96xf32> to vector<32x96xf32>
    %c0_14 = arith.constant 0 : index
    %c0_15 = arith.constant 0 : index
    %c0_16 = arith.constant 0 : index
    %11 = vector.load %arg4[%c0_14, %c0_15, %c0_16] : memref<3x1x96xf32, #tpu.memory_space<vmem>>, vector<1x1x96xf32>
    %12 = vector.shape_cast %11 : vector<1x1x96xf32> to vector<1x96xf32>
    %c1_17 = arith.constant 1 : index
    %c0_18 = arith.constant 0 : index
    %c0_19 = arith.constant 0 : index
    %13 = vector.load %arg4[%c1_17, %c0_18, %c0_19] : memref<3x1x96xf32, #tpu.memory_space<vmem>>, vector<1x1x96xf32>
    %14 = vector.shape_cast %13 : vector<1x1x96xf32> to vector<1x96xf32>
    %c2_20 = arith.constant 2 : index
    %c0_21 = arith.constant 0 : index
    %c0_22 = arith.constant 0 : index
    %15 = vector.load %arg4[%c2_20, %c0_21, %c0_22] : memref<3x1x96xf32, #tpu.memory_space<vmem>>, vector<1x1x96xf32>
    %16 = vector.shape_cast %15 : vector<1x1x96xf32> to vector<1x96xf32>
    %c0_23 = arith.constant 0 : index
    %c0_24 = arith.constant 0 : index
    %c0_25 = arith.constant 0 : index
    %17 = vector.load %arg5[%c0_23, %c0_24, %c0_25] : memref<3x1x96xf32, #tpu.memory_space<vmem>>, vector<1x1x96xf32>
    %18 = vector.shape_cast %17 : vector<1x1x96xf32> to vector<1x96xf32>
    %c1_26 = arith.constant 1 : index
    %c0_27 = arith.constant 0 : index
    %c0_28 = arith.constant 0 : index
    %19 = vector.load %arg5[%c1_26, %c0_27, %c0_28] : memref<3x1x96xf32, #tpu.memory_space<vmem>>, vector<1x1x96xf32>
    %20 = vector.shape_cast %19 : vector<1x1x96xf32> to vector<1x96xf32>
    %c2_29 = arith.constant 2 : index
    %c0_30 = arith.constant 0 : index
    %c0_31 = arith.constant 0 : index
    %21 = vector.load %arg5[%c2_29, %c0_30, %c0_31] : memref<3x1x96xf32, #tpu.memory_space<vmem>>, vector<1x1x96xf32>
    %22 = vector.shape_cast %21 : vector<1x1x96xf32> to vector<1x96xf32>
    %cst = arith.constant 0.000000e+00 : f32
    %23 = vector.broadcast %cst : f32 to vector<2x32xf32>
    %cst_32 = arith.constant dense<0.000000e+00> : vector<2x96xf32>
    %24 = tpu.matmul %23, %6, %cst_32 {dimension_numbers = #tpu.dot_dimension_numbers<[1], [0], [0], [1], [0, 0, 1, 1], [], []>} : vector<2x32xf32>, vector<32x96xf32>, vector<2x96xf32> -> vector<2x96xf32>
    %25 = vector.broadcast %18 : vector<1x96xf32> to vector<2x96xf32>
    %26 = arith.addf %24, %25 : vector<2x96xf32>
    %c0_33 = arith.constant 0 : index
    %c0_34 = arith.constant 0 : index
    %c0_35 = arith.constant 0 : index
    %27 = vector.load %arg0[%c0_33, %c0_34, %c0_35] : memref<2x8x1xf32, #tpu.memory_space<vmem>>, vector<2x1x1xf32>
    %28 = vector.shape_cast %27 : vector<2x1x1xf32> to vector<2x1xf32>
    %29 = vector.broadcast %28 : vector<2x1xf32> to vector<2x96xf32>
    %30 = vector.broadcast %0 : vector<1x96xf32> to vector<2x96xf32>
    %31 = arith.mulf %29, %30 : vector<2x96xf32>
    %32 = vector.broadcast %12 : vector<1x96xf32> to vector<2x96xf32>
    %33 = arith.addf %31, %32 : vector<2x96xf32>
    %34 = arith.addf %33, %26 : vector<2x96xf32>
    %35 = vector.extract_strided_slice %34 {offsets = [0, 0], sizes = [2, 64], strides = [1, 1]} : vector<2x96xf32> to vector<2x64xf32>
    %36 = arith.negf %35 : vector<2x64xf32>
    %37 = math.exp %36 : vector<2x64xf32>
    %cst_36 = arith.constant 1.000000e+00 : f32
    %38 = vector.broadcast %cst_36 : f32 to vector<2x64xf32>
    %39 = arith.addf %38, %37 : vector<2x64xf32>
    %40 = arith.divf %38, %39 : vector<2x64xf32>
    %41 = vector.extract_strided_slice %40 {offsets = [0, 0], sizes = [2, 32], strides = [1, 1]} : vector<2x64xf32> to vector<2x32xf32>
    %42 = vector.extract_strided_slice %40 {offsets = [0, 32], sizes = [2, 32], strides = [1, 1]} : vector<2x64xf32> to vector<2x32xf32>
    %43 = vector.extract_strided_slice %33 {offsets = [0, 64], sizes = [2, 32], strides = [1, 1]} : vector<2x96xf32> to vector<2x32xf32>
    %44 = vector.extract_strided_slice %26 {offsets = [0, 64], sizes = [2, 32], strides = [1, 1]} : vector<2x96xf32> to vector<2x32xf32>
    %45 = arith.mulf %41, %44 : vector<2x32xf32>
    %46 = arith.addf %43, %45 : vector<2x32xf32>
    %47 = math.tanh %46 : vector<2x32xf32>
    %cst_37 = arith.constant 1.000000e+00 : f32
    %48 = vector.broadcast %cst_37 : f32 to vector<2x32xf32>
    %49 = arith.subf %48, %42 : vector<2x32xf32>
    %50 = arith.mulf %49, %47 : vector<2x32xf32>
    %51 = arith.mulf %42, %23 : vector<2x32xf32>
    %52 = arith.addf %50, %51 : vector<2x32xf32>
    %cst_38 = arith.constant dense<0.000000e+00> : vector<2x96xf32>
    %53 = tpu.matmul %52, %6, %cst_38 {dimension_numbers = #tpu.dot_dimension_numbers<[1], [0], [0], [1], [0, 0, 1, 1], [], []>} : vector<2x32xf32>, vector<32x96xf32>, vector<2x96xf32> -> vector<2x96xf32>
    %54 = vector.broadcast %18 : vector<1x96xf32> to vector<2x96xf32>
    %55 = arith.addf %53, %54 : vector<2x96xf32>
    %c0_39 = arith.constant 0 : index
    %c1_40 = arith.constant 1 : index
    %c0_41 = arith.constant 0 : index
    %56 = vector.load %arg0[%c0_39, %c1_40, %c0_41] : memref<2x8x1xf32, #tpu.memory_space<vmem>>, vector<2x1x1xf32>
    %57 = vector.shape_cast %56 : vector<2x1x1xf32> to vector<2x1xf32>
    %58 = vector.broadcast %57 : vector<2x1xf32> to vector<2x96xf32>
    %59 = vector.broadcast %0 : vector<1x96xf32> to vector<2x96xf32>
    %60 = arith.mulf %58, %59 : vector<2x96xf32>
    %61 = vector.broadcast %12 : vector<1x96xf32> to vector<2x96xf32>
    %62 = arith.addf %60, %61 : vector<2x96xf32>
    %63 = arith.addf %62, %55 : vector<2x96xf32>
    %64 = vector.extract_strided_slice %63 {offsets = [0, 0], sizes = [2, 64], strides = [1, 1]} : vector<2x96xf32> to vector<2x64xf32>
    %65 = arith.negf %64 : vector<2x64xf32>
    %66 = math.exp %65 : vector<2x64xf32>
    %cst_42 = arith.constant 1.000000e+00 : f32
    %67 = vector.broadcast %cst_42 : f32 to vector<2x64xf32>
    %68 = arith.addf %67, %66 : vector<2x64xf32>
    %69 = arith.divf %67, %68 : vector<2x64xf32>
    %70 = vector.extract_strided_slice %69 {offsets = [0, 0], sizes = [2, 32], strides = [1, 1]} : vector<2x64xf32> to vector<2x32xf32>
    %71 = vector.extract_strided_slice %69 {offsets = [0, 32], sizes = [2, 32], strides = [1, 1]} : vector<2x64xf32> to vector<2x32xf32>
    %72 = vector.extract_strided_slice %62 {offsets = [0, 64], sizes = [2, 32], strides = [1, 1]} : vector<2x96xf32> to vector<2x32xf32>
    %73 = vector.extract_strided_slice %55 {offsets = [0, 64], sizes = [2, 32], strides = [1, 1]} : vector<2x96xf32> to vector<2x32xf32>
    %74 = arith.mulf %70, %73 : vector<2x32xf32>
    %75 = arith.addf %72, %74 : vector<2x32xf32>
    %76 = math.tanh %75 : vector<2x32xf32>
    %cst_43 = arith.constant 1.000000e+00 : f32
    %77 = vector.broadcast %cst_43 : f32 to vector<2x32xf32>
    %78 = arith.subf %77, %71 : vector<2x32xf32>
    %79 = arith.mulf %78, %76 : vector<2x32xf32>
    %80 = arith.mulf %71, %52 : vector<2x32xf32>
    %81 = arith.addf %79, %80 : vector<2x32xf32>
    %cst_44 = arith.constant dense<0.000000e+00> : vector<2x96xf32>
    %82 = tpu.matmul %52, %2, %cst_44 {dimension_numbers = #tpu.dot_dimension_numbers<[1], [0], [0], [1], [0, 0, 1, 1], [], []>} : vector<2x32xf32>, vector<32x96xf32>, vector<2x96xf32> -> vector<2x96xf32>
    %83 = vector.broadcast %14 : vector<1x96xf32> to vector<2x96xf32>
    %84 = arith.addf %82, %83 : vector<2x96xf32>
    %cst_45 = arith.constant dense<0.000000e+00> : vector<2x96xf32>
    %85 = tpu.matmul %23, %8, %cst_45 {dimension_numbers = #tpu.dot_dimension_numbers<[1], [0], [0], [1], [0, 0, 1, 1], [], []>} : vector<2x32xf32>, vector<32x96xf32>, vector<2x96xf32> -> vector<2x96xf32>
    %86 = vector.broadcast %20 : vector<1x96xf32> to vector<2x96xf32>
    %87 = arith.addf %85, %86 : vector<2x96xf32>
    %88 = arith.addf %84, %87 : vector<2x96xf32>
    %89 = vector.extract_strided_slice %88 {offsets = [0, 0], sizes = [2, 64], strides = [1, 1]} : vector<2x96xf32> to vector<2x64xf32>
    %90 = arith.negf %89 : vector<2x64xf32>
    %91 = math.exp %90 : vector<2x64xf32>
    %cst_46 = arith.constant 1.000000e+00 : f32
    %92 = vector.broadcast %cst_46 : f32 to vector<2x64xf32>
    %93 = arith.addf %92, %91 : vector<2x64xf32>
    %94 = arith.divf %92, %93 : vector<2x64xf32>
    %95 = vector.extract_strided_slice %94 {offsets = [0, 0], sizes = [2, 32], strides = [1, 1]} : vector<2x64xf32> to vector<2x32xf32>
    %96 = vector.extract_strided_slice %94 {offsets = [0, 32], sizes = [2, 32], strides = [1, 1]} : vector<2x64xf32> to vector<2x32xf32>
    %97 = vector.extract_strided_slice %84 {offsets = [0, 64], sizes = [2, 32], strides = [1, 1]} : vector<2x96xf32> to vector<2x32xf32>
    %98 = vector.extract_strided_slice %87 {offsets = [0, 64], sizes = [2, 32], strides = [1, 1]} : vector<2x96xf32> to vector<2x32xf32>
    %99 = arith.mulf %95, %98 : vector<2x32xf32>
    %100 = arith.addf %97, %99 : vector<2x32xf32>
    %101 = math.tanh %100 : vector<2x32xf32>
    %cst_47 = arith.constant 1.000000e+00 : f32
    %102 = vector.broadcast %cst_47 : f32 to vector<2x32xf32>
    %103 = arith.subf %102, %96 : vector<2x32xf32>
    %104 = arith.mulf %103, %101 : vector<2x32xf32>
    %105 = arith.mulf %96, %23 : vector<2x32xf32>
    %106 = arith.addf %104, %105 : vector<2x32xf32>
    %cst_48 = arith.constant dense<0.000000e+00> : vector<2x96xf32>
    %107 = tpu.matmul %81, %6, %cst_48 {dimension_numbers = #tpu.dot_dimension_numbers<[1], [0], [0], [1], [0, 0, 1, 1], [], []>} : vector<2x32xf32>, vector<32x96xf32>, vector<2x96xf32> -> vector<2x96xf32>
    %108 = vector.broadcast %18 : vector<1x96xf32> to vector<2x96xf32>
    %109 = arith.addf %107, %108 : vector<2x96xf32>
    %c0_49 = arith.constant 0 : index
    %c2_50 = arith.constant 2 : index
    %c0_51 = arith.constant 0 : index
    %110 = vector.load %arg0[%c0_49, %c2_50, %c0_51] : memref<2x8x1xf32, #tpu.memory_space<vmem>>, vector<2x1x1xf32>
    %111 = vector.shape_cast %110 : vector<2x1x1xf32> to vector<2x1xf32>
    %112 = vector.broadcast %111 : vector<2x1xf32> to vector<2x96xf32>
    %113 = vector.broadcast %0 : vector<1x96xf32> to vector<2x96xf32>
    %114 = arith.mulf %112, %113 : vector<2x96xf32>
    %115 = vector.broadcast %12 : vector<1x96xf32> to vector<2x96xf32>
    %116 = arith.addf %114, %115 : vector<2x96xf32>
    %117 = arith.addf %116, %109 : vector<2x96xf32>
    %118 = vector.extract_strided_slice %117 {offsets = [0, 0], sizes = [2, 64], strides = [1, 1]} : vector<2x96xf32> to vector<2x64xf32>
    %119 = arith.negf %118 : vector<2x64xf32>
    %120 = math.exp %119 : vector<2x64xf32>
    %cst_52 = arith.constant 1.000000e+00 : f32
    %121 = vector.broadcast %cst_52 : f32 to vector<2x64xf32>
    %122 = arith.addf %121, %120 : vector<2x64xf32>
    %123 = arith.divf %121, %122 : vector<2x64xf32>
    %124 = vector.extract_strided_slice %123 {offsets = [0, 0], sizes = [2, 32], strides = [1, 1]} : vector<2x64xf32> to vector<2x32xf32>
    %125 = vector.extract_strided_slice %123 {offsets = [0, 32], sizes = [2, 32], strides = [1, 1]} : vector<2x64xf32> to vector<2x32xf32>
    %126 = vector.extract_strided_slice %116 {offsets = [0, 64], sizes = [2, 32], strides = [1, 1]} : vector<2x96xf32> to vector<2x32xf32>
    %127 = vector.extract_strided_slice %109 {offsets = [0, 64], sizes = [2, 32], strides = [1, 1]} : vector<2x96xf32> to vector<2x32xf32>
    %128 = arith.mulf %124, %127 : vector<2x32xf32>
    %129 = arith.addf %126, %128 : vector<2x32xf32>
    %130 = math.tanh %129 : vector<2x32xf32>
    %cst_53 = arith.constant 1.000000e+00 : f32
    %131 = vector.broadcast %cst_53 : f32 to vector<2x32xf32>
    %132 = arith.subf %131, %125 : vector<2x32xf32>
    %133 = arith.mulf %132, %130 : vector<2x32xf32>
    %134 = arith.mulf %125, %81 : vector<2x32xf32>
    %135 = arith.addf %133, %134 : vector<2x32xf32>
    %cst_54 = arith.constant dense<0.000000e+00> : vector<2x96xf32>
    %136 = tpu.matmul %81, %2, %cst_54 {dimension_numbers = #tpu.dot_dimension_numbers<[1], [0], [0], [1], [0, 0, 1, 1], [], []>} : vector<2x32xf32>, vector<32x96xf32>, vector<2x96xf32> -> vector<2x96xf32>
    %137 = vector.broadcast %14 : vector<1x96xf32> to vector<2x96xf32>
    %138 = arith.addf %136, %137 : vector<2x96xf32>
    %cst_55 = arith.constant dense<0.000000e+00> : vector<2x96xf32>
    %139 = tpu.matmul %106, %8, %cst_55 {dimension_numbers = #tpu.dot_dimension_numbers<[1], [0], [0], [1], [0, 0, 1, 1], [], []>} : vector<2x32xf32>, vector<32x96xf32>, vector<2x96xf32> -> vector<2x96xf32>
    %140 = vector.broadcast %20 : vector<1x96xf32> to vector<2x96xf32>
    %141 = arith.addf %139, %140 : vector<2x96xf32>
    %142 = arith.addf %138, %141 : vector<2x96xf32>
    %143 = vector.extract_strided_slice %142 {offsets = [0, 0], sizes = [2, 64], strides = [1, 1]} : vector<2x96xf32> to vector<2x64xf32>
    %144 = arith.negf %143 : vector<2x64xf32>
    %145 = math.exp %144 : vector<2x64xf32>
    %cst_56 = arith.constant 1.000000e+00 : f32
    %146 = vector.broadcast %cst_56 : f32 to vector<2x64xf32>
    %147 = arith.addf %146, %145 : vector<2x64xf32>
    %148 = arith.divf %146, %147 : vector<2x64xf32>
    %149 = vector.extract_strided_slice %148 {offsets = [0, 0], sizes = [2, 32], strides = [1, 1]} : vector<2x64xf32> to vector<2x32xf32>
    %150 = vector.extract_strided_slice %148 {offsets = [0, 32], sizes = [2, 32], strides = [1, 1]} : vector<2x64xf32> to vector<2x32xf32>
    %151 = vector.extract_strided_slice %138 {offsets = [0, 64], sizes = [2, 32], strides = [1, 1]} : vector<2x96xf32> to vector<2x32xf32>
    %152 = vector.extract_strided_slice %141 {offsets = [0, 64], sizes = [2, 32], strides = [1, 1]} : vector<2x96xf32> to vector<2x32xf32>
    %153 = arith.mulf %149, %152 : vector<2x32xf32>
    %154 = arith.addf %151, %153 : vector<2x32xf32>
    %155 = math.tanh %154 : vector<2x32xf32>
    %cst_57 = arith.constant 1.000000e+00 : f32
    %156 = vector.broadcast %cst_57 : f32 to vector<2x32xf32>
    %157 = arith.subf %156, %150 : vector<2x32xf32>
    %158 = arith.mulf %157, %155 : vector<2x32xf32>
    %159 = arith.mulf %150, %106 : vector<2x32xf32>
    %160 = arith.addf %158, %159 : vector<2x32xf32>
    %cst_58 = arith.constant dense<0.000000e+00> : vector<2x96xf32>
    %161 = tpu.matmul %106, %4, %cst_58 {dimension_numbers = #tpu.dot_dimension_numbers<[1], [0], [0], [1], [0, 0, 1, 1], [], []>} : vector<2x32xf32>, vector<32x96xf32>, vector<2x96xf32> -> vector<2x96xf32>
    %162 = vector.broadcast %16 : vector<1x96xf32> to vector<2x96xf32>
    %163 = arith.addf %161, %162 : vector<2x96xf32>
    %cst_59 = arith.constant dense<0.000000e+00> : vector<2x96xf32>
    %164 = tpu.matmul %23, %10, %cst_59 {dimension_numbers = #tpu.dot_dimension_numbers<[1], [0], [0], [1], [0, 0, 1, 1], [], []>} : vector<2x32xf32>, vector<32x96xf32>, vector<2x96xf32> -> vector<2x96xf32>
    %165 = vector.broadcast %22 : vector<1x96xf32> to vector<2x96xf32>
    %166 = arith.addf %164, %165 : vector<2x96xf32>
    %167 = arith.addf %163, %166 : vector<2x96xf32>
    %168 = vector.extract_strided_slice %167 {offsets = [0, 0], sizes = [2, 64], strides = [1, 1]} : vector<2x96xf32> to vector<2x64xf32>
    %169 = arith.negf %168 : vector<2x64xf32>
    %170 = math.exp %169 : vector<2x64xf32>
    %cst_60 = arith.constant 1.000000e+00 : f32
    %171 = vector.broadcast %cst_60 : f32 to vector<2x64xf32>
    %172 = arith.addf %171, %170 : vector<2x64xf32>
    %173 = arith.divf %171, %172 : vector<2x64xf32>
    %174 = vector.extract_strided_slice %173 {offsets = [0, 0], sizes = [2, 32], strides = [1, 1]} : vector<2x64xf32> to vector<2x32xf32>
    %175 = vector.extract_strided_slice %173 {offsets = [0, 32], sizes = [2, 32], strides = [1, 1]} : vector<2x64xf32> to vector<2x32xf32>
    %176 = vector.extract_strided_slice %163 {offsets = [0, 64], sizes = [2, 32], strides = [1, 1]} : vector<2x96xf32> to vector<2x32xf32>
    %177 = vector.extract_strided_slice %166 {offsets = [0, 64], sizes = [2, 32], strides = [1, 1]} : vector<2x96xf32> to vector<2x32xf32>
    %178 = arith.mulf %174, %177 : vector<2x32xf32>
    %179 = arith.addf %176, %178 : vector<2x32xf32>
    %180 = math.tanh %179 : vector<2x32xf32>
    %cst_61 = arith.constant 1.000000e+00 : f32
    %181 = vector.broadcast %cst_61 : f32 to vector<2x32xf32>
    %182 = arith.subf %181, %175 : vector<2x32xf32>
    %183 = arith.mulf %182, %180 : vector<2x32xf32>
    %184 = arith.mulf %175, %23 : vector<2x32xf32>
    %185 = arith.addf %183, %184 : vector<2x32xf32>
    %cst_62 = arith.constant dense<0.000000e+00> : vector<2x96xf32>
    %186 = tpu.matmul %135, %6, %cst_62 {dimension_numbers = #tpu.dot_dimension_numbers<[1], [0], [0], [1], [0, 0, 1, 1], [], []>} : vector<2x32xf32>, vector<32x96xf32>, vector<2x96xf32> -> vector<2x96xf32>
    %187 = vector.broadcast %18 : vector<1x96xf32> to vector<2x96xf32>
    %188 = arith.addf %186, %187 : vector<2x96xf32>
    %c0_63 = arith.constant 0 : index
    %c3 = arith.constant 3 : index
    %c0_64 = arith.constant 0 : index
    %189 = vector.load %arg0[%c0_63, %c3, %c0_64] : memref<2x8x1xf32, #tpu.memory_space<vmem>>, vector<2x1x1xf32>
    %190 = vector.shape_cast %189 : vector<2x1x1xf32> to vector<2x1xf32>
    %191 = vector.broadcast %190 : vector<2x1xf32> to vector<2x96xf32>
    %192 = vector.broadcast %0 : vector<1x96xf32> to vector<2x96xf32>
    %193 = arith.mulf %191, %192 : vector<2x96xf32>
    %194 = vector.broadcast %12 : vector<1x96xf32> to vector<2x96xf32>
    %195 = arith.addf %193, %194 : vector<2x96xf32>
    %196 = arith.addf %195, %188 : vector<2x96xf32>
    %197 = vector.extract_strided_slice %196 {offsets = [0, 0], sizes = [2, 64], strides = [1, 1]} : vector<2x96xf32> to vector<2x64xf32>
    %198 = arith.negf %197 : vector<2x64xf32>
    %199 = math.exp %198 : vector<2x64xf32>
    %cst_65 = arith.constant 1.000000e+00 : f32
    %200 = vector.broadcast %cst_65 : f32 to vector<2x64xf32>
    %201 = arith.addf %200, %199 : vector<2x64xf32>
    %202 = arith.divf %200, %201 : vector<2x64xf32>
    %203 = vector.extract_strided_slice %202 {offsets = [0, 0], sizes = [2, 32], strides = [1, 1]} : vector<2x64xf32> to vector<2x32xf32>
    %204 = vector.extract_strided_slice %202 {offsets = [0, 32], sizes = [2, 32], strides = [1, 1]} : vector<2x64xf32> to vector<2x32xf32>
    %205 = vector.extract_strided_slice %195 {offsets = [0, 64], sizes = [2, 32], strides = [1, 1]} : vector<2x96xf32> to vector<2x32xf32>
    %206 = vector.extract_strided_slice %188 {offsets = [0, 64], sizes = [2, 32], strides = [1, 1]} : vector<2x96xf32> to vector<2x32xf32>
    %207 = arith.mulf %203, %206 : vector<2x32xf32>
    %208 = arith.addf %205, %207 : vector<2x32xf32>
    %209 = math.tanh %208 : vector<2x32xf32>
    %cst_66 = arith.constant 1.000000e+00 : f32
    %210 = vector.broadcast %cst_66 : f32 to vector<2x32xf32>
    %211 = arith.subf %210, %204 : vector<2x32xf32>
    %212 = arith.mulf %211, %209 : vector<2x32xf32>
    %213 = arith.mulf %204, %135 : vector<2x32xf32>
    %214 = arith.addf %212, %213 : vector<2x32xf32>
    %cst_67 = arith.constant dense<0.000000e+00> : vector<2x96xf32>
    %215 = tpu.matmul %135, %2, %cst_67 {dimension_numbers = #tpu.dot_dimension_numbers<[1], [0], [0], [1], [0, 0, 1, 1], [], []>} : vector<2x32xf32>, vector<32x96xf32>, vector<2x96xf32> -> vector<2x96xf32>
    %216 = vector.broadcast %14 : vector<1x96xf32> to vector<2x96xf32>
    %217 = arith.addf %215, %216 : vector<2x96xf32>
    %cst_68 = arith.constant dense<0.000000e+00> : vector<2x96xf32>
    %218 = tpu.matmul %160, %8, %cst_68 {dimension_numbers = #tpu.dot_dimension_numbers<[1], [0], [0], [1], [0, 0, 1, 1], [], []>} : vector<2x32xf32>, vector<32x96xf32>, vector<2x96xf32> -> vector<2x96xf32>
    %219 = vector.broadcast %20 : vector<1x96xf32> to vector<2x96xf32>
    %220 = arith.addf %218, %219 : vector<2x96xf32>
    %221 = arith.addf %217, %220 : vector<2x96xf32>
    %222 = vector.extract_strided_slice %221 {offsets = [0, 0], sizes = [2, 64], strides = [1, 1]} : vector<2x96xf32> to vector<2x64xf32>
    %223 = arith.negf %222 : vector<2x64xf32>
    %224 = math.exp %223 : vector<2x64xf32>
    %cst_69 = arith.constant 1.000000e+00 : f32
    %225 = vector.broadcast %cst_69 : f32 to vector<2x64xf32>
    %226 = arith.addf %225, %224 : vector<2x64xf32>
    %227 = arith.divf %225, %226 : vector<2x64xf32>
    %228 = vector.extract_strided_slice %227 {offsets = [0, 0], sizes = [2, 32], strides = [1, 1]} : vector<2x64xf32> to vector<2x32xf32>
    %229 = vector.extract_strided_slice %227 {offsets = [0, 32], sizes = [2, 32], strides = [1, 1]} : vector<2x64xf32> to vector<2x32xf32>
    %230 = vector.extract_strided_slice %217 {offsets = [0, 64], sizes = [2, 32], strides = [1, 1]} : vector<2x96xf32> to vector<2x32xf32>
    %231 = vector.extract_strided_slice %220 {offsets = [0, 64], sizes = [2, 32], strides = [1, 1]} : vector<2x96xf32> to vector<2x32xf32>
    %232 = arith.mulf %228, %231 : vector<2x32xf32>
    %233 = arith.addf %230, %232 : vector<2x32xf32>
    %234 = math.tanh %233 : vector<2x32xf32>
    %cst_70 = arith.constant 1.000000e+00 : f32
    %235 = vector.broadcast %cst_70 : f32 to vector<2x32xf32>
    %236 = arith.subf %235, %229 : vector<2x32xf32>
    %237 = arith.mulf %236, %234 : vector<2x32xf32>
    %238 = arith.mulf %229, %160 : vector<2x32xf32>
    %239 = arith.addf %237, %238 : vector<2x32xf32>
    %cst_71 = arith.constant dense<0.000000e+00> : vector<2x96xf32>
    %240 = tpu.matmul %160, %4, %cst_71 {dimension_numbers = #tpu.dot_dimension_numbers<[1], [0], [0], [1], [0, 0, 1, 1], [], []>} : vector<2x32xf32>, vector<32x96xf32>, vector<2x96xf32> -> vector<2x96xf32>
    %241 = vector.broadcast %16 : vector<1x96xf32> to vector<2x96xf32>
    %242 = arith.addf %240, %241 : vector<2x96xf32>
    %cst_72 = arith.constant dense<0.000000e+00> : vector<2x96xf32>
    %243 = tpu.matmul %185, %10, %cst_72 {dimension_numbers = #tpu.dot_dimension_numbers<[1], [0], [0], [1], [0, 0, 1, 1], [], []>} : vector<2x32xf32>, vector<32x96xf32>, vector<2x96xf32> -> vector<2x96xf32>
    %244 = vector.broadcast %22 : vector<1x96xf32> to vector<2x96xf32>
    %245 = arith.addf %243, %244 : vector<2x96xf32>
    %246 = arith.addf %242, %245 : vector<2x96xf32>
    %247 = vector.extract_strided_slice %246 {offsets = [0, 0], sizes = [2, 64], strides = [1, 1]} : vector<2x96xf32> to vector<2x64xf32>
    %248 = arith.negf %247 : vector<2x64xf32>
    %249 = math.exp %248 : vector<2x64xf32>
    %cst_73 = arith.constant 1.000000e+00 : f32
    %250 = vector.broadcast %cst_73 : f32 to vector<2x64xf32>
    %251 = arith.addf %250, %249 : vector<2x64xf32>
    %252 = arith.divf %250, %251 : vector<2x64xf32>
    %253 = vector.extract_strided_slice %252 {offsets = [0, 0], sizes = [2, 32], strides = [1, 1]} : vector<2x64xf32> to vector<2x32xf32>
    %254 = vector.extract_strided_slice %252 {offsets = [0, 32], sizes = [2, 32], strides = [1, 1]} : vector<2x64xf32> to vector<2x32xf32>
    %255 = vector.extract_strided_slice %242 {offsets = [0, 64], sizes = [2, 32], strides = [1, 1]} : vector<2x96xf32> to vector<2x32xf32>
    %256 = vector.extract_strided_slice %245 {offsets = [0, 64], sizes = [2, 32], strides = [1, 1]} : vector<2x96xf32> to vector<2x32xf32>
    %257 = arith.mulf %253, %256 : vector<2x32xf32>
    %258 = arith.addf %255, %257 : vector<2x32xf32>
    %259 = math.tanh %258 : vector<2x32xf32>
    %cst_74 = arith.constant 1.000000e+00 : f32
    %260 = vector.broadcast %cst_74 : f32 to vector<2x32xf32>
    %261 = arith.subf %260, %254 : vector<2x32xf32>
    %262 = arith.mulf %261, %259 : vector<2x32xf32>
    %263 = arith.mulf %254, %185 : vector<2x32xf32>
    %264 = arith.addf %262, %263 : vector<2x32xf32>
    %cst_75 = arith.constant dense<0.000000e+00> : vector<2x96xf32>
    %265 = tpu.matmul %214, %6, %cst_75 {dimension_numbers = #tpu.dot_dimension_numbers<[1], [0], [0], [1], [0, 0, 1, 1], [], []>} : vector<2x32xf32>, vector<32x96xf32>, vector<2x96xf32> -> vector<2x96xf32>
    %266 = vector.broadcast %18 : vector<1x96xf32> to vector<2x96xf32>
    %267 = arith.addf %265, %266 : vector<2x96xf32>
    %c0_76 = arith.constant 0 : index
    %c4 = arith.constant 4 : index
    %c0_77 = arith.constant 0 : index
    %268 = vector.load %arg0[%c0_76, %c4, %c0_77] : memref<2x8x1xf32, #tpu.memory_space<vmem>>, vector<2x1x1xf32>
    %269 = vector.shape_cast %268 : vector<2x1x1xf32> to vector<2x1xf32>
    %270 = vector.broadcast %269 : vector<2x1xf32> to vector<2x96xf32>
    %271 = vector.broadcast %0 : vector<1x96xf32> to vector<2x96xf32>
    %272 = arith.mulf %270, %271 : vector<2x96xf32>
    %273 = vector.broadcast %12 : vector<1x96xf32> to vector<2x96xf32>
    %274 = arith.addf %272, %273 : vector<2x96xf32>
    %275 = arith.addf %274, %267 : vector<2x96xf32>
    %276 = vector.extract_strided_slice %275 {offsets = [0, 0], sizes = [2, 64], strides = [1, 1]} : vector<2x96xf32> to vector<2x64xf32>
    %277 = arith.negf %276 : vector<2x64xf32>
    %278 = math.exp %277 : vector<2x64xf32>
    %cst_78 = arith.constant 1.000000e+00 : f32
    %279 = vector.broadcast %cst_78 : f32 to vector<2x64xf32>
    %280 = arith.addf %279, %278 : vector<2x64xf32>
    %281 = arith.divf %279, %280 : vector<2x64xf32>
    %282 = vector.extract_strided_slice %281 {offsets = [0, 0], sizes = [2, 32], strides = [1, 1]} : vector<2x64xf32> to vector<2x32xf32>
    %283 = vector.extract_strided_slice %281 {offsets = [0, 32], sizes = [2, 32], strides = [1, 1]} : vector<2x64xf32> to vector<2x32xf32>
    %284 = vector.extract_strided_slice %274 {offsets = [0, 64], sizes = [2, 32], strides = [1, 1]} : vector<2x96xf32> to vector<2x32xf32>
    %285 = vector.extract_strided_slice %267 {offsets = [0, 64], sizes = [2, 32], strides = [1, 1]} : vector<2x96xf32> to vector<2x32xf32>
    %286 = arith.mulf %282, %285 : vector<2x32xf32>
    %287 = arith.addf %284, %286 : vector<2x32xf32>
    %288 = math.tanh %287 : vector<2x32xf32>
    %cst_79 = arith.constant 1.000000e+00 : f32
    %289 = vector.broadcast %cst_79 : f32 to vector<2x32xf32>
    %290 = arith.subf %289, %283 : vector<2x32xf32>
    %291 = arith.mulf %290, %288 : vector<2x32xf32>
    %292 = arith.mulf %283, %214 : vector<2x32xf32>
    %293 = arith.addf %291, %292 : vector<2x32xf32>
    %cst_80 = arith.constant dense<0.000000e+00> : vector<2x96xf32>
    %294 = tpu.matmul %214, %2, %cst_80 {dimension_numbers = #tpu.dot_dimension_numbers<[1], [0], [0], [1], [0, 0, 1, 1], [], []>} : vector<2x32xf32>, vector<32x96xf32>, vector<2x96xf32> -> vector<2x96xf32>
    %295 = vector.broadcast %14 : vector<1x96xf32> to vector<2x96xf32>
    %296 = arith.addf %294, %295 : vector<2x96xf32>
    %cst_81 = arith.constant dense<0.000000e+00> : vector<2x96xf32>
    %297 = tpu.matmul %239, %8, %cst_81 {dimension_numbers = #tpu.dot_dimension_numbers<[1], [0], [0], [1], [0, 0, 1, 1], [], []>} : vector<2x32xf32>, vector<32x96xf32>, vector<2x96xf32> -> vector<2x96xf32>
    %298 = vector.broadcast %20 : vector<1x96xf32> to vector<2x96xf32>
    %299 = arith.addf %297, %298 : vector<2x96xf32>
    %300 = arith.addf %296, %299 : vector<2x96xf32>
    %301 = vector.extract_strided_slice %300 {offsets = [0, 0], sizes = [2, 64], strides = [1, 1]} : vector<2x96xf32> to vector<2x64xf32>
    %302 = arith.negf %301 : vector<2x64xf32>
    %303 = math.exp %302 : vector<2x64xf32>
    %cst_82 = arith.constant 1.000000e+00 : f32
    %304 = vector.broadcast %cst_82 : f32 to vector<2x64xf32>
    %305 = arith.addf %304, %303 : vector<2x64xf32>
    %306 = arith.divf %304, %305 : vector<2x64xf32>
    %307 = vector.extract_strided_slice %306 {offsets = [0, 0], sizes = [2, 32], strides = [1, 1]} : vector<2x64xf32> to vector<2x32xf32>
    %308 = vector.extract_strided_slice %306 {offsets = [0, 32], sizes = [2, 32], strides = [1, 1]} : vector<2x64xf32> to vector<2x32xf32>
    %309 = vector.extract_strided_slice %296 {offsets = [0, 64], sizes = [2, 32], strides = [1, 1]} : vector<2x96xf32> to vector<2x32xf32>
    %310 = vector.extract_strided_slice %299 {offsets = [0, 64], sizes = [2, 32], strides = [1, 1]} : vector<2x96xf32> to vector<2x32xf32>
    %311 = arith.mulf %307, %310 : vector<2x32xf32>
    %312 = arith.addf %309, %311 : vector<2x32xf32>
    %313 = math.tanh %312 : vector<2x32xf32>
    %cst_83 = arith.constant 1.000000e+00 : f32
    %314 = vector.broadcast %cst_83 : f32 to vector<2x32xf32>
    %315 = arith.subf %314, %308 : vector<2x32xf32>
    %316 = arith.mulf %315, %313 : vector<2x32xf32>
    %317 = arith.mulf %308, %239 : vector<2x32xf32>
    %318 = arith.addf %316, %317 : vector<2x32xf32>
    %cst_84 = arith.constant dense<0.000000e+00> : vector<2x96xf32>
    %319 = tpu.matmul %239, %4, %cst_84 {dimension_numbers = #tpu.dot_dimension_numbers<[1], [0], [0], [1], [0, 0, 1, 1], [], []>} : vector<2x32xf32>, vector<32x96xf32>, vector<2x96xf32> -> vector<2x96xf32>
    %320 = vector.broadcast %16 : vector<1x96xf32> to vector<2x96xf32>
    %321 = arith.addf %319, %320 : vector<2x96xf32>
    %cst_85 = arith.constant dense<0.000000e+00> : vector<2x96xf32>
    %322 = tpu.matmul %264, %10, %cst_85 {dimension_numbers = #tpu.dot_dimension_numbers<[1], [0], [0], [1], [0, 0, 1, 1], [], []>} : vector<2x32xf32>, vector<32x96xf32>, vector<2x96xf32> -> vector<2x96xf32>
    %323 = vector.broadcast %22 : vector<1x96xf32> to vector<2x96xf32>
    %324 = arith.addf %322, %323 : vector<2x96xf32>
    %325 = arith.addf %321, %324 : vector<2x96xf32>
    %326 = vector.extract_strided_slice %325 {offsets = [0, 0], sizes = [2, 64], strides = [1, 1]} : vector<2x96xf32> to vector<2x64xf32>
    %327 = arith.negf %326 : vector<2x64xf32>
    %328 = math.exp %327 : vector<2x64xf32>
    %cst_86 = arith.constant 1.000000e+00 : f32
    %329 = vector.broadcast %cst_86 : f32 to vector<2x64xf32>
    %330 = arith.addf %329, %328 : vector<2x64xf32>
    %331 = arith.divf %329, %330 : vector<2x64xf32>
    %332 = vector.extract_strided_slice %331 {offsets = [0, 0], sizes = [2, 32], strides = [1, 1]} : vector<2x64xf32> to vector<2x32xf32>
    %333 = vector.extract_strided_slice %331 {offsets = [0, 32], sizes = [2, 32], strides = [1, 1]} : vector<2x64xf32> to vector<2x32xf32>
    %334 = vector.extract_strided_slice %321 {offsets = [0, 64], sizes = [2, 32], strides = [1, 1]} : vector<2x96xf32> to vector<2x32xf32>
    %335 = vector.extract_strided_slice %324 {offsets = [0, 64], sizes = [2, 32], strides = [1, 1]} : vector<2x96xf32> to vector<2x32xf32>
    %336 = arith.mulf %332, %335 : vector<2x32xf32>
    %337 = arith.addf %334, %336 : vector<2x32xf32>
    %338 = math.tanh %337 : vector<2x32xf32>
    %cst_87 = arith.constant 1.000000e+00 : f32
    %339 = vector.broadcast %cst_87 : f32 to vector<2x32xf32>
    %340 = arith.subf %339, %333 : vector<2x32xf32>
    %341 = arith.mulf %340, %338 : vector<2x32xf32>
    %342 = arith.mulf %333, %264 : vector<2x32xf32>
    %343 = arith.addf %341, %342 : vector<2x32xf32>
    %cst_88 = arith.constant dense<0.000000e+00> : vector<2x96xf32>
    %344 = tpu.matmul %293, %6, %cst_88 {dimension_numbers = #tpu.dot_dimension_numbers<[1], [0], [0], [1], [0, 0, 1, 1], [], []>} : vector<2x32xf32>, vector<32x96xf32>, vector<2x96xf32> -> vector<2x96xf32>
    %345 = vector.broadcast %18 : vector<1x96xf32> to vector<2x96xf32>
    %346 = arith.addf %344, %345 : vector<2x96xf32>
    %c0_89 = arith.constant 0 : index
    %c5 = arith.constant 5 : index
    %c0_90 = arith.constant 0 : index
    %347 = vector.load %arg0[%c0_89, %c5, %c0_90] : memref<2x8x1xf32, #tpu.memory_space<vmem>>, vector<2x1x1xf32>
    %348 = vector.shape_cast %347 : vector<2x1x1xf32> to vector<2x1xf32>
    %349 = vector.broadcast %348 : vector<2x1xf32> to vector<2x96xf32>
    %350 = vector.broadcast %0 : vector<1x96xf32> to vector<2x96xf32>
    %351 = arith.mulf %349, %350 : vector<2x96xf32>
    %352 = vector.broadcast %12 : vector<1x96xf32> to vector<2x96xf32>
    %353 = arith.addf %351, %352 : vector<2x96xf32>
    %354 = arith.addf %353, %346 : vector<2x96xf32>
    %355 = vector.extract_strided_slice %354 {offsets = [0, 0], sizes = [2, 64], strides = [1, 1]} : vector<2x96xf32> to vector<2x64xf32>
    %356 = arith.negf %355 : vector<2x64xf32>
    %357 = math.exp %356 : vector<2x64xf32>
    %cst_91 = arith.constant 1.000000e+00 : f32
    %358 = vector.broadcast %cst_91 : f32 to vector<2x64xf32>
    %359 = arith.addf %358, %357 : vector<2x64xf32>
    %360 = arith.divf %358, %359 : vector<2x64xf32>
    %361 = vector.extract_strided_slice %360 {offsets = [0, 0], sizes = [2, 32], strides = [1, 1]} : vector<2x64xf32> to vector<2x32xf32>
    %362 = vector.extract_strided_slice %360 {offsets = [0, 32], sizes = [2, 32], strides = [1, 1]} : vector<2x64xf32> to vector<2x32xf32>
    %363 = vector.extract_strided_slice %353 {offsets = [0, 64], sizes = [2, 32], strides = [1, 1]} : vector<2x96xf32> to vector<2x32xf32>
    %364 = vector.extract_strided_slice %346 {offsets = [0, 64], sizes = [2, 32], strides = [1, 1]} : vector<2x96xf32> to vector<2x32xf32>
    %365 = arith.mulf %361, %364 : vector<2x32xf32>
    %366 = arith.addf %363, %365 : vector<2x32xf32>
    %367 = math.tanh %366 : vector<2x32xf32>
    %cst_92 = arith.constant 1.000000e+00 : f32
    %368 = vector.broadcast %cst_92 : f32 to vector<2x32xf32>
    %369 = arith.subf %368, %362 : vector<2x32xf32>
    %370 = arith.mulf %369, %367 : vector<2x32xf32>
    %371 = arith.mulf %362, %293 : vector<2x32xf32>
    %372 = arith.addf %370, %371 : vector<2x32xf32>
    %cst_93 = arith.constant dense<0.000000e+00> : vector<2x96xf32>
    %373 = tpu.matmul %293, %2, %cst_93 {dimension_numbers = #tpu.dot_dimension_numbers<[1], [0], [0], [1], [0, 0, 1, 1], [], []>} : vector<2x32xf32>, vector<32x96xf32>, vector<2x96xf32> -> vector<2x96xf32>
    %374 = vector.broadcast %14 : vector<1x96xf32> to vector<2x96xf32>
    %375 = arith.addf %373, %374 : vector<2x96xf32>
    %cst_94 = arith.constant dense<0.000000e+00> : vector<2x96xf32>
    %376 = tpu.matmul %318, %8, %cst_94 {dimension_numbers = #tpu.dot_dimension_numbers<[1], [0], [0], [1], [0, 0, 1, 1], [], []>} : vector<2x32xf32>, vector<32x96xf32>, vector<2x96xf32> -> vector<2x96xf32>
    %377 = vector.broadcast %20 : vector<1x96xf32> to vector<2x96xf32>
    %378 = arith.addf %376, %377 : vector<2x96xf32>
    %379 = arith.addf %375, %378 : vector<2x96xf32>
    %380 = vector.extract_strided_slice %379 {offsets = [0, 0], sizes = [2, 64], strides = [1, 1]} : vector<2x96xf32> to vector<2x64xf32>
    %381 = arith.negf %380 : vector<2x64xf32>
    %382 = math.exp %381 : vector<2x64xf32>
    %cst_95 = arith.constant 1.000000e+00 : f32
    %383 = vector.broadcast %cst_95 : f32 to vector<2x64xf32>
    %384 = arith.addf %383, %382 : vector<2x64xf32>
    %385 = arith.divf %383, %384 : vector<2x64xf32>
    %386 = vector.extract_strided_slice %385 {offsets = [0, 0], sizes = [2, 32], strides = [1, 1]} : vector<2x64xf32> to vector<2x32xf32>
    %387 = vector.extract_strided_slice %385 {offsets = [0, 32], sizes = [2, 32], strides = [1, 1]} : vector<2x64xf32> to vector<2x32xf32>
    %388 = vector.extract_strided_slice %375 {offsets = [0, 64], sizes = [2, 32], strides = [1, 1]} : vector<2x96xf32> to vector<2x32xf32>
    %389 = vector.extract_strided_slice %378 {offsets = [0, 64], sizes = [2, 32], strides = [1, 1]} : vector<2x96xf32> to vector<2x32xf32>
    %390 = arith.mulf %386, %389 : vector<2x32xf32>
    %391 = arith.addf %388, %390 : vector<2x32xf32>
    %392 = math.tanh %391 : vector<2x32xf32>
    %cst_96 = arith.constant 1.000000e+00 : f32
    %393 = vector.broadcast %cst_96 : f32 to vector<2x32xf32>
    %394 = arith.subf %393, %387 : vector<2x32xf32>
    %395 = arith.mulf %394, %392 : vector<2x32xf32>
    %396 = arith.mulf %387, %318 : vector<2x32xf32>
    %397 = arith.addf %395, %396 : vector<2x32xf32>
    %cst_97 = arith.constant dense<0.000000e+00> : vector<2x96xf32>
    %398 = tpu.matmul %318, %4, %cst_97 {dimension_numbers = #tpu.dot_dimension_numbers<[1], [0], [0], [1], [0, 0, 1, 1], [], []>} : vector<2x32xf32>, vector<32x96xf32>, vector<2x96xf32> -> vector<2x96xf32>
    %399 = vector.broadcast %16 : vector<1x96xf32> to vector<2x96xf32>
    %400 = arith.addf %398, %399 : vector<2x96xf32>
    %cst_98 = arith.constant dense<0.000000e+00> : vector<2x96xf32>
    %401 = tpu.matmul %343, %10, %cst_98 {dimension_numbers = #tpu.dot_dimension_numbers<[1], [0], [0], [1], [0, 0, 1, 1], [], []>} : vector<2x32xf32>, vector<32x96xf32>, vector<2x96xf32> -> vector<2x96xf32>
    %402 = vector.broadcast %22 : vector<1x96xf32> to vector<2x96xf32>
    %403 = arith.addf %401, %402 : vector<2x96xf32>
    %404 = arith.addf %400, %403 : vector<2x96xf32>
    %405 = vector.extract_strided_slice %404 {offsets = [0, 0], sizes = [2, 64], strides = [1, 1]} : vector<2x96xf32> to vector<2x64xf32>
    %406 = arith.negf %405 : vector<2x64xf32>
    %407 = math.exp %406 : vector<2x64xf32>
    %cst_99 = arith.constant 1.000000e+00 : f32
    %408 = vector.broadcast %cst_99 : f32 to vector<2x64xf32>
    %409 = arith.addf %408, %407 : vector<2x64xf32>
    %410 = arith.divf %408, %409 : vector<2x64xf32>
    %411 = vector.extract_strided_slice %410 {offsets = [0, 0], sizes = [2, 32], strides = [1, 1]} : vector<2x64xf32> to vector<2x32xf32>
    %412 = vector.extract_strided_slice %410 {offsets = [0, 32], sizes = [2, 32], strides = [1, 1]} : vector<2x64xf32> to vector<2x32xf32>
    %413 = vector.extract_strided_slice %400 {offsets = [0, 64], sizes = [2, 32], strides = [1, 1]} : vector<2x96xf32> to vector<2x32xf32>
    %414 = vector.extract_strided_slice %403 {offsets = [0, 64], sizes = [2, 32], strides = [1, 1]} : vector<2x96xf32> to vector<2x32xf32>
    %415 = arith.mulf %411, %414 : vector<2x32xf32>
    %416 = arith.addf %413, %415 : vector<2x32xf32>
    %417 = math.tanh %416 : vector<2x32xf32>
    %cst_100 = arith.constant 1.000000e+00 : f32
    %418 = vector.broadcast %cst_100 : f32 to vector<2x32xf32>
    %419 = arith.subf %418, %412 : vector<2x32xf32>
    %420 = arith.mulf %419, %417 : vector<2x32xf32>
    %421 = arith.mulf %412, %343 : vector<2x32xf32>
    %422 = arith.addf %420, %421 : vector<2x32xf32>
    %cst_101 = arith.constant dense<0.000000e+00> : vector<2x96xf32>
    %423 = tpu.matmul %372, %6, %cst_101 {dimension_numbers = #tpu.dot_dimension_numbers<[1], [0], [0], [1], [0, 0, 1, 1], [], []>} : vector<2x32xf32>, vector<32x96xf32>, vector<2x96xf32> -> vector<2x96xf32>
    %424 = vector.broadcast %18 : vector<1x96xf32> to vector<2x96xf32>
    %425 = arith.addf %423, %424 : vector<2x96xf32>
    %c0_102 = arith.constant 0 : index
    %c6 = arith.constant 6 : index
    %c0_103 = arith.constant 0 : index
    %426 = vector.load %arg0[%c0_102, %c6, %c0_103] : memref<2x8x1xf32, #tpu.memory_space<vmem>>, vector<2x1x1xf32>
    %427 = vector.shape_cast %426 : vector<2x1x1xf32> to vector<2x1xf32>
    %428 = vector.broadcast %427 : vector<2x1xf32> to vector<2x96xf32>
    %429 = vector.broadcast %0 : vector<1x96xf32> to vector<2x96xf32>
    %430 = arith.mulf %428, %429 : vector<2x96xf32>
    %431 = vector.broadcast %12 : vector<1x96xf32> to vector<2x96xf32>
    %432 = arith.addf %430, %431 : vector<2x96xf32>
    %433 = arith.addf %432, %425 : vector<2x96xf32>
    %434 = vector.extract_strided_slice %433 {offsets = [0, 0], sizes = [2, 64], strides = [1, 1]} : vector<2x96xf32> to vector<2x64xf32>
    %435 = arith.negf %434 : vector<2x64xf32>
    %436 = math.exp %435 : vector<2x64xf32>
    %cst_104 = arith.constant 1.000000e+00 : f32
    %437 = vector.broadcast %cst_104 : f32 to vector<2x64xf32>
    %438 = arith.addf %437, %436 : vector<2x64xf32>
    %439 = arith.divf %437, %438 : vector<2x64xf32>
    %440 = vector.extract_strided_slice %439 {offsets = [0, 0], sizes = [2, 32], strides = [1, 1]} : vector<2x64xf32> to vector<2x32xf32>
    %441 = vector.extract_strided_slice %439 {offsets = [0, 32], sizes = [2, 32], strides = [1, 1]} : vector<2x64xf32> to vector<2x32xf32>
    %442 = vector.extract_strided_slice %432 {offsets = [0, 64], sizes = [2, 32], strides = [1, 1]} : vector<2x96xf32> to vector<2x32xf32>
    %443 = vector.extract_strided_slice %425 {offsets = [0, 64], sizes = [2, 32], strides = [1, 1]} : vector<2x96xf32> to vector<2x32xf32>
    %444 = arith.mulf %440, %443 : vector<2x32xf32>
    %445 = arith.addf %442, %444 : vector<2x32xf32>
    %446 = math.tanh %445 : vector<2x32xf32>
    %cst_105 = arith.constant 1.000000e+00 : f32
    %447 = vector.broadcast %cst_105 : f32 to vector<2x32xf32>
    %448 = arith.subf %447, %441 : vector<2x32xf32>
    %449 = arith.mulf %448, %446 : vector<2x32xf32>
    %450 = arith.mulf %441, %372 : vector<2x32xf32>
    %451 = arith.addf %449, %450 : vector<2x32xf32>
    %cst_106 = arith.constant dense<0.000000e+00> : vector<2x96xf32>
    %452 = tpu.matmul %372, %2, %cst_106 {dimension_numbers = #tpu.dot_dimension_numbers<[1], [0], [0], [1], [0, 0, 1, 1], [], []>} : vector<2x32xf32>, vector<32x96xf32>, vector<2x96xf32> -> vector<2x96xf32>
    %453 = vector.broadcast %14 : vector<1x96xf32> to vector<2x96xf32>
    %454 = arith.addf %452, %453 : vector<2x96xf32>
    %cst_107 = arith.constant dense<0.000000e+00> : vector<2x96xf32>
    %455 = tpu.matmul %397, %8, %cst_107 {dimension_numbers = #tpu.dot_dimension_numbers<[1], [0], [0], [1], [0, 0, 1, 1], [], []>} : vector<2x32xf32>, vector<32x96xf32>, vector<2x96xf32> -> vector<2x96xf32>
    %456 = vector.broadcast %20 : vector<1x96xf32> to vector<2x96xf32>
    %457 = arith.addf %455, %456 : vector<2x96xf32>
    %458 = arith.addf %454, %457 : vector<2x96xf32>
    %459 = vector.extract_strided_slice %458 {offsets = [0, 0], sizes = [2, 64], strides = [1, 1]} : vector<2x96xf32> to vector<2x64xf32>
    %460 = arith.negf %459 : vector<2x64xf32>
    %461 = math.exp %460 : vector<2x64xf32>
    %cst_108 = arith.constant 1.000000e+00 : f32
    %462 = vector.broadcast %cst_108 : f32 to vector<2x64xf32>
    %463 = arith.addf %462, %461 : vector<2x64xf32>
    %464 = arith.divf %462, %463 : vector<2x64xf32>
    %465 = vector.extract_strided_slice %464 {offsets = [0, 0], sizes = [2, 32], strides = [1, 1]} : vector<2x64xf32> to vector<2x32xf32>
    %466 = vector.extract_strided_slice %464 {offsets = [0, 32], sizes = [2, 32], strides = [1, 1]} : vector<2x64xf32> to vector<2x32xf32>
    %467 = vector.extract_strided_slice %454 {offsets = [0, 64], sizes = [2, 32], strides = [1, 1]} : vector<2x96xf32> to vector<2x32xf32>
    %468 = vector.extract_strided_slice %457 {offsets = [0, 64], sizes = [2, 32], strides = [1, 1]} : vector<2x96xf32> to vector<2x32xf32>
    %469 = arith.mulf %465, %468 : vector<2x32xf32>
    %470 = arith.addf %467, %469 : vector<2x32xf32>
    %471 = math.tanh %470 : vector<2x32xf32>
    %cst_109 = arith.constant 1.000000e+00 : f32
    %472 = vector.broadcast %cst_109 : f32 to vector<2x32xf32>
    %473 = arith.subf %472, %466 : vector<2x32xf32>
    %474 = arith.mulf %473, %471 : vector<2x32xf32>
    %475 = arith.mulf %466, %397 : vector<2x32xf32>
    %476 = arith.addf %474, %475 : vector<2x32xf32>
    %cst_110 = arith.constant dense<0.000000e+00> : vector<2x96xf32>
    %477 = tpu.matmul %397, %4, %cst_110 {dimension_numbers = #tpu.dot_dimension_numbers<[1], [0], [0], [1], [0, 0, 1, 1], [], []>} : vector<2x32xf32>, vector<32x96xf32>, vector<2x96xf32> -> vector<2x96xf32>
    %478 = vector.broadcast %16 : vector<1x96xf32> to vector<2x96xf32>
    %479 = arith.addf %477, %478 : vector<2x96xf32>
    %cst_111 = arith.constant dense<0.000000e+00> : vector<2x96xf32>
    %480 = tpu.matmul %422, %10, %cst_111 {dimension_numbers = #tpu.dot_dimension_numbers<[1], [0], [0], [1], [0, 0, 1, 1], [], []>} : vector<2x32xf32>, vector<32x96xf32>, vector<2x96xf32> -> vector<2x96xf32>
    %481 = vector.broadcast %22 : vector<1x96xf32> to vector<2x96xf32>
    %482 = arith.addf %480, %481 : vector<2x96xf32>
    %483 = arith.addf %479, %482 : vector<2x96xf32>
    %484 = vector.extract_strided_slice %483 {offsets = [0, 0], sizes = [2, 64], strides = [1, 1]} : vector<2x96xf32> to vector<2x64xf32>
    %485 = arith.negf %484 : vector<2x64xf32>
    %486 = math.exp %485 : vector<2x64xf32>
    %cst_112 = arith.constant 1.000000e+00 : f32
    %487 = vector.broadcast %cst_112 : f32 to vector<2x64xf32>
    %488 = arith.addf %487, %486 : vector<2x64xf32>
    %489 = arith.divf %487, %488 : vector<2x64xf32>
    %490 = vector.extract_strided_slice %489 {offsets = [0, 0], sizes = [2, 32], strides = [1, 1]} : vector<2x64xf32> to vector<2x32xf32>
    %491 = vector.extract_strided_slice %489 {offsets = [0, 32], sizes = [2, 32], strides = [1, 1]} : vector<2x64xf32> to vector<2x32xf32>
    %492 = vector.extract_strided_slice %479 {offsets = [0, 64], sizes = [2, 32], strides = [1, 1]} : vector<2x96xf32> to vector<2x32xf32>
    %493 = vector.extract_strided_slice %482 {offsets = [0, 64], sizes = [2, 32], strides = [1, 1]} : vector<2x96xf32> to vector<2x32xf32>
    %494 = arith.mulf %490, %493 : vector<2x32xf32>
    %495 = arith.addf %492, %494 : vector<2x32xf32>
    %496 = math.tanh %495 : vector<2x32xf32>
    %cst_113 = arith.constant 1.000000e+00 : f32
    %497 = vector.broadcast %cst_113 : f32 to vector<2x32xf32>
    %498 = arith.subf %497, %491 : vector<2x32xf32>
    %499 = arith.mulf %498, %496 : vector<2x32xf32>
    %500 = arith.mulf %491, %422 : vector<2x32xf32>
    %501 = arith.addf %499, %500 : vector<2x32xf32>
    %cst_114 = arith.constant dense<0.000000e+00> : vector<2x96xf32>
    %502 = tpu.matmul %451, %6, %cst_114 {dimension_numbers = #tpu.dot_dimension_numbers<[1], [0], [0], [1], [0, 0, 1, 1], [], []>} : vector<2x32xf32>, vector<32x96xf32>, vector<2x96xf32> -> vector<2x96xf32>
    %503 = vector.broadcast %18 : vector<1x96xf32> to vector<2x96xf32>
    %504 = arith.addf %502, %503 : vector<2x96xf32>
    %c0_115 = arith.constant 0 : index
    %c7 = arith.constant 7 : index
    %c0_116 = arith.constant 0 : index
    %505 = vector.load %arg0[%c0_115, %c7, %c0_116] : memref<2x8x1xf32, #tpu.memory_space<vmem>>, vector<2x1x1xf32>
    %506 = vector.shape_cast %505 : vector<2x1x1xf32> to vector<2x1xf32>
    %507 = vector.broadcast %506 : vector<2x1xf32> to vector<2x96xf32>
    %508 = vector.broadcast %0 : vector<1x96xf32> to vector<2x96xf32>
    %509 = arith.mulf %507, %508 : vector<2x96xf32>
    %510 = vector.broadcast %12 : vector<1x96xf32> to vector<2x96xf32>
    %511 = arith.addf %509, %510 : vector<2x96xf32>
    %512 = arith.addf %511, %504 : vector<2x96xf32>
    %513 = vector.extract_strided_slice %512 {offsets = [0, 0], sizes = [2, 64], strides = [1, 1]} : vector<2x96xf32> to vector<2x64xf32>
    %514 = arith.negf %513 : vector<2x64xf32>
    %515 = math.exp %514 : vector<2x64xf32>
    %cst_117 = arith.constant 1.000000e+00 : f32
    %516 = vector.broadcast %cst_117 : f32 to vector<2x64xf32>
    %517 = arith.addf %516, %515 : vector<2x64xf32>
    %518 = arith.divf %516, %517 : vector<2x64xf32>
    %519 = vector.extract_strided_slice %518 {offsets = [0, 0], sizes = [2, 32], strides = [1, 1]} : vector<2x64xf32> to vector<2x32xf32>
    %520 = vector.extract_strided_slice %518 {offsets = [0, 32], sizes = [2, 32], strides = [1, 1]} : vector<2x64xf32> to vector<2x32xf32>
    %521 = vector.extract_strided_slice %511 {offsets = [0, 64], sizes = [2, 32], strides = [1, 1]} : vector<2x96xf32> to vector<2x32xf32>
    %522 = vector.extract_strided_slice %504 {offsets = [0, 64], sizes = [2, 32], strides = [1, 1]} : vector<2x96xf32> to vector<2x32xf32>
    %523 = arith.mulf %519, %522 : vector<2x32xf32>
    %524 = arith.addf %521, %523 : vector<2x32xf32>
    %525 = math.tanh %524 : vector<2x32xf32>
    %cst_118 = arith.constant 1.000000e+00 : f32
    %526 = vector.broadcast %cst_118 : f32 to vector<2x32xf32>
    %527 = arith.subf %526, %520 : vector<2x32xf32>
    %528 = arith.mulf %527, %525 : vector<2x32xf32>
    %529 = arith.mulf %520, %451 : vector<2x32xf32>
    %530 = arith.addf %528, %529 : vector<2x32xf32>
    %cst_119 = arith.constant dense<0.000000e+00> : vector<2x96xf32>
    %531 = tpu.matmul %451, %2, %cst_119 {dimension_numbers = #tpu.dot_dimension_numbers<[1], [0], [0], [1], [0, 0, 1, 1], [], []>} : vector<2x32xf32>, vector<32x96xf32>, vector<2x96xf32> -> vector<2x96xf32>
    %532 = vector.broadcast %14 : vector<1x96xf32> to vector<2x96xf32>
    %533 = arith.addf %531, %532 : vector<2x96xf32>
    %cst_120 = arith.constant dense<0.000000e+00> : vector<2x96xf32>
    %534 = tpu.matmul %476, %8, %cst_120 {dimension_numbers = #tpu.dot_dimension_numbers<[1], [0], [0], [1], [0, 0, 1, 1], [], []>} : vector<2x32xf32>, vector<32x96xf32>, vector<2x96xf32> -> vector<2x96xf32>
    %535 = vector.broadcast %20 : vector<1x96xf32> to vector<2x96xf32>
    %536 = arith.addf %534, %535 : vector<2x96xf32>
    %537 = arith.addf %533, %536 : vector<2x96xf32>
    %538 = vector.extract_strided_slice %537 {offsets = [0, 0], sizes = [2, 64], strides = [1, 1]} : vector<2x96xf32> to vector<2x64xf32>
    %539 = arith.negf %538 : vector<2x64xf32>
    %540 = math.exp %539 : vector<2x64xf32>
    %cst_121 = arith.constant 1.000000e+00 : f32
    %541 = vector.broadcast %cst_121 : f32 to vector<2x64xf32>
    %542 = arith.addf %541, %540 : vector<2x64xf32>
    %543 = arith.divf %541, %542 : vector<2x64xf32>
    %544 = vector.extract_strided_slice %543 {offsets = [0, 0], sizes = [2, 32], strides = [1, 1]} : vector<2x64xf32> to vector<2x32xf32>
    %545 = vector.extract_strided_slice %543 {offsets = [0, 32], sizes = [2, 32], strides = [1, 1]} : vector<2x64xf32> to vector<2x32xf32>
    %546 = vector.extract_strided_slice %533 {offsets = [0, 64], sizes = [2, 32], strides = [1, 1]} : vector<2x96xf32> to vector<2x32xf32>
    %547 = vector.extract_strided_slice %536 {offsets = [0, 64], sizes = [2, 32], strides = [1, 1]} : vector<2x96xf32> to vector<2x32xf32>
    %548 = arith.mulf %544, %547 : vector<2x32xf32>
    %549 = arith.addf %546, %548 : vector<2x32xf32>
    %550 = math.tanh %549 : vector<2x32xf32>
    %cst_122 = arith.constant 1.000000e+00 : f32
    %551 = vector.broadcast %cst_122 : f32 to vector<2x32xf32>
    %552 = arith.subf %551, %545 : vector<2x32xf32>
    %553 = arith.mulf %552, %550 : vector<2x32xf32>
    %554 = arith.mulf %545, %476 : vector<2x32xf32>
    %555 = arith.addf %553, %554 : vector<2x32xf32>
    %cst_123 = arith.constant dense<0.000000e+00> : vector<2x96xf32>
    %556 = tpu.matmul %476, %4, %cst_123 {dimension_numbers = #tpu.dot_dimension_numbers<[1], [0], [0], [1], [0, 0, 1, 1], [], []>} : vector<2x32xf32>, vector<32x96xf32>, vector<2x96xf32> -> vector<2x96xf32>
    %557 = vector.broadcast %16 : vector<1x96xf32> to vector<2x96xf32>
    %558 = arith.addf %556, %557 : vector<2x96xf32>
    %cst_124 = arith.constant dense<0.000000e+00> : vector<2x96xf32>
    %559 = tpu.matmul %501, %10, %cst_124 {dimension_numbers = #tpu.dot_dimension_numbers<[1], [0], [0], [1], [0, 0, 1, 1], [], []>} : vector<2x32xf32>, vector<32x96xf32>, vector<2x96xf32> -> vector<2x96xf32>
    %560 = vector.broadcast %22 : vector<1x96xf32> to vector<2x96xf32>
    %561 = arith.addf %559, %560 : vector<2x96xf32>
    %562 = arith.addf %558, %561 : vector<2x96xf32>
    %563 = vector.extract_strided_slice %562 {offsets = [0, 0], sizes = [2, 64], strides = [1, 1]} : vector<2x96xf32> to vector<2x64xf32>
    %564 = arith.negf %563 : vector<2x64xf32>
    %565 = math.exp %564 : vector<2x64xf32>
    %cst_125 = arith.constant 1.000000e+00 : f32
    %566 = vector.broadcast %cst_125 : f32 to vector<2x64xf32>
    %567 = arith.addf %566, %565 : vector<2x64xf32>
    %568 = arith.divf %566, %567 : vector<2x64xf32>
    %569 = vector.extract_strided_slice %568 {offsets = [0, 0], sizes = [2, 32], strides = [1, 1]} : vector<2x64xf32> to vector<2x32xf32>
    %570 = vector.extract_strided_slice %568 {offsets = [0, 32], sizes = [2, 32], strides = [1, 1]} : vector<2x64xf32> to vector<2x32xf32>
    %571 = vector.extract_strided_slice %558 {offsets = [0, 64], sizes = [2, 32], strides = [1, 1]} : vector<2x96xf32> to vector<2x32xf32>
    %572 = vector.extract_strided_slice %561 {offsets = [0, 64], sizes = [2, 32], strides = [1, 1]} : vector<2x96xf32> to vector<2x32xf32>
    %573 = arith.mulf %569, %572 : vector<2x32xf32>
    %574 = arith.addf %571, %573 : vector<2x32xf32>
    %575 = math.tanh %574 : vector<2x32xf32>
    %cst_126 = arith.constant 1.000000e+00 : f32
    %576 = vector.broadcast %cst_126 : f32 to vector<2x32xf32>
    %577 = arith.subf %576, %570 : vector<2x32xf32>
    %578 = arith.mulf %577, %575 : vector<2x32xf32>
    %579 = arith.mulf %570, %501 : vector<2x32xf32>
    %580 = arith.addf %578, %579 : vector<2x32xf32>
    %cst_127 = arith.constant dense<0.000000e+00> : vector<2x96xf32>
    %581 = tpu.matmul %530, %2, %cst_127 {dimension_numbers = #tpu.dot_dimension_numbers<[1], [0], [0], [1], [0, 0, 1, 1], [], []>} : vector<2x32xf32>, vector<32x96xf32>, vector<2x96xf32> -> vector<2x96xf32>
    %582 = vector.broadcast %14 : vector<1x96xf32> to vector<2x96xf32>
    %583 = arith.addf %581, %582 : vector<2x96xf32>
    %cst_128 = arith.constant dense<0.000000e+00> : vector<2x96xf32>
    %584 = tpu.matmul %555, %8, %cst_128 {dimension_numbers = #tpu.dot_dimension_numbers<[1], [0], [0], [1], [0, 0, 1, 1], [], []>} : vector<2x32xf32>, vector<32x96xf32>, vector<2x96xf32> -> vector<2x96xf32>
    %585 = vector.broadcast %20 : vector<1x96xf32> to vector<2x96xf32>
    %586 = arith.addf %584, %585 : vector<2x96xf32>
    %587 = arith.addf %583, %586 : vector<2x96xf32>
    %588 = vector.extract_strided_slice %587 {offsets = [0, 0], sizes = [2, 64], strides = [1, 1]} : vector<2x96xf32> to vector<2x64xf32>
    %589 = arith.negf %588 : vector<2x64xf32>
    %590 = math.exp %589 : vector<2x64xf32>
    %cst_129 = arith.constant 1.000000e+00 : f32
    %591 = vector.broadcast %cst_129 : f32 to vector<2x64xf32>
    %592 = arith.addf %591, %590 : vector<2x64xf32>
    %593 = arith.divf %591, %592 : vector<2x64xf32>
    %594 = vector.extract_strided_slice %593 {offsets = [0, 0], sizes = [2, 32], strides = [1, 1]} : vector<2x64xf32> to vector<2x32xf32>
    %595 = vector.extract_strided_slice %593 {offsets = [0, 32], sizes = [2, 32], strides = [1, 1]} : vector<2x64xf32> to vector<2x32xf32>
    %596 = vector.extract_strided_slice %583 {offsets = [0, 64], sizes = [2, 32], strides = [1, 1]} : vector<2x96xf32> to vector<2x32xf32>
    %597 = vector.extract_strided_slice %586 {offsets = [0, 64], sizes = [2, 32], strides = [1, 1]} : vector<2x96xf32> to vector<2x32xf32>
    %598 = arith.mulf %594, %597 : vector<2x32xf32>
    %599 = arith.addf %596, %598 : vector<2x32xf32>
    %600 = math.tanh %599 : vector<2x32xf32>
    %cst_130 = arith.constant 1.000000e+00 : f32
    %601 = vector.broadcast %cst_130 : f32 to vector<2x32xf32>
    %602 = arith.subf %601, %595 : vector<2x32xf32>
    %603 = arith.mulf %602, %600 : vector<2x32xf32>
    %604 = arith.mulf %595, %555 : vector<2x32xf32>
    %605 = arith.addf %603, %604 : vector<2x32xf32>
    %cst_131 = arith.constant dense<0.000000e+00> : vector<2x96xf32>
    %606 = tpu.matmul %555, %4, %cst_131 {dimension_numbers = #tpu.dot_dimension_numbers<[1], [0], [0], [1], [0, 0, 1, 1], [], []>} : vector<2x32xf32>, vector<32x96xf32>, vector<2x96xf32> -> vector<2x96xf32>
    %607 = vector.broadcast %16 : vector<1x96xf32> to vector<2x96xf32>
    %608 = arith.addf %606, %607 : vector<2x96xf32>
    %cst_132 = arith.constant dense<0.000000e+00> : vector<2x96xf32>
    %609 = tpu.matmul %580, %10, %cst_132 {dimension_numbers = #tpu.dot_dimension_numbers<[1], [0], [0], [1], [0, 0, 1, 1], [], []>} : vector<2x32xf32>, vector<32x96xf32>, vector<2x96xf32> -> vector<2x96xf32>
    %610 = vector.broadcast %22 : vector<1x96xf32> to vector<2x96xf32>
    %611 = arith.addf %609, %610 : vector<2x96xf32>
    %612 = arith.addf %608, %611 : vector<2x96xf32>
    %613 = vector.extract_strided_slice %612 {offsets = [0, 0], sizes = [2, 64], strides = [1, 1]} : vector<2x96xf32> to vector<2x64xf32>
    %614 = arith.negf %613 : vector<2x64xf32>
    %615 = math.exp %614 : vector<2x64xf32>
    %cst_133 = arith.constant 1.000000e+00 : f32
    %616 = vector.broadcast %cst_133 : f32 to vector<2x64xf32>
    %617 = arith.addf %616, %615 : vector<2x64xf32>
    %618 = arith.divf %616, %617 : vector<2x64xf32>
    %619 = vector.extract_strided_slice %618 {offsets = [0, 0], sizes = [2, 32], strides = [1, 1]} : vector<2x64xf32> to vector<2x32xf32>
    %620 = vector.extract_strided_slice %618 {offsets = [0, 32], sizes = [2, 32], strides = [1, 1]} : vector<2x64xf32> to vector<2x32xf32>
    %621 = vector.extract_strided_slice %608 {offsets = [0, 64], sizes = [2, 32], strides = [1, 1]} : vector<2x96xf32> to vector<2x32xf32>
    %622 = vector.extract_strided_slice %611 {offsets = [0, 64], sizes = [2, 32], strides = [1, 1]} : vector<2x96xf32> to vector<2x32xf32>
    %623 = arith.mulf %619, %622 : vector<2x32xf32>
    %624 = arith.addf %621, %623 : vector<2x32xf32>
    %625 = math.tanh %624 : vector<2x32xf32>
    %cst_134 = arith.constant 1.000000e+00 : f32
    %626 = vector.broadcast %cst_134 : f32 to vector<2x32xf32>
    %627 = arith.subf %626, %620 : vector<2x32xf32>
    %628 = arith.mulf %627, %625 : vector<2x32xf32>
    %629 = arith.mulf %620, %580 : vector<2x32xf32>
    %630 = arith.addf %628, %629 : vector<2x32xf32>
    %cst_135 = arith.constant dense<0.000000e+00> : vector<2x96xf32>
    %631 = tpu.matmul %605, %4, %cst_135 {dimension_numbers = #tpu.dot_dimension_numbers<[1], [0], [0], [1], [0, 0, 1, 1], [], []>} : vector<2x32xf32>, vector<32x96xf32>, vector<2x96xf32> -> vector<2x96xf32>
    %632 = vector.broadcast %16 : vector<1x96xf32> to vector<2x96xf32>
    %633 = arith.addf %631, %632 : vector<2x96xf32>
    %cst_136 = arith.constant dense<0.000000e+00> : vector<2x96xf32>
    %634 = tpu.matmul %630, %10, %cst_136 {dimension_numbers = #tpu.dot_dimension_numbers<[1], [0], [0], [1], [0, 0, 1, 1], [], []>} : vector<2x32xf32>, vector<32x96xf32>, vector<2x96xf32> -> vector<2x96xf32>
    %635 = vector.broadcast %22 : vector<1x96xf32> to vector<2x96xf32>
    %636 = arith.addf %634, %635 : vector<2x96xf32>
    %637 = arith.addf %633, %636 : vector<2x96xf32>
    %638 = vector.extract_strided_slice %637 {offsets = [0, 0], sizes = [2, 64], strides = [1, 1]} : vector<2x96xf32> to vector<2x64xf32>
    %639 = arith.negf %638 : vector<2x64xf32>
    %640 = math.exp %639 : vector<2x64xf32>
    %cst_137 = arith.constant 1.000000e+00 : f32
    %641 = vector.broadcast %cst_137 : f32 to vector<2x64xf32>
    %642 = arith.addf %641, %640 : vector<2x64xf32>
    %643 = arith.divf %641, %642 : vector<2x64xf32>
    %644 = vector.extract_strided_slice %643 {offsets = [0, 0], sizes = [2, 32], strides = [1, 1]} : vector<2x64xf32> to vector<2x32xf32>
    %645 = vector.extract_strided_slice %643 {offsets = [0, 32], sizes = [2, 32], strides = [1, 1]} : vector<2x64xf32> to vector<2x32xf32>
    %646 = vector.extract_strided_slice %633 {offsets = [0, 64], sizes = [2, 32], strides = [1, 1]} : vector<2x96xf32> to vector<2x32xf32>
    %647 = vector.extract_strided_slice %636 {offsets = [0, 64], sizes = [2, 32], strides = [1, 1]} : vector<2x96xf32> to vector<2x32xf32>
    %648 = arith.mulf %644, %647 : vector<2x32xf32>
    %649 = arith.addf %646, %648 : vector<2x32xf32>
    %650 = math.tanh %649 : vector<2x32xf32>
    %cst_138 = arith.constant 1.000000e+00 : f32
    %651 = vector.broadcast %cst_138 : f32 to vector<2x32xf32>
    %652 = arith.subf %651, %645 : vector<2x32xf32>
    %653 = arith.mulf %652, %650 : vector<2x32xf32>
    %654 = arith.mulf %645, %630 : vector<2x32xf32>
    %655 = arith.addf %653, %654 : vector<2x32xf32>
    %c0_139 = arith.constant 0 : index
    %c0_140 = arith.constant 0 : index
    %656 = vector.load %arg6[%c0_139, %c0_140] : memref<32x1xf32, #tpu.memory_space<vmem>>, vector<32x1xf32>
    %cst_141 = arith.constant dense<0.000000e+00> : vector<2x1xf32>
    %657 = tpu.matmul %655, %656, %cst_141 {dimension_numbers = #tpu.dot_dimension_numbers<[1], [0], [0], [1], [0, 0, 1, 1], [], []>} : vector<2x32xf32>, vector<32x1xf32>, vector<2x1xf32> -> vector<2x1xf32>
    %c0_142 = arith.constant 0 : index
    %c0_143 = arith.constant 0 : index
    %658 = vector.load %arg7[%c0_142, %c0_143] : memref<1x1xf32, #tpu.memory_space<vmem>>, vector<1x1xf32>
    %659 = vector.broadcast %658 : vector<1x1xf32> to vector<2x1xf32>
    %660 = arith.addf %657, %659 : vector<2x1xf32>
    %c0_144 = arith.constant 0 : index
    %c0_145 = arith.constant 0 : index
    %661 = vector.load %arg8[%c0_144, %c0_145] : memref<2x1xf32, #tpu.memory_space<vmem>>, vector<2x1xf32>
    tpu.vector_store %arg8[%c0_144, %c0_145], %660 {strides = array<i32>} : memref<2x1xf32, #tpu.memory_space<vmem>>, vector<2x1xf32>,
    return
  }
}

</mosaic_0001>

<bundles_post_ra>
// kernel: gru_forward.1
= control target key start
LH: loop header
LB: loop body
LE: loop exit
PB: predicated region body
PF: predicated region fallthrough
CT: control target
= control target key end

     0   :  { %s6220_s0 = inlined_call_operand.vmem [shape: f32[2,8,1], index: 0, kind: input, shape index: {}]   ;;  %s6221_s1 = inlined_call_operand.vmem [shape: f32[1,96], index: 1, kind: input, shape index: {}]   ;;  %s6222_s2 = inlined_call_operand.hbm [shape: f32[2,32,96], index: 2, kind: input, shape index: {}]   ;;  %s6223_s3 = inlined_call_operand.hbm [shape: f32[3,32,96], index: 3, kind: input, shape index: {}]   ;;  %s6224_s4 = inlined_call_operand.vmem [shape: f32[3,1,96], index: 4, kind: input, shape index: {}]   ;;  %s6225_s5 = inlined_call_operand.vmem [shape: f32[3,1,96], index: 5, kind: input, shape index: {}]   ;;  %s6226_s6 = inlined_call_operand.vmem [shape: f32[32,1], index: 6, kind: input, shape index: {}]   ;;  %s6227_s7 = inlined_call_operand.<no memory space> [shape: f32[1,1], index: 7, kind: input, shape index: {}]   ;;  %s6228_s8 = inlined_call_operand.vmem [shape: f32[2,1], index: 8, kind: output, shape index: {}]  }
   0x1   :  { %v13_v0 = vstv %s6227_s7 }
   0x2   :  { %14 = vst [vmem:[#allocation2] sm:$0x1] %v13_v0 }
   0x3   :  { %15 = vsyncpa [#allocation4], 0 }
   0x4   :  { %16 = vsyncpa [#allocation6], 0  ;;  %s5392_s29 = smov [#allocation3]   ;;  %s5344_s11 = scalar_lea.hbm %s6222_s2, 1024 }
   0x5   :  { %s26_s30 = sshll.u32 %s5392_s29, 4  ;;  %p5345_p0 = scmp.ne.s32.totalorder %s6222_s2, %s5344_s11  ;;  %s27_s30 = int_to_ptr.vmem [resolvable:$true] %s26_s30 }
   0x6   :  { %p5348_p1 = scmp.lt.u32.totalorder %s5344_s11, %s6222_s2 }
   0x8   :  { %p5350_p2 = pnand %p5348_p1, %p5345_p0 }
   0xa   :  { %5353 = shalt.err (!%p5350_p2)
}
   0xb   :  { %s5354_s7 = scalar_lea.vmem %s27_s30, 1024  ;;  %p5359_p4 = scmp.lt.s32.totalorder %s27_s30, %s27_s30 }
   0xc   :  { %p5355_p3 = scmp.ne.s32.totalorder %s27_s30, %s5354_s7  ;;  %p5360_p5 = scmp.lt.s32.totalorder %s5354_s7, %s5354_s7 }
   0xe   :  { %p5361_p6 = por %p5360_p5, %p5359_p4 }
  0x10   :  { %p5362_p7 = pnand %p5361_p6, %p5355_p3 }
  0x12   :  { %5365 = shalt.err (!%p5362_p7)
}
  0x13   :  { %s5393_s16 = smov 128   ;;  %s5394_s17 = smov 8  }
  0x14   :  { %32 = dma.hbm_to_vmem [thread:$0]  %s6222_s2, 1024, %s27_s30, [#allocation4], %s5393_s16, %s5393_s16, %s5394_s17  }
  0x15   :  { %s5395_s20 = smov [#allocation5]   ;;  %s5366_s24 = scalar_lea.hbm %s6223_s3, 1536 }
  0x16   :  { %s38_s21 = sshll.u32 %s5395_s20, 4  ;;  %p5367_p8 = scmp.ne.s32.totalorder %s6223_s3, %s5366_s24  ;;  %s39_s21 = int_to_ptr.vmem [resolvable:$true] %s38_s21 }
  0x17   :  { %p5370_p9 = scmp.lt.u32.totalorder %s5366_s24, %s6223_s3 }
  0x19   :  { %p5372_p10 = pnand %p5370_p9, %p5367_p8 }
  0x1b   :  { %5375 = shalt.err (!%p5372_p10)
}
  0x1c   :  { %s5376_s29 = scalar_lea.vmem %s39_s21, 1536  ;;  %p5381_p12 = scmp.lt.s32.totalorder %s39_s21, %s39_s21 }
  0x1d   :  { %p5377_p11 = scmp.ne.s32.totalorder %s39_s21, %s5376_s29  ;;  %p5382_p13 = scmp.lt.s32.totalorder %s5376_s29, %s5376_s29 }
  0x1f   :  { %p5383_p0 = por %p5382_p13, %p5381_p12 }
  0x21   :  { %p5384_p1 = pnand %p5383_p0, %p5377_p11 }
  0x23   :  { %5387 = shalt.err (!%p5384_p1)
}
  0x24   :  { %44 = dma.hbm_to_vmem [thread:$0]  %s6223_s3, 1536, %s39_s21, [#allocation6], %s5393_s16, %s5393_s16, %s5394_s17  }
  0x25   :  { %5388 = dma.done.wait [#allocation4], 1024  }
  0x26   :  { %5389 = vsyncadd [#allocation4], 4294966272 }
  0x27   :  { %5390 = dma.done.wait [#allocation6], 1536  }
  0x28   :  { %5391 = vsyncadd [#allocation6], 4294965760  ;;  %v5396_v1 = vmov 0.0|0.0   ;;  %vm5397_vm0 = vmmov 0   ;;  %v5398_v2 = vmov 0.0   ;;  %v5399_v3 = vmov 0  }
  0x29   :  { %4887 = vmatprep.subr.bf16.mxu0 %v5396_v1  ;;  %4444 = vmatprep.mubr.msk.f32.mxu0 %vm5397_vm0, %v5398_v2  ;;  %v69_v4 = vld [vmem:[#allocation5] sm:$0xff]  ;;  %v70_v5 = vld [vmem:[#allocation5 + $0x8] sm:$0xff]  ;;  %v71_v6 = vld [vmem:[#allocation5 + $0x10] sm:$0xff]  ;;  %s5400_s14 = smov 64   ;;  %s5401_s18 = smov 96   ;;  %vm258_vm1 = vcmask 1041409  }
  0x2a   :  { %5143 = vset.pattern.permute.xlu0 %v5399_v3  ;;  %4893 = vmatprep.subr.bf16.mxu1 %v5396_v1  ;;  %v5480_v7 = vpack.c.bf16 %v70_v5, %v69_v4  ;;  %v72_v8 = vld [vmem:[#allocation5 + $0x18] sm:$0xff]  ;;  %v174_v9 = vld [vmem:[%s6220_s0 + $0x8] sm:$0x1]  ;;  %v61_v45 = vld [vmem:[#allocation3 + $0x8] sm:$0xff]  ;;  %vm99_vm2 = vcmask 261120   ;;  %vm4141_vm3 = vcmask 1024  }
  0x2b   :  { %4455 = vmatprep.mubr.msk.f32.mxu1 %vm5397_vm0, %v5398_v2  ;;  %5144 = vset.pattern.permute.xlu1 %v5399_v3  ;;  %v5486_v10 = vpack.c.bf16 %v72_v8, %v71_v6  ;;  %v173_v11 = vld [vmem:[%s6220_s0] sm:$0x1]  ;;  %v60_v44 = vld [vmem:[#allocation3] sm:$0xff]  ;;  %v62_v46 = vld [vmem:[#allocation3 + $0x10] sm:$0xff] }
  0x2c   :  { %182 = vperm.xlu0 %5143, %v174_v9   ;;  %4889 = vmatpush3.bf16.msra.mxu0 %v5480_v7  ;;  %v5504_v12 = vld [vmem:[%s6225_s5] ss:$0 sm:$0xff]  ;;  %v5526_v47 = vpack.c.bf16 %v61_v45, %v60_v44  ;;  %v334_v63 = vld [vmem:[%s6220_s0 + $0x1] sm:$0x1]  ;;  %v335_v0 = vld [vmem:[%s6220_s0 + $0x9] sm:$0x1] }
  0x2d   :  { %4895 = vmatpush3.bf16.msra.mxu1 %v5480_v7  ;;  %4890 = vmatprep.subr.bf16.mxu0 %v5396_v1  ;;  %v5512_v18 = vld [vmem:[%s6221_s1] ss:$0 sm:$0xff]  ;;  %v74_v3 = vld [vmem:[#allocation5 + $0x20] sm:$0xff]  ;;  %v75_v4 = vld [vmem:[#allocation5 + $0x28] sm:$0xff] }
  0x2e   :  { %4896 = vmatprep.subr.bf16.mxu1 %v5396_v1  ;;  %v5518_v21 = vld [vmem:[%s6224_s4] ss:$0 sm:$0xff]  ;;  %v5549_v5 = vpack.c.bf16 %v75_v4, %v74_v3  ;;  %v76_v6 = vld [vmem:[#allocation5 + $0x30] sm:$0xff] }
  0x2f   :  { %v63_v48 = vld [vmem:[#allocation3 + $0x18] sm:$0xff] }
  0x30   :  { %177 = vperm.xlu0 %5143, %v173_v11   ;;  %4892 = vmatpush3.bf16.msra.mxu0 %v5486_v10  ;;  %v5529_v50 = vpack.c.bf16 %v63_v48, %v62_v46  ;;  %v77_v8 = vld [vmem:[#allocation5 + $0x38] sm:$0xff] }
  0x31   :  { %4898 = vmatpush3.bf16.msra.mxu1 %v5486_v10  ;;  %4899 = vmatprep.subr.bf16.mxu0 %v5396_v1  ;;  %v5554_v11 = vpack.c.bf16 %v77_v8, %v76_v6 }
  0x32   :  { %4905 = vmatprep.subr.bf16.mxu1 %v5396_v1 }
  0x33   :  { %4445 = vmatmul.mubr.f32.vlgmr.msra.gmra.mrb[0].mxu0 %v5398_v2 }
  0x34   :  { %4466 = vmatprep.mubr.msk.f32.mxu0 %vm5397_vm0, %v5398_v2  ;;  %4901 = vmatpush3.bf16.msra.mxu0 %v5526_v47 }
  0x35   :  { %4902 = vmatprep.subr.bf16.mxu0 %v5396_v1 }
  0x38   :  { %4904 = vmatpush3.bf16.msra.mxu0 %v5529_v50 }
  0x39   :  { %4911 = vmatprep.subr.bf16.mxu0 %v5396_v1 }
  0xab   :  { %v183_v17 = vpop.permute.xlu0 %182 }
  0xac   :  { %v192_v19 = vmul.f32 %v5512_v18, %v183_v17 }
  0xae   :  { %v200_v22 = vadd.f32 %v5518_v21, %v192_v19 }
  0xaf   :  { %v178_v20 = vpop.permute.xlu0 %177 }
  0xb0   :  { %v191_v23 = vmul.f32 %v5512_v18, %v178_v20  ;;  %v5580_v20 = vld [vmem:[%s6225_s5 + $0x1] ss:$0 sm:$0xff] }
  0xb2   :  { %v199_v24 = vadd.f32 %v5518_v21, %v191_v23 }
 0x106   :  { %v169_v13 = vpop.f32.mrb[0].mxu0 }
 0x107   :  { %v170_v14 = vadd.f32 %v5504_v12, %v169_v13  ;;  %v4446_v15 = vpop.f32.mrb[1].mxu0 }
 0x109   :  { %v202_v16 = vrot.slane %v170_v14, 1  ;;  %v205_v26 = vadd.f32 %v199_v24, %v170_v14 }
 0x10b   :  { %221 = vrot.lane.b32.xlu1 %v202_v16, %s5400_s14  ;;  %v206_v25 = vadd.f32 %v202_v16, %v200_v22  ;;  %v4156_v28 = vmul.f32 -1.442695, %v205_v26 }
 0x10d   :  { %v4157_v27 = vmul.f32 -1.442695, %v206_v25 }
 0x10f   :  { %219 = vrot.lane.b32.xlu1 %v170_v14, %s5400_s14  ;;  %5145 = vpow2.f32 %v4157_v27 }
 0x110   :  { %5147 = vpow2.f32 %v4156_v28 }
 0x119   :  { %v5146_v29 = vpop.eup %5145 }
 0x11a   :  { %v214_v30 = vadd.f32 1.0, %v5146_v29  ;;  %v5148_v31 = vpop.eup %5147 }
 0x11b   :  { %v213_v32 = vadd.f32 1.0, %v5148_v31 }
 0x11c   :  { %5149 = vrcp.f32 %v214_v30 }
 0x11d   :  { %5151 = vrcp.f32 %v213_v32 }
 0x126   :  { %v5150_v33 = vpop.eup %5149 }
 0x127   :  { %v5152_v36 = vpop.eup %5151  ;;  %v240_v51 = vsub.f32 1.0, %v5150_v33  ;;  %v252_v53 = vmul.f32 0.0, %v5150_v33 }
 0x128   :  { %v239_v56 = vsub.f32 1.0, %v5152_v36  ;;  %v251_v58 = vmul.f32 0.0, %v5152_v36 }
 0x17d   :  { %v222_v34 = vpop.permute.xlu1 %221 }
 0x17e   :  { %v226_v35 = vmul.f32 %v5150_v33, %v222_v34  ;;  %v5591_v33 = vld [vmem:[%s6224_s4 + $0x1] ss:$0 sm:$0xff] }
 0x180   :  { %231 = vrot.lane.b32.xlu0 %v226_v35, %s5400_s14 }
 0x181   :  { %v220_v37 = vpop.permute.xlu1 %219 }
 0x182   :  { %v225_v38 = vmul.f32 %v5152_v36, %v220_v37 }
 0x184   :  { %229 = vrot.lane.b32.xlu1 %v225_v38, %s5400_s14 }
 0x1f2   :  { %v232_v39 = vpop.permute.xlu0 %231 }
 0x1f3   :  { %v236_v40 = vadd.f32 %v232_v39, %v200_v22 }
 0x1f5   :  { %5153 = vtanh.f32 %v236_v40 }
 0x1f6   :  { %v230_v41 = vpop.permute.xlu1 %229 }
 0x1f7   :  { %v235_v42 = vadd.f32 %v230_v41, %v199_v24 }
 0x1f9   :  { %5155 = vtanh.f32 %v235_v42 }
 0x1ff   :  { %v5154_v43 = vpop.eup %5153 }
 0x200   :  { %245 = vrot.lane.b32.xlu0 %v5154_v43, %s5401_s18 }
 0x203   :  { %v5156_v49 = vpop.eup %5155 }
 0x204   :  { %243 = vrot.lane.b32.xlu1 %v5156_v49, %s5401_s18 }
 0x208   :  { %343 = vperm.xlu1 %5144, %v335_v0  }
 0x272   :  { %v246_v52 = vpop.permute.xlu0 %245 }
 0x273   :  { %v250_v54 = vmul.f32 %v246_v52, %v240_v51 }
 0x275   :  { %v5535_v55 = vadd.f32 %v252_v53, %v250_v54 }
 0x276   :  { %v244_v57 = vpop.permute.xlu1 %243 }
 0x277   :  { %v249_v59 = vmul.f32 %v244_v57, %v239_v56  ;;  %v257_v60 = vrot.slane %v5535_v55, 7 }
 0x279   :  { %v5538_v61 = vadd.f32 %v251_v58, %v249_v59 }
 0x27b   :  { %v259_v62 = vsel %vm258_vm1, %v257_v60, %v5538_v61 }
 0x27c   :  { %260 = vrot.lane.b32.xlu0 %v259_v62, %s5401_s18 }
 0x280   :  { %338 = vperm.xlu0 %5143, %v334_v63  }
 0x287   :  { %v344_v26 = vpop.permute.xlu1 %343 }
 0x288   :  { %v347_v28 = vmul.f32 %v5512_v18, %v344_v26 }
 0x28a   :  { %v349_v30 = vadd.f32 %v5518_v21, %v347_v28 }
 0x2ee   :  { %v261_v9 = vpop.permute.xlu0 %260 }
 0x2ef   :  { %4456 = vmatmul.mubr.msk.f32.vlgmr.msra.gmra.mrb[0].mxu1 %vm99_vm2, %v261_v9  ;;  %4467 = vmatmul.mubr.msk.f32.vlgmr.msra.gmra.mrb[2].mxu0 %vm99_vm2, %v261_v9 }
 0x2f0   :  { %4907 = vmatpush3.bf16.msra.mxu1 %v5549_v5  ;;  %4477 = vmatprep.mubr.msk.f32.mxu1 %vm5397_vm0, %v5398_v2 }
 0x2f1   :  { %4908 = vmatprep.subr.bf16.mxu1 %v5396_v1  ;;  %4913 = vmatpush3.bf16.msra.mxu0 %v5480_v7 }
 0x2f2   :  { %4914 = vmatprep.subr.bf16.mxu0 %v5396_v1  ;;  %4488 = vmatprep.mubr.msk.f32.mxu0 %vm5397_vm0, %v5398_v2 }
 0x2f4   :  { %4910 = vmatpush3.bf16.msra.mxu1 %v5554_v11 }
 0x2f5   :  { %4917 = vmatprep.subr.bf16.mxu1 %v5396_v1  ;;  %4916 = vmatpush3.bf16.msra.mxu0 %v5486_v10 }
 0x2f6   :  { %4923 = vmatprep.subr.bf16.mxu0 %v5396_v1 }
 0x2f7   :  { %4478 = vmatmul.mubr.f32.vlgmr.msra.gmra.mrb[2].mxu1 %v5398_v2 }
 0x2f8   :  { %4919 = vmatpush3.bf16.msra.mxu1 %v5526_v47  ;;  %4499 = vmatprep.mubr.msk.f32.mxu1 %vm5397_vm0, %v5398_v2 }
 0x2f9   :  { %4920 = vmatprep.subr.bf16.mxu1 %v5396_v1 }
 0x2fc   :  { %4922 = vmatpush3.bf16.msra.mxu1 %v5529_v50 }
 0x2fd   :  { %4929 = vmatprep.subr.bf16.mxu1 %v5396_v1 }
 0x2ff   :  { %v339_v25 = vpop.permute.xlu0 %338 }
 0x300   :  { %v346_v27 = vmul.f32 %v5512_v18, %v339_v25 }
 0x302   :  { %v348_v29 = vadd.f32 %v5518_v21, %v346_v27 }
 0x3c2   :  { %v330_v13 = vpop.f32.mrb[0].mxu1  ;;  %v476_v14 = vpop.f32.mrb[2].mxu0 }
 0x3c3   :  { %v331_v15 = vadd.f32 %v5504_v12, %v330_v13  ;;  %v4457_v16 = vpop.f32.mrb[1].mxu1  ;;  %v4468_v17 = vpop.f32.mrb[3].mxu0  ;;  %v477_v35 = vadd.f32 %v5591_v33, %v476_v14 }
 0x3c5   :  { %368 = vrot.lane.b32.xlu0 %v331_v15, %s5400_s14  ;;  %v351_v19 = vrot.slane %v331_v15, 1  ;;  %v354_v31 = vadd.f32 %v348_v29, %v331_v15 }
 0x3c7   :  { %370 = vrot.lane.b32.xlu1 %v351_v19, %s5400_s14  ;;  %v355_v32 = vadd.f32 %v351_v19, %v349_v30  ;;  %v4159_v34 = vmul.f32 -1.442695, %v354_v31  ;;  %v66_v31 = vld [vmem:[#allocation3 + $0x28] sm:$0xff] }
 0x3c9   :  { %v4160_v36 = vmul.f32 -1.442695, %v355_v32  ;;  %5157 = vpow2.f32 %v4159_v34  ;;  %v67_v34 = vld [vmem:[#allocation3 + $0x30] sm:$0xff] }
 0x3ca   :  { %v552_v22 = vpop.f32.mrb[2].mxu1 }
 0x3cb   :  { %v553_v23 = vadd.f32 %v5580_v20, %v552_v22  ;;  %v4479_v24 = vpop.f32.mrb[3].mxu1  ;;  %5159 = vpow2.f32 %v4160_v36 }
 0x3cd   :  { %564 = vrot.lane.b32.xlu1 %v553_v23, %s5400_s14  ;;  %v556_v37 = vadd.f32 %v553_v23, %v477_v35 }
 0x3cf   :  { %v4164_v38 = vmul.f32 -1.442695, %v556_v37 }
 0x3d1   :  { %5161 = vpow2.f32 %v4164_v38  ;;  %v79_v38 = vld [vmem:[#allocation5 + $0x40] sm:$0xff] }
 0x3d3   :  { %v5158_v39 = vpop.eup %5157 }
 0x3d4   :  { %v362_v41 = vadd.f32 1.0, %v5158_v39  ;;  %v80_v39 = vld [vmem:[#allocation5 + $0x48] sm:$0xff] }
 0x3d5   :  { %v5160_v40 = vpop.eup %5159 }
 0x3d6   :  { %v363_v42 = vadd.f32 1.0, %v5160_v40  ;;  %5163 = vrcp.f32 %v362_v41  ;;  %v5636_v40 = vpack.c.bf16 %v80_v39, %v79_v38  ;;  %v81_v41 = vld [vmem:[#allocation5 + $0x50] sm:$0xff] }
 0x3d8   :  { %5165 = vrcp.f32 %v363_v42  ;;  %v82_v42 = vld [vmem:[#allocation5 + $0x58] sm:$0xff] }
 0x3db   :  { %v5162_v43 = vpop.eup %5161 }
 0x3dc   :  { %v560_v44 = vadd.f32 1.0, %v5162_v43 }
 0x3de   :  { %5167 = vrcp.f32 %v560_v44  ;;  %v5643_v44 = vpack.c.bf16 %v82_v42, %v81_v41 }
 0x3e0   :  { %v5164_v45 = vpop.eup %5163 }
 0x3e1   :  { %v388_v8 = vsub.f32 1.0, %v5164_v45  ;;  %v400_v17 = vmul.f32 %v5164_v45, %v5538_v61  ;;  %v660_v61 = vld [vmem:[%s6220_s0 + $0x2] sm:$0x1] }
 0x3e2   :  { %v5166_v49 = vpop.eup %5165 }
 0x3e3   :  { %v389_v9 = vsub.f32 1.0, %v5166_v49  ;;  %v401_v15 = vmul.f32 %v5166_v49, %v5535_v55  ;;  %v661_v55 = vld [vmem:[%s6220_s0 + $0xa] sm:$0x1] }
 0x3e8   :  { %v5168_v53 = vpop.eup %5167 }
 0x3e9   :  { %v574_v24 = vsub.f32 1.0, %v5168_v53  ;;  %v580_v26 = vmul.f32 0.0, %v5168_v53 }
 0x437   :  { %v369_v46 = vpop.permute.xlu0 %368 }
 0x438   :  { %v374_v48 = vmul.f32 %v5164_v45, %v369_v46 }
 0x439   :  { %v371_v51 = vpop.permute.xlu1 %370 }
 0x43a   :  { %v375_v52 = vmul.f32 %v5166_v49, %v371_v51  ;;  %378 = vrot.lane.b32.xlu1 %v374_v48, %s5400_s14 }
 0x43c   :  { %380 = vrot.lane.b32.xlu0 %v375_v52, %s5400_s14 }
 0x43f   :  { %v565_v54 = vpop.permute.xlu1 %564 }
 0x440   :  { %v567_v56 = vmul.f32 %v5168_v53, %v565_v54 }
 0x442   :  { %569 = vrot.lane.b32.xlu0 %v567_v56, %s5400_s14 }
 0x4ac   :  { %v379_v57 = vpop.permute.xlu1 %378 }
 0x4ad   :  { %v384_v58 = vadd.f32 %v379_v57, %v348_v29 }
 0x4ae   :  { %v381_v59 = vpop.permute.xlu0 %380 }
 0x4af   :  { %5169 = vtanh.f32 %v384_v58  ;;  %v385_v60 = vadd.f32 %v381_v59, %v349_v30  ;;  %v65_v30 = vld [vmem:[#allocation3 + $0x20] sm:$0xff] }
 0x4b0   :  { %v5620_v32 = vpack.c.bf16 %v66_v31, %v65_v30  ;;  %v5671_v59 = vld [vmem:[%s6225_s5 + $0x2] ss:$0 sm:$0xff] }
 0x4b1   :  { %5171 = vtanh.f32 %v385_v60 }
 0x4b4   :  { %v570_v62 = vpop.permute.xlu0 %569 }
 0x4b5   :  { %v572_v63 = vadd.f32 %v570_v62, %v477_v35  ;;  %v68_v35 = vld [vmem:[#allocation3 + $0x38] sm:$0xff] }
 0x4b6   :  { %v5626_v37 = vpack.c.bf16 %v68_v35, %v67_v34 }
 0x4b7   :  { %5173 = vtanh.f32 %v572_v63 }
 0x4b9   :  { %v5170_v0 = vpop.eup %5169 }
 0x4ba   :  { %392 = vrot.lane.b32.xlu0 %v5170_v0, %s5401_s18 }
 0x4bb   :  { %v5172_v3 = vpop.eup %5171 }
 0x4bc   :  { %394 = vrot.lane.b32.xlu1 %v5172_v3, %s5401_s18 }
 0x4c1   :  { %v5174_v4 = vpop.eup %5173 }
 0x4c2   :  { %576 = vrot.lane.b32.xlu1 %v5174_v4, %s5401_s18 }
 0x52c   :  { %v393_v6 = vpop.permute.xlu0 %392 }
 0x52d   :  { %v398_v14 = vmul.f32 %v393_v6, %v388_v8 }
 0x52e   :  { %v395_v13 = vpop.permute.xlu1 %394 }
 0x52f   :  { %v399_v16 = vmul.f32 %v395_v13, %v389_v9  ;;  %v5604_v22 = vadd.f32 %v400_v17, %v398_v14 }
 0x531   :  { %v5602_v19 = vadd.f32 %v401_v15, %v399_v16 }
 0x533   :  { %v584_v23 = vrot.slane %v5602_v19, 7 }
 0x534   :  { %v577_v25 = vpop.permute.xlu1 %576 }
 0x535   :  { %v579_v27 = vmul.f32 %v577_v25, %v574_v24  ;;  %v585_v28 = vsel %vm258_vm1, %v584_v23, %v5604_v22  ;;  %v5683_v24 = vld [vmem:[%s6224_s4 + $0x2] ss:$0 sm:$0xff] }
 0x536   :  { %586 = vrot.lane.b32.xlu0 %v585_v28, %s5401_s18 }
 0x537   :  { %v5610_v29 = vadd.f32 %v580_v26, %v579_v27 }
 0x539   :  { %801 = vrot.lane.b32.xlu1 %v5610_v29, %s5401_s18 }
 0x53a   :  { %669 = vperm.xlu0 %5143, %v661_v55  }
 0x53d   :  { %664 = vperm.xlu1 %5144, %v660_v61  }
 0x5a8   :  { %v587_v36 = vpop.permute.xlu0 %586 }
 0x5a9   :  { %4489 = vmatmul.mubr.msk.f32.vlgmr.msra.gmra.mrb[4].mxu0 %vm99_vm2, %v587_v36  ;;  %4500 = vmatmul.mubr.msk.f32.vlgmr.msra.gmra.mrb[4].mxu1 %vm99_vm2, %v587_v36 }
 0x5aa   :  { %4925 = vmatpush3.bf16.msra.mxu0 %v5549_v5  ;;  %4931 = vmatpush3.bf16.msra.mxu1 %v5620_v32 }
 0x5ab   :  { %4926 = vmatprep.subr.bf16.mxu0 %v5396_v1  ;;  %4932 = vmatprep.subr.bf16.mxu1 %v5396_v1  ;;  %v802_v43 = vpop.permute.xlu1 %801 }
 0x5ac   :  { %4510 = vmatprep.mubr.msk.f32.mxu0 %vm5397_vm0, %v5398_v2  ;;  %4521 = vmatprep.mubr.msk.f32.mxu1 %vm5397_vm0, %v5398_v2 }
 0x5ae   :  { %4928 = vmatpush3.bf16.msra.mxu0 %v5554_v11  ;;  %4934 = vmatpush3.bf16.msra.mxu1 %v5626_v37 }
 0x5af   :  { %4935 = vmatprep.subr.bf16.mxu0 %v5396_v1  ;;  %4941 = vmatprep.subr.bf16.mxu1 %v5396_v1 }
 0x5b1   :  { %4511 = vmatmul.mubr.msk.f32.vlgmr.msra.gmra.mrb[6].mxu0 %vm99_vm2, %v802_v43  ;;  %4522 = vmatmul.mubr.msk.f32.vlgmr.msra.gmra.mrb[6].mxu1 %vm99_vm2, %v802_v43 }
 0x5b2   :  { %4937 = vmatpush3.bf16.msra.mxu0 %v5636_v40  ;;  %4532 = vmatprep.mubr.msk.f32.mxu0 %vm5397_vm0, %v5398_v2 }
 0x5b3   :  { %4938 = vmatprep.subr.bf16.mxu0 %v5396_v1  ;;  %4943 = vmatpush3.bf16.msra.mxu1 %v5480_v7 }
 0x5b4   :  { %4944 = vmatprep.subr.bf16.mxu1 %v5396_v1  ;;  %4543 = vmatprep.mubr.msk.f32.mxu1 %vm5397_vm0, %v5398_v2 }
 0x5b6   :  { %4940 = vmatpush3.bf16.msra.mxu0 %v5643_v44 }
 0x5b7   :  { %4947 = vmatprep.subr.bf16.mxu0 %v5396_v1  ;;  %4946 = vmatpush3.bf16.msra.mxu1 %v5486_v10 }
 0x5b8   :  { %4953 = vmatprep.subr.bf16.mxu1 %v5396_v1 }
 0x5b9   :  { %4533 = vmatmul.mubr.f32.vlgmr.msra.gmra.mrb[8].mxu0 %v5398_v2  ;;  %v670_v3 = vpop.permute.xlu0 %669 }
 0x5ba   :  { %4949 = vmatpush3.bf16.msra.mxu0 %v5526_v47  ;;  %4554 = vmatprep.mubr.msk.f32.mxu0 %vm5397_vm0, %v5398_v2  ;;  %v673_v6 = vmul.f32 %v5512_v18, %v670_v3 }
 0x5bb   :  { %4950 = vmatprep.subr.bf16.mxu0 %v5396_v1 }
 0x5bc   :  { %v665_v0 = vpop.permute.xlu1 %664  ;;  %v675_v9 = vadd.f32 %v5518_v21, %v673_v6 }
 0x5bd   :  { %v672_v4 = vmul.f32 %v5512_v18, %v665_v0 }
 0x5be   :  { %4952 = vmatpush3.bf16.msra.mxu0 %v5529_v50 }
 0x5bf   :  { %4959 = vmatprep.subr.bf16.mxu0 %v5396_v1  ;;  %v674_v8 = vadd.f32 %v5518_v21, %v672_v4 }
 0x67c   :  { %v656_v45 = vpop.f32.mrb[4].mxu0  ;;  %v796_v46 = vpop.f32.mrb[4].mxu1 }
 0x67d   :  { %v657_v48 = vadd.f32 %v5504_v12, %v656_v45  ;;  %v4490_v49 = vpop.f32.mrb[5].mxu0  ;;  %v4501_v51 = vpop.f32.mrb[5].mxu1  ;;  %v797_v16 = vadd.f32 %v5591_v33, %v796_v46 }
 0x67f   :  { %694 = vrot.lane.b32.xlu1 %v657_v48, %s5400_s14  ;;  %v677_v52 = vrot.slane %v657_v48, 1  ;;  %v680_v13 = vadd.f32 %v674_v8, %v657_v48 }
 0x681   :  { %696 = vrot.lane.b32.xlu0 %v677_v52, %s5400_s14  ;;  %v681_v14 = vadd.f32 %v677_v52, %v675_v9  ;;  %v4166_v15 = vmul.f32 -1.442695, %v680_v13 }
 0x683   :  { %v4167_v17 = vmul.f32 -1.442695, %v681_v14  ;;  %5175 = vpow2.f32 %v4166_v15 }
 0x684   :  { %v871_v53 = vpop.f32.mrb[6].mxu0  ;;  %v973_v54 = vpop.f32.mrb[6].mxu1 }
 0x685   :  { %v872_v56 = vadd.f32 %v5580_v20, %v871_v53  ;;  %v4512_v57 = vpop.f32.mrb[7].mxu0  ;;  %v4523_v58 = vpop.f32.mrb[7].mxu1  ;;  %5177 = vpow2.f32 %v4167_v17  ;;  %v974_v26 = vadd.f32 %v5683_v24, %v973_v54 }
 0x687   :  { %883 = vrot.lane.b32.xlu0 %v872_v56, %s5400_s14  ;;  %v875_v23 = vadd.f32 %v872_v56, %v797_v16 }
 0x689   :  { %v4170_v25 = vmul.f32 -1.442695, %v875_v23 }
 0x68b   :  { %5179 = vpow2.f32 %v4170_v25 }
 0x68c   :  { %v1049_v60 = vpop.f32.mrb[8].mxu0 }
 0x68d   :  { %v1050_v62 = vadd.f32 %v5671_v59, %v1049_v60  ;;  %v4534_v63 = vpop.f32.mrb[9].mxu0  ;;  %v5176_v28 = vpop.eup %5175 }
 0x68e   :  { %v688_v30 = vadd.f32 1.0, %v5176_v28 }
 0x68f   :  { %1061 = vrot.lane.b32.xlu1 %v1050_v62, %s5400_s14  ;;  %v1053_v27 = vadd.f32 %v1050_v62, %v974_v26  ;;  %v5178_v55 = vpop.eup %5177 }
 0x690   :  { %v689_v31 = vadd.f32 1.0, %v5178_v55 }
 0x691   :  { %v4174_v61 = vmul.f32 -1.442695, %v1053_v27 }
 0x693   :  { %5181 = vpow2.f32 %v4174_v61 }
 0x694   :  { %5183 = vrcp.f32 %v688_v30 }
 0x695   :  { %v5180_v34 = vpop.eup %5179  ;;  %5185 = vrcp.f32 %v689_v31 }
 0x696   :  { %v879_v35 = vadd.f32 1.0, %v5180_v34 }
 0x698   :  { %5187 = vrcp.f32 %v879_v35 }
 0x69d   :  { %v5182_v36 = vpop.eup %5181 }
 0x69e   :  { %v5184_v38 = vpop.eup %5183  ;;  %v1057_v43 = vadd.f32 1.0, %v5182_v36 }
 0x69f   :  { %v5186_v42 = vpop.eup %5185  ;;  %v714_v14 = vsub.f32 1.0, %v5184_v38  ;;  %v726_v27 = vmul.f32 %v5184_v38, %v5604_v22  ;;  %v1158_v22 = vld [vmem:[%s6220_s0 + $0xb] sm:$0x1] }
 0x6a0   :  { %5189 = vrcp.f32 %v1057_v43  ;;  %v715_v15 = vsub.f32 1.0, %v5186_v42  ;;  %v727_v23 = vmul.f32 %v5186_v42, %v5602_v19 }
 0x6a2   :  { %v5188_v48 = vpop.eup %5187 }
 0x6a3   :  { %v893_v61 = vsub.f32 1.0, %v5188_v48  ;;  %v899_v31 = vmul.f32 %v5188_v48, %v5610_v29 }
 0x6aa   :  { %v5190_v52 = vpop.eup %5189 }
 0x6ab   :  { %v1071_v36 = vsub.f32 1.0, %v5190_v52 }
 0x6f1   :  { %v695_v39 = vpop.permute.xlu1 %694 }
 0x6f2   :  { %v700_v41 = vmul.f32 %v5184_v38, %v695_v39  ;;  %v1077_v39 = vmul.f32 0.0, %v5190_v52 }
 0x6f3   :  { %v697_v45 = vpop.permute.xlu0 %696 }
 0x6f4   :  { %v701_v46 = vmul.f32 %v5186_v42, %v697_v45  ;;  %704 = vrot.lane.b32.xlu1 %v700_v41, %s5400_s14  ;;  %v1157_v42 = vld [vmem:[%s6220_s0 + $0x3] sm:$0x1] }
 0x6f6   :  { %706 = vrot.lane.b32.xlu0 %v701_v46, %s5400_s14 }
 0x6f9   :  { %v884_v49 = vpop.permute.xlu0 %883 }
 0x6fa   :  { %v886_v51 = vmul.f32 %v5188_v48, %v884_v49 }
 0x6fc   :  { %888 = vrot.lane.b32.xlu0 %v886_v51, %s5400_s14 }
 0x701   :  { %v1062_v53 = vpop.permute.xlu1 %1061 }
 0x702   :  { %v1064_v54 = vmul.f32 %v5190_v52, %v1062_v53 }
 0x704   :  { %1066 = vrot.lane.b32.xlu1 %v1064_v54, %s5400_s14 }
 0x766   :  { %v705_v56 = vpop.permute.xlu1 %704 }
 0x767   :  { %v710_v57 = vadd.f32 %v705_v56, %v674_v8 }
 0x768   :  { %v707_v58 = vpop.permute.xlu0 %706 }
 0x769   :  { %5191 = vtanh.f32 %v710_v57  ;;  %v711_v60 = vadd.f32 %v707_v58, %v675_v9 }
 0x76b   :  { %5193 = vtanh.f32 %v711_v60 }
 0x76e   :  { %v889_v62 = vpop.permute.xlu0 %888 }
 0x76f   :  { %v891_v63 = vadd.f32 %v889_v62, %v797_v16 }
 0x771   :  { %5195 = vtanh.f32 %v891_v63 }
 0x773   :  { %v5192_v0 = vpop.eup %5191 }
 0x774   :  { %718 = vrot.lane.b32.xlu1 %v5192_v0, %s5401_s18 }
 0x775   :  { %v5194_v3 = vpop.eup %5193 }
 0x776   :  { %v1067_v4 = vpop.permute.xlu1 %1066  ;;  %720 = vrot.lane.b32.xlu0 %v5194_v3, %s5401_s18 }
 0x777   :  { %v1069_v6 = vadd.f32 %v1067_v4, %v974_v26 }
 0x779   :  { %5197 = vtanh.f32 %v1069_v6 }
 0x77b   :  { %v5196_v13 = vpop.eup %5195 }
 0x77c   :  { %895 = vrot.lane.b32.xlu0 %v5196_v13, %s5401_s18 }
 0x783   :  { %v5198_v8 = vpop.eup %5197 }
 0x784   :  { %1073 = vrot.lane.b32.xlu1 %v5198_v8, %s5401_s18 }
 0x7e6   :  { %v719_v9 = vpop.permute.xlu1 %718 }
 0x7e7   :  { %v724_v17 = vmul.f32 %v719_v9, %v714_v14 }
 0x7e8   :  { %v721_v16 = vpop.permute.xlu0 %720 }
 0x7e9   :  { %v725_v25 = vmul.f32 %v721_v16, %v715_v15  ;;  %v5698_v26 = vadd.f32 %v726_v27, %v724_v17 }
 0x7eb   :  { %v5696_v28 = vadd.f32 %v727_v23, %v725_v25 }
 0x7ed   :  { %v1081_v55 = vrot.slane %v5696_v28, 7 }
 0x7ee   :  { %v896_v30 = vpop.permute.xlu0 %895 }
 0x7ef   :  { %v898_v34 = vmul.f32 %v896_v30, %v893_v61  ;;  %v1082_v35 = vsel %vm258_vm1, %v1081_v55, %v5698_v26 }
 0x7f0   :  { %1083 = vrot.lane.b32.xlu0 %v1082_v35, %s5401_s18 }
 0x7f1   :  { %v5705_v19 = vadd.f32 %v899_v31, %v898_v34 }
 0x7f3   :  { %1298 = vrot.lane.b32.xlu1 %v5705_v19, %s5401_s18 }
 0x7f6   :  { %v1074_v38 = vpop.permute.xlu1 %1073 }
 0x7f7   :  { %v1076_v41 = vmul.f32 %v1074_v38, %v1071_v36  ;;  %1166 = vperm.xlu1 %5144, %v1158_v22  }
 0x7f9   :  { %v5712_v29 = vadd.f32 %v1077_v39, %v1076_v41 }
 0x7fb   :  { %1469 = vrot.lane.b32.xlu0 %v5712_v29, %s5401_s18 }
 0x7ff   :  { %1161 = vperm.xlu0 %5143, %v1157_v42  }
 0x862   :  { %v1084_v43 = vpop.permute.xlu0 %1083 }
 0x863   :  { %4544 = vmatmul.mubr.msk.f32.vlgmr.msra.gmra.mrb[8].mxu1 %vm99_vm2, %v1084_v43  ;;  %4555 = vmatmul.mubr.msk.f32.vlgmr.msra.gmra.mrb[10].mxu0 %vm99_vm2, %v1084_v43 }
 0x864   :  { %4955 = vmatpush3.bf16.msra.mxu1 %v5549_v5  ;;  %4961 = vmatpush3.bf16.msra.mxu0 %v5620_v32 }
 0x865   :  { %4956 = vmatprep.subr.bf16.mxu1 %v5396_v1  ;;  %4962 = vmatprep.subr.bf16.mxu0 %v5396_v1  ;;  %v1299_v45 = vpop.permute.xlu1 %1298 }
 0x866   :  { %4565 = vmatprep.mubr.msk.f32.mxu1 %vm5397_vm0, %v5398_v2  ;;  %4576 = vmatprep.mubr.msk.f32.mxu0 %vm5397_vm0, %v5398_v2 }
 0x868   :  { %4958 = vmatpush3.bf16.msra.mxu1 %v5554_v11  ;;  %4964 = vmatpush3.bf16.msra.mxu0 %v5626_v37 }
 0x869   :  { %4965 = vmatprep.subr.bf16.mxu1 %v5396_v1  ;;  %4971 = vmatprep.subr.bf16.mxu0 %v5396_v1 }
 0x86b   :  { %4566 = vmatmul.mubr.msk.f32.vlgmr.msra.gmra.mrb[10].mxu1 %vm99_vm2, %v1299_v45  ;;  %4577 = vmatmul.mubr.msk.f32.vlgmr.msra.gmra.mrb[12].mxu0 %vm99_vm2, %v1299_v45 }
 0x86c   :  { %4967 = vmatpush3.bf16.msra.mxu1 %v5636_v40  ;;  %4587 = vmatprep.mubr.msk.f32.mxu1 %vm5397_vm0, %v5398_v2 }
 0x86d   :  { %4968 = vmatprep.subr.bf16.mxu1 %v5396_v1  ;;  %4973 = vmatpush3.bf16.msra.mxu0 %v5480_v7  ;;  %v1470_v46 = vpop.permute.xlu0 %1469 }
 0x86e   :  { %4974 = vmatprep.subr.bf16.mxu0 %v5396_v1  ;;  %4598 = vmatprep.mubr.msk.f32.mxu0 %vm5397_vm0, %v5398_v2 }
 0x870   :  { %4970 = vmatpush3.bf16.msra.mxu1 %v5643_v44 }
 0x871   :  { %4977 = vmatprep.subr.bf16.mxu1 %v5396_v1  ;;  %4976 = vmatpush3.bf16.msra.mxu0 %v5486_v10 }
 0x872   :  { %4983 = vmatprep.subr.bf16.mxu0 %v5396_v1 }
 0x873   :  { %4588 = vmatmul.mubr.msk.f32.vlgmr.msra.gmra.mrb[12].mxu1 %vm99_vm2, %v1470_v46 }
 0x874   :  { %4979 = vmatpush3.bf16.msra.mxu1 %v5526_v47  ;;  %4609 = vmatprep.mubr.msk.f32.mxu1 %vm5397_vm0, %v5398_v2 }
 0x875   :  { %4980 = vmatprep.subr.bf16.mxu1 %v5396_v1 }
 0x876   :  { %v1167_v4 = vpop.permute.xlu1 %1166 }
 0x877   :  { %v1170_v13 = vmul.f32 %v5512_v18, %v1167_v4 }
 0x878   :  { %4982 = vmatpush3.bf16.msra.mxu1 %v5529_v50 }
 0x879   :  { %4989 = vmatprep.subr.bf16.mxu1 %v5396_v1  ;;  %v1172_v9 = vadd.f32 %v5518_v21, %v1170_v13 }
 0x936   :  { %v1153_v48 = vpop.f32.mrb[8].mxu1  ;;  %v1293_v49 = vpop.f32.mrb[10].mxu0 }
 0x937   :  { %v1154_v51 = vadd.f32 %v5504_v12, %v1153_v48  ;;  %v4545_v52 = vpop.f32.mrb[9].mxu1  ;;  %v4556_v53 = vpop.f32.mrb[11].mxu0  ;;  %v1294_v17 = vadd.f32 %v5591_v33, %v1293_v49 }
 0x938   :  { %v1162_v12 = vpop.permute.xlu0 %1161 }
 0x939   :  { %1191 = vrot.lane.b32.xlu0 %v1154_v51, %s5400_s14  ;;  %v1174_v54 = vrot.slane %v1154_v51, 1  ;;  %v1169_v6 = vmul.f32 %v5512_v18, %v1162_v12 }
 0x93b   :  { %1193 = vrot.lane.b32.xlu1 %v1174_v54, %s5400_s14  ;;  %v1171_v8 = vadd.f32 %v5518_v21, %v1169_v6  ;;  %v1178_v15 = vadd.f32 %v1174_v54, %v1172_v9 }
 0x93d   :  { %v1177_v14 = vadd.f32 %v1171_v8, %v1154_v51  ;;  %v4177_v23 = vmul.f32 -1.442695, %v1178_v15 }
 0x93e   :  { %v1368_v56 = vpop.f32.mrb[10].mxu1  ;;  %v1464_v57 = vpop.f32.mrb[12].mxu0 }
 0x93f   :  { %v1369_v58 = vadd.f32 %v5580_v20, %v1368_v56  ;;  %v4567_v60 = vpop.f32.mrb[11].mxu1  ;;  %v4578_v62 = vpop.f32.mrb[13].mxu0  ;;  %v4176_v16 = vmul.f32 -1.442695, %v1177_v14  ;;  %v1465_v55 = vadd.f32 %v5683_v24, %v1464_v57 }
 0x941   :  { %1380 = vrot.lane.b32.xlu1 %v1369_v58, %s5400_s14  ;;  %5199 = vpow2.f32 %v4176_v16  ;;  %v1372_v25 = vadd.f32 %v1369_v58, %v1294_v17 }
 0x942   :  { %5201 = vpow2.f32 %v4177_v23 }
 0x943   :  { %v4180_v27 = vmul.f32 -1.442695, %v1372_v25 }
 0x945   :  { %5203 = vpow2.f32 %v4180_v27 }
 0x946   :  { %v1539_v63 = vpop.f32.mrb[12].mxu1 }
 0x947   :  { %v1540_v0 = vadd.f32 %v5671_v59, %v1539_v63  ;;  %v4589_v3 = vpop.f32.mrb[13].mxu1 }
 0x949   :  { %1551 = vrot.lane.b32.xlu0 %v1540_v0, %s5400_s14  ;;  %v1543_v61 = vadd.f32 %v1540_v0, %v1465_v55 }
 0x94b   :  { %v5200_v30 = vpop.eup %5199  ;;  %v4183_v31 = vmul.f32 -1.442695, %v1543_v61 }
 0x94c   :  { %v5202_v18 = vpop.eup %5201  ;;  %v1185_v34 = vadd.f32 1.0, %v5200_v30 }
 0x94d   :  { %v1186_v35 = vadd.f32 1.0, %v5202_v18  ;;  %5205 = vpow2.f32 %v4183_v31 }
 0x94e   :  { %5207 = vrcp.f32 %v1185_v34 }
 0x94f   :  { %v5204_v21 = vpop.eup %5203  ;;  %5209 = vrcp.f32 %v1186_v35 }
 0x950   :  { %v1376_v22 = vadd.f32 1.0, %v5204_v21 }
 0x952   :  { %5211 = vrcp.f32 %v1376_v22 }
 0x957   :  { %v5206_v36 = vpop.eup %5205 }
 0x958   :  { %v5208_v38 = vpop.eup %5207  ;;  %v1547_v43 = vadd.f32 1.0, %v5206_v36 }
 0x959   :  { %v5210_v42 = vpop.eup %5209  ;;  %v1223_v25 = vmul.f32 %v5208_v38, %v5698_v26  ;;  %v1648_v26 = vld [vmem:[%s6220_s0 + $0xc] sm:$0x1] }
 0x95a   :  { %5213 = vrcp.f32 %v1547_v43  ;;  %v1212_v14 = vsub.f32 1.0, %v5210_v42 }
 0x95c   :  { %v5212_v48 = vpop.eup %5211 }
 0x95d   :  { %v1390_v30 = vsub.f32 1.0, %v5212_v48  ;;  %v1396_v31 = vmul.f32 %v5212_v48, %v5705_v19 }
 0x964   :  { %v5214_v52 = vpop.eup %5213 }
 0x965   :  { %v1561_v21 = vsub.f32 1.0, %v5214_v52  ;;  %v1567_v36 = vmul.f32 %v5214_v52, %v5712_v29 }
 0x9ab   :  { %v1192_v39 = vpop.permute.xlu0 %1191 }
 0x9ac   :  { %v1197_v41 = vmul.f32 %v5208_v38, %v1192_v39  ;;  %v1647_v39 = vld [vmem:[%s6220_s0 + $0x4] sm:$0x1] }
 0x9ad   :  { %v1194_v45 = vpop.permute.xlu1 %1193 }
 0x9ae   :  { %v1198_v46 = vmul.f32 %v5210_v42, %v1194_v45  ;;  %1201 = vrot.lane.b32.xlu0 %v1197_v41, %s5400_s14 }
 0x9b0   :  { %1203 = vrot.lane.b32.xlu1 %v1198_v46, %s5400_s14  ;;  %v5839_v46 = vld [vmem:[%s6225_s5] ss:$0 sm:$0xff] }
 0x9b3   :  { %v1381_v49 = vpop.permute.xlu1 %1380 }
 0x9b4   :  { %v1383_v51 = vmul.f32 %v5212_v48, %v1381_v49 }
 0x9b6   :  { %1385 = vrot.lane.b32.xlu1 %v1383_v51, %s5400_s14 }
 0x9bb   :  { %v1552_v53 = vpop.permute.xlu0 %1551 }
 0x9bc   :  { %v1554_v54 = vmul.f32 %v5214_v52, %v1552_v53 }
 0x9be   :  { %1556 = vrot.lane.b32.xlu0 %v1554_v54, %s5400_s14 }
 0xa20   :  { %v1202_v56 = vpop.permute.xlu0 %1201 }
 0xa21   :  { %v1207_v57 = vadd.f32 %v1202_v56, %v1171_v8 }
 0xa22   :  { %v1204_v58 = vpop.permute.xlu1 %1203 }
 0xa23   :  { %5215 = vtanh.f32 %v1207_v57  ;;  %v1208_v60 = vadd.f32 %v1204_v58, %v1172_v9  ;;  %v1211_v9 = vsub.f32 1.0, %v5208_v38 }
 0xa25   :  { %5217 = vtanh.f32 %v1208_v60 }
 0xa28   :  { %v1386_v62 = vpop.permute.xlu1 %1385 }
 0xa29   :  { %v1388_v63 = vadd.f32 %v1386_v62, %v1294_v17  ;;  %v1224_v17 = vmul.f32 %v5210_v42, %v5696_v28 }
 0xa2b   :  { %5219 = vtanh.f32 %v1388_v63 }
 0xa2d   :  { %v5216_v0 = vpop.eup %5215 }
 0xa2e   :  { %1215 = vrot.lane.b32.xlu0 %v5216_v0, %s5401_s18 }
 0xa2f   :  { %v5218_v3 = vpop.eup %5217 }
 0xa30   :  { %v1557_v12 = vpop.permute.xlu0 %1556  ;;  %1217 = vrot.lane.b32.xlu1 %v5218_v3, %s5401_s18 }
 0xa31   :  { %v1559_v4 = vadd.f32 %v1557_v12, %v1465_v55  ;;  %v5851_v12 = vld [vmem:[%s6221_s1] ss:$0 sm:$0xff] }
 0xa33   :  { %5221 = vtanh.f32 %v1559_v4 }
 0xa35   :  { %v5220_v6 = vpop.eup %5219 }
 0xa36   :  { %1392 = vrot.lane.b32.xlu1 %v5220_v6, %s5401_s18  ;;  %v5858_v6 = vld [vmem:[%s6224_s4] ss:$0 sm:$0xff] }
 0xa3d   :  { %v5222_v13 = vpop.eup %5221 }
 0xa3e   :  { %1563 = vrot.lane.b32.xlu0 %v5222_v13, %s5401_s18 }
 0xaa0   :  { %v1216_v8 = vpop.permute.xlu0 %1215 }
 0xaa1   :  { %v1221_v16 = vmul.f32 %v1216_v8, %v1211_v9 }
 0xaa2   :  { %v1218_v15 = vpop.permute.xlu1 %1217 }
 0xaa3   :  { %v1222_v23 = vmul.f32 %v1218_v15, %v1212_v14  ;;  %v5779_v55 = vadd.f32 %v1223_v25, %v1221_v16 }
 0xaa5   :  { %v5777_v27 = vadd.f32 %v1224_v17, %v1222_v23 }
 0xaa7   :  { %v1571_v61 = vrot.slane %v5777_v27, 7 }
 0xaa8   :  { %v1393_v18 = vpop.permute.xlu1 %1392 }
 0xaa9   :  { %v1395_v34 = vmul.f32 %v1393_v18, %v1390_v30  ;;  %v1572_v35 = vsel %vm258_vm1, %v1571_v61, %v5779_v55 }
 0xaaa   :  { %1573 = vrot.lane.b32.xlu1 %v1572_v35, %s5401_s18 }
 0xaab   :  { %v5786_v28 = vadd.f32 %v1396_v31, %v1395_v34 }
 0xaad   :  { %1788 = vrot.lane.b32.xlu0 %v5786_v28, %s5401_s18 }
 0xab0   :  { %v1564_v22 = vpop.permute.xlu0 %1563 }
 0xab1   :  { %v1566_v19 = vmul.f32 %v1564_v22, %v1561_v21  ;;  %1656 = vperm.xlu0 %5143, %v1648_v26  }
 0xab3   :  { %v5794_v38 = vadd.f32 %v1567_v36, %v1566_v19 }
 0xab5   :  { %1959 = vrot.lane.b32.xlu1 %v5794_v38, %s5401_s18 }
 0xab9   :  { %1651 = vperm.xlu1 %5144, %v1647_v39  }
 0xb1c   :  { %v1574_v41 = vpop.permute.xlu1 %1573 }
 0xb1d   :  { %4599 = vmatmul.mubr.msk.f32.vlgmr.msra.gmra.mrb[14].mxu0 %vm99_vm2, %v1574_v41  ;;  %4610 = vmatmul.mubr.msk.f32.vlgmr.msra.gmra.mrb[14].mxu1 %vm99_vm2, %v1574_v41 }
 0xb1e   :  { %4985 = vmatpush3.bf16.msra.mxu0 %v5549_v5  ;;  %4991 = vmatpush3.bf16.msra.mxu1 %v5620_v32 }
 0xb1f   :  { %4986 = vmatprep.subr.bf16.mxu0 %v5396_v1  ;;  %4992 = vmatprep.subr.bf16.mxu1 %v5396_v1  ;;  %v1789_v29 = vpop.permute.xlu0 %1788 }
 0xb20   :  { %4620 = vmatprep.mubr.msk.f32.mxu0 %vm5397_vm0, %v5398_v2  ;;  %4631 = vmatprep.mubr.msk.f32.mxu1 %vm5397_vm0, %v5398_v2 }
 0xb22   :  { %4988 = vmatpush3.bf16.msra.mxu0 %v5554_v11  ;;  %4994 = vmatpush3.bf16.msra.mxu1 %v5626_v37 }
 0xb23   :  { %4995 = vmatprep.subr.bf16.mxu0 %v5396_v1  ;;  %5001 = vmatprep.subr.bf16.mxu1 %v5396_v1 }
 0xb25   :  { %4621 = vmatmul.mubr.msk.f32.vlgmr.msra.gmra.mrb[16].mxu0 %vm99_vm2, %v1789_v29  ;;  %4632 = vmatmul.mubr.msk.f32.vlgmr.msra.gmra.mrb[16].mxu1 %vm99_vm2, %v1789_v29 }
 0xb26   :  { %4997 = vmatpush3.bf16.msra.mxu0 %v5636_v40  ;;  %4642 = vmatprep.mubr.msk.f32.mxu0 %vm5397_vm0, %v5398_v2 }
 0xb27   :  { %4998 = vmatprep.subr.bf16.mxu0 %v5396_v1  ;;  %5003 = vmatpush3.bf16.msra.mxu1 %v5480_v7  ;;  %v1960_v42 = vpop.permute.xlu1 %1959 }
 0xb28   :  { %5004 = vmatprep.subr.bf16.mxu1 %v5396_v1  ;;  %4653 = vmatprep.mubr.msk.f32.mxu1 %vm5397_vm0, %v5398_v2 }
 0xb2a   :  { %5000 = vmatpush3.bf16.msra.mxu0 %v5643_v44 }
 0xb2b   :  { %5007 = vmatprep.subr.bf16.mxu0 %v5396_v1  ;;  %5006 = vmatpush3.bf16.msra.mxu1 %v5486_v10 }
 0xb2c   :  { %5013 = vmatprep.subr.bf16.mxu1 %v5396_v1 }
 0xb2d   :  { %4643 = vmatmul.mubr.msk.f32.vlgmr.msra.gmra.mrb[18].mxu0 %vm99_vm2, %v1960_v42 }
 0xb2e   :  { %5009 = vmatpush3.bf16.msra.mxu0 %v5526_v47  ;;  %4664 = vmatprep.mubr.msk.f32.mxu0 %vm5397_vm0, %v5398_v2 }
 0xb2f   :  { %5010 = vmatprep.subr.bf16.mxu0 %v5396_v1 }
 0xb30   :  { %v1657_v3 = vpop.permute.xlu0 %1656 }
 0xb32   :  { %5012 = vmatpush3.bf16.msra.mxu0 %v5529_v50 }
 0xb33   :  { %5019 = vmatprep.subr.bf16.mxu0 %v5396_v1 }
 0xb38   :  { %v1652_v0 = vpop.permute.xlu1 %1651 }
 0xb39   :  { %v1659_v4 = vmul.f32 %v5851_v12, %v1652_v0 }
 0xb3b   :  { %v1661_v13 = vadd.f32 %v5858_v6, %v1659_v4 }
 0xbf0   :  { %v1643_v43 = vpop.f32.mrb[14].mxu0  ;;  %v1783_v45 = vpop.f32.mrb[14].mxu1 }
 0xbf1   :  { %v1644_v48 = vadd.f32 %v5839_v46, %v1643_v43  ;;  %v4600_v49 = vpop.f32.mrb[15].mxu0  ;;  %v4611_v51 = vpop.f32.mrb[15].mxu1  ;;  %v1784_v16 = vadd.f32 %v5591_v33, %v1783_v45 }
 0xbf3   :  { %1681 = vrot.lane.b32.xlu1 %v1644_v48, %s5400_s14  ;;  %v1664_v52 = vrot.slane %v1644_v48, 1  ;;  %v1667_v9 = vadd.f32 %v1661_v13, %v1644_v48 }
 0xbf5   :  { %1683 = vrot.lane.b32.xlu0 %v1664_v52, %s5400_s14  ;;  %v4185_v15 = vmul.f32 -1.442695, %v1667_v9 }
 0xbf7   :  { %5223 = vpow2.f32 %v4185_v15 }
 0xbf8   :  { %v1858_v53 = vpop.f32.mrb[16].mxu0  ;;  %v1954_v54 = vpop.f32.mrb[16].mxu1 }
 0xbf9   :  { %v1859_v56 = vadd.f32 %v5580_v20, %v1858_v53  ;;  %v4622_v57 = vpop.f32.mrb[17].mxu0  ;;  %v4633_v58 = vpop.f32.mrb[17].mxu1  ;;  %v1660_v20 = vmul.f32 %v5851_v12, %v1657_v3  ;;  %v1955_v61 = vadd.f32 %v5683_v24, %v1954_v54 }
 0xbfb   :  { %1870 = vrot.lane.b32.xlu0 %v1859_v56, %s5400_s14  ;;  %v1662_v8 = vadd.f32 %v5858_v6, %v1660_v20  ;;  %v1862_v23 = vadd.f32 %v1859_v56, %v1784_v16 }
 0xbfd   :  { %v1668_v14 = vadd.f32 %v1664_v52, %v1662_v8  ;;  %v4189_v25 = vmul.f32 -1.442695, %v1862_v23 }
 0xbff   :  { %v4186_v17 = vmul.f32 -1.442695, %v1668_v14 }
 0xc00   :  { %v2029_v60 = vpop.f32.mrb[18].mxu0 }
 0xc01   :  { %v2030_v62 = vadd.f32 %v5671_v59, %v2029_v60  ;;  %v4644_v63 = vpop.f32.mrb[19].mxu0  ;;  %5225 = vpow2.f32 %v4186_v17  ;;  %v5224_v18 = vpop.eup %5223 }
 0xc02   :  { %5227 = vpow2.f32 %v4189_v25  ;;  %v1675_v35 = vadd.f32 1.0, %v5224_v18 }
 0xc03   :  { %2041 = vrot.lane.b32.xlu1 %v2030_v62, %s5400_s14  ;;  %v2033_v30 = vadd.f32 %v2030_v62, %v1955_v61 }
 0xc05   :  { %v4192_v34 = vmul.f32 -1.442695, %v2033_v30 }
 0xc07   :  { %5229 = vpow2.f32 %v4192_v34 }
 0xc08   :  { %5231 = vrcp.f32 %v1675_v35 }
 0xc0b   :  { %v5226_v31 = vpop.eup %5225 }
 0xc0c   :  { %v1676_v26 = vadd.f32 1.0, %v5226_v31  ;;  %v5228_v21 = vpop.eup %5227 }
 0xc0d   :  { %v1866_v22 = vadd.f32 1.0, %v5228_v21 }
 0xc0e   :  { %5233 = vrcp.f32 %v1676_v26 }
 0xc0f   :  { %5235 = vrcp.f32 %v1866_v22 }
 0xc11   :  { %v5230_v33 = vpop.eup %5229 }
 0xc12   :  { %v5232_v36 = vpop.eup %5231  ;;  %v2037_v29 = vadd.f32 1.0, %v5230_v33 }
 0xc13   :  { %v1701_v9 = vsub.f32 1.0, %v5232_v36  ;;  %v1713_v25 = vmul.f32 %v5232_v36, %v5779_v55  ;;  %v2138_v55 = vld [vmem:[%s6220_s0 + $0xd] sm:$0x1] }
 0xc14   :  { %5237 = vrcp.f32 %v2037_v29 }
 0xc18   :  { %v5234_v41 = vpop.eup %5233 }
 0xc19   :  { %v5236_v45 = vpop.eup %5235  ;;  %v1702_v14 = vsub.f32 1.0, %v5234_v41  ;;  %v1714_v17 = vmul.f32 %v5234_v41, %v5777_v27 }
 0xc1a   :  { %v1880_v31 = vsub.f32 1.0, %v5236_v45  ;;  %v1886_v35 = vmul.f32 %v5236_v45, %v5786_v28 }
 0xc1e   :  { %v5238_v51 = vpop.eup %5237 }
 0xc1f   :  { %v2051_v22 = vsub.f32 1.0, %v5238_v51 }
 0xc65   :  { %v1682_v19 = vpop.permute.xlu1 %1681 }
 0xc66   :  { %v1687_v39 = vmul.f32 %v5232_v36, %v1682_v19  ;;  %v2057_v36 = vmul.f32 %v5238_v51, %v5794_v38 }
 0xc67   :  { %v1684_v42 = vpop.permute.xlu0 %1683 }
 0xc68   :  { %v1688_v43 = vmul.f32 %v5234_v41, %v1684_v42  ;;  %1691 = vrot.lane.b32.xlu1 %v1687_v39, %s5400_s14  ;;  %v2137_v39 = vld [vmem:[%s6220_s0 + $0x5] sm:$0x1] }
 0xc6a   :  { %1693 = vrot.lane.b32.xlu0 %v1688_v43, %s5400_s14 }
 0xc6d   :  { %v1871_v48 = vpop.permute.xlu0 %1870 }
 0xc6e   :  { %v1873_v49 = vmul.f32 %v5236_v45, %v1871_v48 }
 0xc70   :  { %1875 = vrot.lane.b32.xlu0 %v1873_v49, %s5400_s14 }
 0xc75   :  { %v2042_v52 = vpop.permute.xlu1 %2041 }
 0xc76   :  { %v2044_v53 = vmul.f32 %v5238_v51, %v2042_v52 }
 0xc78   :  { %2046 = vrot.lane.b32.xlu1 %v2044_v53, %s5400_s14 }
 0xcda   :  { %v1692_v54 = vpop.permute.xlu1 %1691 }
 0xcdb   :  { %v1697_v56 = vadd.f32 %v1692_v54, %v1661_v13  ;;  %v5939_v54 = vld [vmem:[%s6225_s5 + $0x1] ss:$0 sm:$0xff] }
 0xcdc   :  { %v1694_v57 = vpop.permute.xlu0 %1693 }
 0xcdd   :  { %5239 = vtanh.f32 %v1697_v56  ;;  %v1698_v58 = vadd.f32 %v1694_v57, %v1662_v8 }
 0xcdf   :  { %5241 = vtanh.f32 %v1698_v58 }
 0xce2   :  { %v1876_v60 = vpop.permute.xlu0 %1875 }
 0xce3   :  { %v1878_v62 = vadd.f32 %v1876_v60, %v1784_v16 }
 0xce5   :  { %5243 = vtanh.f32 %v1878_v62 }
 0xce7   :  { %v5240_v63 = vpop.eup %5239 }
 0xce8   :  { %1705 = vrot.lane.b32.xlu1 %v5240_v63, %s5401_s18 }
 0xce9   :  { %v5242_v0 = vpop.eup %5241 }
 0xcea   :  { %v2047_v3 = vpop.permute.xlu1 %2046  ;;  %1707 = vrot.lane.b32.xlu0 %v5242_v0, %s5401_s18 }
 0xceb   :  { %v2049_v4 = vadd.f32 %v2047_v3, %v1955_v61 }
 0xced   :  { %5245 = vtanh.f32 %v2049_v4 }
 0xcef   :  { %v5244_v20 = vpop.eup %5243 }
 0xcf0   :  { %1882 = vrot.lane.b32.xlu0 %v5244_v20, %s5401_s18 }
 0xcf7   :  { %v5246_v13 = vpop.eup %5245 }
 0xcf8   :  { %2053 = vrot.lane.b32.xlu1 %v5246_v13, %s5401_s18 }
 0xd5a   :  { %v1706_v8 = vpop.permute.xlu1 %1705 }
 0xd5b   :  { %v1711_v16 = vmul.f32 %v1706_v8, %v1701_v9 }
 0xd5c   :  { %v1708_v15 = vpop.permute.xlu0 %1707 }
 0xd5d   :  { %v1712_v23 = vmul.f32 %v1708_v15, %v1702_v14  ;;  %v5876_v61 = vadd.f32 %v1713_v25, %v1711_v16 }
 0xd5f   :  { %v5874_v30 = vadd.f32 %v1714_v17, %v1712_v23 }
 0xd61   :  { %v2061_v18 = vrot.slane %v5874_v30, 7 }
 0xd62   :  { %v1883_v34 = vpop.permute.xlu0 %1882 }
 0xd63   :  { %v1885_v26 = vmul.f32 %v1883_v34, %v1880_v31  ;;  %v2062_v21 = vsel %vm258_vm1, %v2061_v18, %v5876_v61 }
 0xd64   :  { %2063 = vrot.lane.b32.xlu0 %v2062_v21, %s5401_s18 }
 0xd65   :  { %v5883_v27 = vadd.f32 %v1886_v35, %v1885_v26 }
 0xd67   :  { %2278 = vrot.lane.b32.xlu1 %v5883_v27, %s5401_s18 }
 0xd6a   :  { %v2054_v33 = vpop.permute.xlu1 %2053 }
 0xd6b   :  { %v2056_v28 = vmul.f32 %v2054_v33, %v2051_v22  ;;  %2146 = vperm.xlu1 %5144, %v2138_v55  }
 0xd6d   :  { %v5891_v19 = vadd.f32 %v2057_v36, %v2056_v28 }
 0xd6f   :  { %2449 = vrot.lane.b32.xlu0 %v5891_v19, %s5401_s18 }
 0xd73   :  { %2141 = vperm.xlu0 %5143, %v2137_v39  }
 0xdd6   :  { %v2064_v41 = vpop.permute.xlu0 %2063 }
 0xdd7   :  { %4654 = vmatmul.mubr.msk.f32.vlgmr.msra.gmra.mrb[18].mxu1 %vm99_vm2, %v2064_v41  ;;  %4665 = vmatmul.mubr.msk.f32.vlgmr.msra.gmra.mrb[20].mxu0 %vm99_vm2, %v2064_v41 }
 0xdd8   :  { %5015 = vmatpush3.bf16.msra.mxu1 %v5549_v5  ;;  %5021 = vmatpush3.bf16.msra.mxu0 %v5620_v32 }
 0xdd9   :  { %5016 = vmatprep.subr.bf16.mxu1 %v5396_v1  ;;  %5022 = vmatprep.subr.bf16.mxu0 %v5396_v1  ;;  %v2279_v38 = vpop.permute.xlu1 %2278 }
 0xdda   :  { %4675 = vmatprep.mubr.msk.f32.mxu1 %vm5397_vm0, %v5398_v2  ;;  %4686 = vmatprep.mubr.msk.f32.mxu0 %vm5397_vm0, %v5398_v2 }
 0xddc   :  { %5018 = vmatpush3.bf16.msra.mxu1 %v5554_v11  ;;  %5024 = vmatpush3.bf16.msra.mxu0 %v5626_v37 }
 0xddd   :  { %5025 = vmatprep.subr.bf16.mxu1 %v5396_v1  ;;  %5031 = vmatprep.subr.bf16.mxu0 %v5396_v1 }
 0xddf   :  { %4676 = vmatmul.mubr.msk.f32.vlgmr.msra.gmra.mrb[20].mxu1 %vm99_vm2, %v2279_v38  ;;  %4687 = vmatmul.mubr.msk.f32.vlgmr.msra.gmra.mrb[22].mxu0 %vm99_vm2, %v2279_v38 }
 0xde0   :  { %5027 = vmatpush3.bf16.msra.mxu1 %v5636_v40  ;;  %4697 = vmatprep.mubr.msk.f32.mxu1 %vm5397_vm0, %v5398_v2 }
 0xde1   :  { %5028 = vmatprep.subr.bf16.mxu1 %v5396_v1  ;;  %5033 = vmatpush3.bf16.msra.mxu0 %v5480_v7  ;;  %v2450_v29 = vpop.permute.xlu0 %2449 }
 0xde2   :  { %5034 = vmatprep.subr.bf16.mxu0 %v5396_v1  ;;  %4708 = vmatprep.mubr.msk.f32.mxu0 %vm5397_vm0, %v5398_v2 }
 0xde4   :  { %5030 = vmatpush3.bf16.msra.mxu1 %v5643_v44 }
 0xde5   :  { %5037 = vmatprep.subr.bf16.mxu1 %v5396_v1  ;;  %5036 = vmatpush3.bf16.msra.mxu0 %v5486_v10 }
 0xde6   :  { %5043 = vmatprep.subr.bf16.mxu0 %v5396_v1 }
 0xde7   :  { %4698 = vmatmul.mubr.msk.f32.vlgmr.msra.gmra.mrb[22].mxu1 %vm99_vm2, %v2450_v29 }
 0xde8   :  { %5039 = vmatpush3.bf16.msra.mxu1 %v5526_v47  ;;  %4719 = vmatprep.mubr.msk.f32.mxu1 %vm5397_vm0, %v5398_v2 }
 0xde9   :  { %5040 = vmatprep.subr.bf16.mxu1 %v5396_v1 }
 0xdea   :  { %v2147_v3 = vpop.permute.xlu1 %2146 }
 0xdeb   :  { %v2150_v20 = vmul.f32 %v5851_v12, %v2147_v3 }
 0xdec   :  { %5042 = vmatpush3.bf16.msra.mxu1 %v5529_v50 }
 0xded   :  { %5049 = vmatprep.subr.bf16.mxu1 %v5396_v1  ;;  %v2152_v8 = vadd.f32 %v5858_v6, %v2150_v20 }
 0xdf2   :  { %v2142_v0 = vpop.permute.xlu0 %2141 }
 0xdf3   :  { %v2149_v4 = vmul.f32 %v5851_v12, %v2142_v0 }
 0xdf5   :  { %v2151_v13 = vadd.f32 %v5858_v6, %v2149_v4 }
 0xeaa   :  { %v2133_v42 = vpop.f32.mrb[18].mxu1  ;;  %v2273_v43 = vpop.f32.mrb[20].mxu0 }
 0xeab   :  { %v2134_v45 = vadd.f32 %v5839_v46, %v2133_v42  ;;  %v4655_v48 = vpop.f32.mrb[19].mxu1  ;;  %v4666_v49 = vpop.f32.mrb[21].mxu0 }
 0xead   :  { %2171 = vrot.lane.b32.xlu0 %v2134_v45, %s5400_s14  ;;  %v2154_v51 = vrot.slane %v2134_v45, 1  ;;  %v2157_v9 = vadd.f32 %v2151_v13, %v2134_v45 }
 0xeaf   :  { %2173 = vrot.lane.b32.xlu1 %v2154_v51, %s5400_s14  ;;  %v2158_v14 = vadd.f32 %v2154_v51, %v2152_v8  ;;  %v4194_v15 = vmul.f32 -1.442695, %v2157_v9 }
 0xeb1   :  { %v4195_v17 = vmul.f32 -1.442695, %v2158_v14  ;;  %5247 = vpow2.f32 %v4194_v15 }
 0xeb2   :  { %v2348_v52 = vpop.f32.mrb[20].mxu1  ;;  %v2444_v53 = vpop.f32.mrb[22].mxu0 }
 0xeb3   :  { %v2349_v56 = vadd.f32 %v5939_v54, %v2348_v52  ;;  %v4677_v57 = vpop.f32.mrb[21].mxu1  ;;  %v4688_v58 = vpop.f32.mrb[23].mxu0  ;;  %5249 = vpow2.f32 %v4195_v17  ;;  %v2445_v18 = vadd.f32 %v5683_v24, %v2444_v53 }
 0xeb5   :  { %2360 = vrot.lane.b32.xlu1 %v2349_v56, %s5400_s14 }
 0xeba   :  { %v2519_v60 = vpop.f32.mrb[22].mxu1 }
 0xebb   :  { %v2520_v62 = vadd.f32 %v5671_v59, %v2519_v60  ;;  %v4699_v63 = vpop.f32.mrb[23].mxu1  ;;  %v5952_v59 = vld [vmem:[%s6224_s4 + $0x1] ss:$0 sm:$0xff]  ;;  %v5248_v34 = vpop.eup %5247 }
 0xebc   :  { %v2274_v16 = vadd.f32 %v5952_v59, %v2273_v43  ;;  %v2165_v21 = vadd.f32 1.0, %v5248_v34 }
 0xebd   :  { %2531 = vrot.lane.b32.xlu0 %v2520_v62, %s5400_s14  ;;  %v2523_v31 = vadd.f32 %v2520_v62, %v2445_v18  ;;  %v5250_v35 = vpop.eup %5249 }
 0xebe   :  { %v2352_v23 = vadd.f32 %v2349_v56, %v2274_v16  ;;  %v2166_v55 = vadd.f32 1.0, %v5250_v35 }
 0xebf   :  { %v4201_v26 = vmul.f32 -1.442695, %v2523_v31 }
 0xec0   :  { %v4198_v25 = vmul.f32 -1.442695, %v2352_v23 }
 0xec2   :  { %5251 = vpow2.f32 %v4198_v25 }
 0xec3   :  { %5253 = vpow2.f32 %v4201_v26 }
 0xec4   :  { %5255 = vrcp.f32 %v2165_v21 }
 0xec5   :  { %5257 = vrcp.f32 %v2166_v55 }
 0xecc   :  { %v5252_v22 = vpop.eup %5251 }
 0xecd   :  { %v2356_v33 = vadd.f32 1.0, %v5252_v22  ;;  %v5254_v36 = vpop.eup %5253 }
 0xece   :  { %v5256_v28 = vpop.eup %5255  ;;  %v2527_v29 = vadd.f32 1.0, %v5254_v36 }
 0xecf   :  { %5259 = vrcp.f32 %v2356_v33  ;;  %v5258_v38 = vpop.eup %5257  ;;  %v2191_v9 = vsub.f32 1.0, %v5256_v28  ;;  %v2203_v25 = vmul.f32 %v5256_v28, %v5876_v61  ;;  %v2628_v61 = vld [vmem:[%s6220_s0 + $0xe] sm:$0x1] }
 0xed0   :  { %5261 = vrcp.f32 %v2527_v29  ;;  %v2192_v14 = vsub.f32 1.0, %v5258_v38  ;;  %v2204_v17 = vmul.f32 %v5258_v38, %v5874_v30 }
 0xed9   :  { %v5260_v43 = vpop.eup %5259 }
 0xeda   :  { %v5262_v49 = vpop.eup %5261  ;;  %v2370_v35 = vsub.f32 1.0, %v5260_v43  ;;  %v2376_v21 = vmul.f32 %v5260_v43, %v5883_v27 }
 0xedb   :  { %v2541_v33 = vsub.f32 1.0, %v5262_v49 }
 0xf1f   :  { %v2172_v39 = vpop.permute.xlu0 %2171 }
 0xf20   :  { %v2177_v41 = vmul.f32 %v5256_v28, %v2172_v39  ;;  %v2547_v28 = vmul.f32 %v5262_v49, %v5891_v19 }
 0xf21   :  { %v2174_v24 = vpop.permute.xlu1 %2173 }
 0xf22   :  { %v2178_v42 = vmul.f32 %v5258_v38, %v2174_v24  ;;  %2181 = vrot.lane.b32.xlu0 %v2177_v41, %s5400_s14  ;;  %v2627_v41 = vld [vmem:[%s6220_s0 + $0x6] sm:$0x1] }
 0xf24   :  { %2183 = vrot.lane.b32.xlu1 %v2178_v42, %s5400_s14 }
 0xf27   :  { %v2361_v45 = vpop.permute.xlu1 %2360 }
 0xf28   :  { %v2363_v48 = vmul.f32 %v5260_v43, %v2361_v45 }
 0xf2a   :  { %2365 = vrot.lane.b32.xlu1 %v2363_v48, %s5400_s14 }
 0xf2f   :  { %v2532_v51 = vpop.permute.xlu0 %2531 }
 0xf30   :  { %v2534_v52 = vmul.f32 %v5262_v49, %v2532_v51 }
 0xf32   :  { %2536 = vrot.lane.b32.xlu0 %v2534_v52, %s5400_s14 }
 0xf94   :  { %v2182_v53 = vpop.permute.xlu0 %2181 }
 0xf95   :  { %v2187_v56 = vadd.f32 %v2182_v53, %v2151_v13 }
 0xf96   :  { %v2184_v57 = vpop.permute.xlu1 %2183 }
 0xf97   :  { %5263 = vtanh.f32 %v2187_v56  ;;  %v2188_v58 = vadd.f32 %v2184_v57, %v2152_v8  ;;  %v6033_v57 = vld [vmem:[%s6225_s5 + $0x2] ss:$0 sm:$0xff] }
 0xf99   :  { %5265 = vtanh.f32 %v2188_v58 }
 0xf9c   :  { %v2366_v60 = vpop.permute.xlu1 %2365 }
 0xf9d   :  { %v2368_v62 = vadd.f32 %v2366_v60, %v2274_v16 }
 0xf9f   :  { %5267 = vtanh.f32 %v2368_v62 }
 0xfa1   :  { %v5264_v63 = vpop.eup %5263 }
 0xfa2   :  { %2195 = vrot.lane.b32.xlu0 %v5264_v63, %s5401_s18 }
 0xfa3   :  { %v5266_v0 = vpop.eup %5265 }
 0xfa4   :  { %v2537_v3 = vpop.permute.xlu0 %2536  ;;  %2197 = vrot.lane.b32.xlu1 %v5266_v0, %s5401_s18 }
 0xfa5   :  { %v2539_v4 = vadd.f32 %v2537_v3, %v2445_v18 }
 0xfa7   :  { %5269 = vtanh.f32 %v2539_v4 }
 0xfa9   :  { %v5268_v20 = vpop.eup %5267 }
 0xfaa   :  { %2372 = vrot.lane.b32.xlu1 %v5268_v20, %s5401_s18 }
 0xfb1   :  { %v5270_v13 = vpop.eup %5269 }
 0xfb2   :  { %2543 = vrot.lane.b32.xlu0 %v5270_v13, %s5401_s18 }
0x1014   :  { %v2196_v8 = vpop.permute.xlu0 %2195 }
0x1015   :  { %v2201_v16 = vmul.f32 %v2196_v8, %v2191_v9 }
0x1016   :  { %v2198_v15 = vpop.permute.xlu1 %2197 }
0x1017   :  { %v2202_v23 = vmul.f32 %v2198_v15, %v2192_v14  ;;  %v5968_v18 = vadd.f32 %v2203_v25, %v2201_v16 }
0x1019   :  { %v5966_v31 = vadd.f32 %v2204_v17, %v2202_v23  ;;  %v6045_v23 = vld [vmem:[%s6224_s4 + $0x2] ss:$0 sm:$0xff] }
0x101b   :  { %v2551_v34 = vrot.slane %v5966_v31, 7 }
0x101c   :  { %v2373_v26 = vpop.permute.xlu1 %2372 }
0x101d   :  { %v2375_v55 = vmul.f32 %v2373_v26, %v2370_v35  ;;  %v2552_v22 = vsel %vm258_vm1, %v2551_v34, %v5968_v18 }
0x101e   :  { %2553 = vrot.lane.b32.xlu1 %v2552_v22, %s5401_s18 }
0x101f   :  { %v5975_v30 = vadd.f32 %v2376_v21, %v2375_v55 }
0x1021   :  { %2768 = vrot.lane.b32.xlu0 %v5975_v30, %s5401_s18 }
0x1024   :  { %v2544_v36 = vpop.permute.xlu0 %2543 }
0x1025   :  { %v2546_v27 = vmul.f32 %v2544_v36, %v2541_v33  ;;  %2636 = vperm.xlu0 %5143, %v2628_v61  }
0x1027   :  { %v5983_v39 = vadd.f32 %v2547_v28, %v2546_v27 }
0x1029   :  { %2939 = vrot.lane.b32.xlu1 %v5983_v39, %s5401_s18 }
0x102d   :  { %2631 = vperm.xlu1 %5144, %v2627_v41  }
0x1090   :  { %v2554_v38 = vpop.permute.xlu1 %2553 }
0x1091   :  { %4709 = vmatmul.mubr.msk.f32.vlgmr.msra.gmra.mrb[24].mxu0 %vm99_vm2, %v2554_v38  ;;  %4720 = vmatmul.mubr.msk.f32.vlgmr.msra.gmra.mrb[24].mxu1 %vm99_vm2, %v2554_v38 }
0x1092   :  { %5045 = vmatpush3.bf16.msra.mxu0 %v5549_v5  ;;  %5051 = vmatpush3.bf16.msra.mxu1 %v5620_v32 }
0x1093   :  { %5046 = vmatprep.subr.bf16.mxu0 %v5396_v1  ;;  %5052 = vmatprep.subr.bf16.mxu1 %v5396_v1  ;;  %v2769_v19 = vpop.permute.xlu0 %2768 }
0x1094   :  { %4730 = vmatprep.mubr.msk.f32.mxu0 %vm5397_vm0, %v5398_v2  ;;  %4741 = vmatprep.mubr.msk.f32.mxu1 %vm5397_vm0, %v5398_v2 }
0x1096   :  { %5048 = vmatpush3.bf16.msra.mxu0 %v5554_v11  ;;  %5054 = vmatpush3.bf16.msra.mxu1 %v5626_v37 }
0x1097   :  { %5055 = vmatprep.subr.bf16.mxu0 %v5396_v1  ;;  %5061 = vmatprep.subr.bf16.mxu1 %v5396_v1 }
0x1099   :  { %4731 = vmatmul.mubr.msk.f32.vlgmr.msra.gmra.mrb[26].mxu0 %vm99_vm2, %v2769_v19  ;;  %4742 = vmatmul.mubr.msk.f32.vlgmr.msra.gmra.mrb[26].mxu1 %vm99_vm2, %v2769_v19 }
0x109a   :  { %5057 = vmatpush3.bf16.msra.mxu0 %v5636_v40  ;;  %4752 = vmatprep.mubr.msk.f32.mxu0 %vm5397_vm0, %v5398_v2 }
0x109b   :  { %5058 = vmatprep.subr.bf16.mxu0 %v5396_v1  ;;  %5063 = vmatpush3.bf16.msra.mxu1 %v5480_v7  ;;  %v2940_v29 = vpop.permute.xlu1 %2939 }
0x109c   :  { %5064 = vmatprep.subr.bf16.mxu1 %v5396_v1  ;;  %4763 = vmatprep.mubr.msk.f32.mxu1 %vm5397_vm0, %v5398_v2 }
0x109e   :  { %5060 = vmatpush3.bf16.msra.mxu0 %v5643_v44 }
0x109f   :  { %5067 = vmatprep.subr.bf16.mxu0 %v5396_v1  ;;  %5066 = vmatpush3.bf16.msra.mxu1 %v5486_v10 }
0x10a0   :  { %5073 = vmatprep.subr.bf16.mxu1 %v5396_v1 }
0x10a1   :  { %4753 = vmatmul.mubr.msk.f32.vlgmr.msra.gmra.mrb[28].mxu0 %vm99_vm2, %v2940_v29 }
0x10a2   :  { %5069 = vmatpush3.bf16.msra.mxu0 %v5526_v47  ;;  %4774 = vmatprep.mubr.msk.f32.mxu0 %vm5397_vm0, %v5398_v2 }
0x10a3   :  { %5070 = vmatprep.subr.bf16.mxu0 %v5396_v1 }
0x10a4   :  { %v2637_v63 = vpop.permute.xlu0 %2636 }
0x10a5   :  { %v2640_v3 = vmul.f32 %v5851_v12, %v2637_v63 }
0x10a6   :  { %5072 = vmatpush3.bf16.msra.mxu0 %v5529_v50 }
0x10a7   :  { %5079 = vmatprep.subr.bf16.mxu0 %v5396_v1  ;;  %v2642_v20 = vadd.f32 %v5858_v6, %v2640_v3 }
0x10ac   :  { %v2632_v62 = vpop.permute.xlu1 %2631 }
0x10ad   :  { %v2639_v0 = vmul.f32 %v5851_v12, %v2632_v62 }
0x10af   :  { %v2641_v4 = vadd.f32 %v5858_v6, %v2639_v0 }
0x1164   :  { %v2623_v7 = vpop.f32.mrb[24].mxu0  ;;  %v2763_v24 = vpop.f32.mrb[24].mxu1 }
0x1165   :  { %v2624_v10 = vadd.f32 %v5839_v46, %v2623_v7  ;;  %v4710_v42 = vpop.f32.mrb[25].mxu0  ;;  %v4721_v43 = vpop.f32.mrb[25].mxu1  ;;  %v2764_v14 = vadd.f32 %v5952_v59, %v2763_v24 }
0x1167   :  { %2661 = vrot.lane.b32.xlu1 %v2624_v10, %s5400_s14  ;;  %v2644_v45 = vrot.slane %v2624_v10, 1  ;;  %v2647_v13 = vadd.f32 %v2641_v4, %v2624_v10 }
0x1169   :  { %2663 = vrot.lane.b32.xlu0 %v2644_v45, %s5400_s14  ;;  %v2648_v8 = vadd.f32 %v2644_v45, %v2642_v20  ;;  %v4203_v9 = vmul.f32 -1.442695, %v2647_v13 }
0x116b   :  { %v4204_v15 = vmul.f32 -1.442695, %v2648_v8  ;;  %5271 = vpow2.f32 %v4203_v9 }
0x116c   :  { %v2838_v48 = vpop.f32.mrb[26].mxu0  ;;  %v2934_v49 = vpop.f32.mrb[26].mxu1 }
0x116d   :  { %v2839_v51 = vadd.f32 %v5939_v54, %v2838_v48  ;;  %v4732_v52 = vpop.f32.mrb[27].mxu0  ;;  %v4743_v53 = vpop.f32.mrb[27].mxu1  ;;  %5273 = vpow2.f32 %v4204_v15  ;;  %v2935_v25 = vadd.f32 %v6045_v23, %v2934_v49 }
0x116f   :  { %2850 = vrot.lane.b32.xlu0 %v2839_v51, %s5400_s14  ;;  %v2842_v16 = vadd.f32 %v2839_v51, %v2764_v14 }
0x1171   :  { %v4207_v17 = vmul.f32 -1.442695, %v2842_v16 }
0x1173   :  { %5275 = vpow2.f32 %v4207_v17 }
0x1174   :  { %v3009_v56 = vpop.f32.mrb[28].mxu0 }
0x1175   :  { %v3010_v58 = vadd.f32 %v6033_v57, %v3009_v56  ;;  %v4754_v60 = vpop.f32.mrb[29].mxu0  ;;  %v5272_v35 = vpop.eup %5271 }
0x1176   :  { %v2655_v55 = vadd.f32 1.0, %v5272_v35 }
0x1177   :  { %3021 = vrot.lane.b32.xlu1 %v3010_v58, %s5400_s14  ;;  %v3013_v34 = vadd.f32 %v3010_v58, %v2935_v25  ;;  %v5274_v26 = vpop.eup %5273 }
0x1178   :  { %v2656_v22 = vadd.f32 1.0, %v5274_v26 }
0x1179   :  { %v4210_v21 = vmul.f32 -1.442695, %v3013_v34 }
0x117b   :  { %5277 = vpow2.f32 %v4210_v21 }
0x117c   :  { %5279 = vrcp.f32 %v2655_v55 }
0x117d   :  { %v5276_v61 = vpop.eup %5275  ;;  %5281 = vrcp.f32 %v2656_v22 }
0x117e   :  { %v2846_v33 = vadd.f32 1.0, %v5276_v61 }
0x1180   :  { %5283 = vrcp.f32 %v2846_v33 }
0x1185   :  { %v5278_v36 = vpop.eup %5277 }
0x1186   :  { %v5280_v28 = vpop.eup %5279  ;;  %v3017_v19 = vadd.f32 1.0, %v5278_v36 }
0x1187   :  { %v5282_v38 = vpop.eup %5281  ;;  %v2681_v13 = vsub.f32 1.0, %v5280_v28  ;;  %v2693_v17 = vmul.f32 %v5280_v28, %v5968_v18  ;;  %v3118_v18 = vld [vmem:[%s6220_s0 + $0xf] sm:$0x1] }
0x1188   :  { %5285 = vrcp.f32 %v3017_v19  ;;  %v2682_v8 = vsub.f32 1.0, %v5282_v38  ;;  %v2694_v15 = vmul.f32 %v5282_v38, %v5966_v31 }
0x118a   :  { %v5284_v24 = vpop.eup %5283 }
0x118b   :  { %v2860_v26 = vsub.f32 1.0, %v5284_v24  ;;  %v2866_v55 = vmul.f32 %v5284_v24, %v5975_v30 }
0x1192   :  { %v5286_v43 = vpop.eup %5285 }
0x1193   :  { %v3031_v33 = vsub.f32 1.0, %v5286_v43 }
0x11d9   :  { %v2662_v27 = vpop.permute.xlu1 %2661 }
0x11da   :  { %v2667_v41 = vmul.f32 %v5280_v28, %v2662_v27  ;;  %v3037_v28 = vmul.f32 %v5286_v43, %v5983_v39 }
0x11db   :  { %v2664_v29 = vpop.permute.xlu0 %2663 }
0x11dc   :  { %v2668_v7 = vmul.f32 %v5282_v38, %v2664_v29  ;;  %2671 = vrot.lane.b32.xlu1 %v2667_v41, %s5400_s14  ;;  %v3117_v41 = vld [vmem:[%s6220_s0 + $0x7] sm:$0x1] }
0x11de   :  { %2673 = vrot.lane.b32.xlu0 %v2668_v7, %s5400_s14 }
0x11e1   :  { %v2851_v10 = vpop.permute.xlu0 %2850 }
0x11e2   :  { %v2853_v42 = vmul.f32 %v5284_v24, %v2851_v10 }
0x11e4   :  { %2855 = vrot.lane.b32.xlu0 %v2853_v42, %s5400_s14 }
0x11e9   :  { %v3022_v45 = vpop.permute.xlu1 %3021 }
0x11ea   :  { %v3024_v48 = vmul.f32 %v5286_v43, %v3022_v45 }
0x11ec   :  { %3026 = vrot.lane.b32.xlu1 %v3024_v48, %s5400_s14 }
0x124e   :  { %v2672_v49 = vpop.permute.xlu1 %2671 }
0x124f   :  { %v2677_v51 = vadd.f32 %v2672_v49, %v2641_v4 }
0x1250   :  { %v2674_v52 = vpop.permute.xlu0 %2673 }
0x1251   :  { %5287 = vtanh.f32 %v2677_v51  ;;  %v2678_v53 = vadd.f32 %v2674_v52, %v2642_v20 }
0x1253   :  { %5289 = vtanh.f32 %v2678_v53 }
0x1256   :  { %v2856_v56 = vpop.permute.xlu0 %2855 }
0x1257   :  { %v2858_v58 = vadd.f32 %v2856_v56, %v2764_v14 }
0x1259   :  { %5291 = vtanh.f32 %v2858_v58 }
0x125b   :  { %v5288_v60 = vpop.eup %5287 }
0x125c   :  { %2685 = vrot.lane.b32.xlu1 %v5288_v60, %s5401_s18 }
0x125d   :  { %v5290_v62 = vpop.eup %5289 }
0x125e   :  { %v3027_v63 = vpop.permute.xlu1 %3026  ;;  %2687 = vrot.lane.b32.xlu0 %v5290_v62, %s5401_s18 }
0x125f   :  { %v3029_v0 = vadd.f32 %v3027_v63, %v2935_v25 }
0x1261   :  { %5293 = vtanh.f32 %v3029_v0 }
0x1263   :  { %v5292_v3 = vpop.eup %5291 }
0x1264   :  { %2862 = vrot.lane.b32.xlu0 %v5292_v3, %s5401_s18 }
0x126b   :  { %v5294_v4 = vpop.eup %5293 }
0x126c   :  { %3033 = vrot.lane.b32.xlu1 %v5294_v4, %s5401_s18 }
0x12ce   :  { %v2686_v20 = vpop.permute.xlu1 %2685 }
0x12cf   :  { %v2691_v14 = vmul.f32 %v2686_v20, %v2681_v13 }
0x12d0   :  { %v2688_v9 = vpop.permute.xlu0 %2687 }
0x12d1   :  { %v2692_v16 = vmul.f32 %v2688_v9, %v2682_v8  ;;  %v6060_v25 = vadd.f32 %v2693_v17, %v2691_v14 }
0x12d3   :  { %v6058_v34 = vadd.f32 %v2694_v15, %v2692_v16 }
0x12d5   :  { %v3041_v35 = vrot.slane %v6058_v34, 7 }
0x12d6   :  { %v2863_v21 = vpop.permute.xlu0 %2862 }
0x12d7   :  { %v2865_v22 = vmul.f32 %v2863_v21, %v2860_v26  ;;  %v3042_v61 = vsel %vm258_vm1, %v3041_v35, %v6060_v25 }
0x12d8   :  { %3043 = vrot.lane.b32.xlu0 %v3042_v61, %s5401_s18 }
0x12d9   :  { %v6067_v31 = vadd.f32 %v2866_v55, %v2865_v22 }
0x12db   :  { %3258 = vrot.lane.b32.xlu1 %v6067_v31, %s5401_s18 }
0x12de   :  { %v3034_v36 = vpop.permute.xlu1 %3033 }
0x12df   :  { %v3036_v30 = vmul.f32 %v3034_v36, %v3031_v33  ;;  %3126 = vperm.xlu1 %5144, %v3118_v18  }
0x12e1   :  { %v6075_v27 = vadd.f32 %v3037_v28, %v3036_v30 }
0x12e3   :  { %3429 = vrot.lane.b32.xlu0 %v6075_v27, %s5401_s18 }
0x12e7   :  { %3121 = vperm.xlu0 %5143, %v3117_v41  }
0x134a   :  { %v3044_v38 = vpop.permute.xlu0 %3043 }
0x134b   :  { %4764 = vmatmul.mubr.msk.f32.vlgmr.msra.gmra.mrb[28].mxu1 %vm99_vm2, %v3044_v38  ;;  %4775 = vmatmul.mubr.msk.f32.vlgmr.msra.gmra.mrb[30].mxu0 %vm99_vm2, %v3044_v38 }
0x134c   :  { %5075 = vmatpush3.bf16.msra.mxu1 %v5549_v5  ;;  %5081 = vmatpush3.bf16.msra.mxu0 %v5620_v32 }
0x134d   :  { %5076 = vmatprep.subr.bf16.mxu1 %v5396_v1  ;;  %5082 = vmatprep.subr.bf16.mxu0 %v5396_v1  ;;  %v3259_v39 = vpop.permute.xlu1 %3258 }
0x134e   :  { %4785 = vmatprep.mubr.msk.f32.mxu1 %vm5397_vm0, %v5398_v2  ;;  %4796 = vmatprep.mubr.msk.f32.mxu0 %vm5397_vm0, %v5398_v2 }
0x1350   :  { %5078 = vmatpush3.bf16.msra.mxu1 %v5554_v11  ;;  %5084 = vmatpush3.bf16.msra.mxu0 %v5626_v37 }
0x1351   :  { %5085 = vmatprep.subr.bf16.mxu1 %v5396_v1  ;;  %5091 = vmatprep.subr.bf16.mxu0 %v5396_v1 }
0x1353   :  { %4786 = vmatmul.mubr.msk.f32.vlgmr.msra.gmra.mrb[30].mxu1 %vm99_vm2, %v3259_v39  ;;  %4797 = vmatmul.mubr.msk.f32.vlgmr.msra.gmra.mrb[32].mxu0 %vm99_vm2, %v3259_v39 }
0x1354   :  { %5087 = vmatpush3.bf16.msra.mxu1 %v5636_v40  ;;  %4807 = vmatprep.mubr.msk.f32.mxu1 %vm5397_vm0, %v5398_v2 }
0x1355   :  { %5088 = vmatprep.subr.bf16.mxu1 %v5396_v1  ;;  %5093 = vmatpush3.bf16.msra.mxu0 %v5526_v47  ;;  %v3430_v19 = vpop.permute.xlu0 %3429 }
0x1356   :  { %5094 = vmatprep.subr.bf16.mxu0 %v5396_v1  ;;  %4818 = vmatprep.mubr.msk.f32.mxu0 %vm5397_vm0, %v5398_v2 }
0x1358   :  { %5090 = vmatpush3.bf16.msra.mxu1 %v5643_v44 }
0x1359   :  { %5097 = vmatprep.subr.bf16.mxu1 %v5396_v1  ;;  %5096 = vmatpush3.bf16.msra.mxu0 %v5529_v50 }
0x135a   :  { %5103 = vmatprep.subr.bf16.mxu0 %v5396_v1 }
0x135b   :  { %4808 = vmatmul.mubr.msk.f32.vlgmr.msra.gmra.mrb[32].mxu1 %vm99_vm2, %v3430_v19 }
0x135c   :  { %5099 = vmatpush3.bf16.msra.mxu1 %v5549_v5  ;;  %4829 = vmatprep.mubr.msk.f32.mxu1 %vm5397_vm0, %v5398_v2 }
0x135d   :  { %5100 = vmatprep.subr.bf16.mxu1 %v5396_v1 }
0x135e   :  { %v3127_v52 = vpop.permute.xlu1 %3126 }
0x1360   :  { %5102 = vmatpush3.bf16.msra.mxu1 %v5554_v11 }
0x1361   :  { %5109 = vmatprep.subr.bf16.mxu1 %v5396_v1 }
0x1366   :  { %v3122_v60 = vpop.permute.xlu0 %3121 }
0x1367   :  { %v3129_v0 = vmul.f32 %v5851_v12, %v3122_v60 }
0x1369   :  { %v3131_v13 = vadd.f32 %v5858_v6, %v3129_v0 }
0x141e   :  { %v3113_v47 = vpop.f32.mrb[28].mxu1  ;;  %v3253_v29 = vpop.f32.mrb[30].mxu0 }
0x141f   :  { %v4765_v7 = vpop.f32.mrb[29].mxu1  ;;  %v4776_v50 = vpop.f32.mrb[31].mxu0  ;;  %v3114_v42 = vadd.f32 %v5839_v46, %v3113_v47  ;;  %v3130_v46 = vmul.f32 %v5851_v12, %v3127_v52  ;;  %v3254_v53 = vadd.f32 %v5952_v59, %v3253_v29 }
0x1421   :  { %v3134_v48 = vrot.slane %v3114_v42, 1  ;;  %v3132_v58 = vadd.f32 %v5858_v6, %v3130_v46  ;;  %v3137_v8 = vadd.f32 %v3131_v13, %v3114_v42 }
0x1423   :  { %v3138_v62 = vadd.f32 %v3134_v48, %v3132_v58  ;;  %v4212_v14 = vmul.f32 -1.442695, %v3137_v8 }
0x1425   :  { %v4213_v4 = vmul.f32 -1.442695, %v3138_v62 }
0x1426   :  { %v3328_v24 = vpop.f32.mrb[30].mxu1  ;;  %v3424_v10 = vpop.f32.mrb[32].mxu0 }
0x1427   :  { %v3329_v43 = vadd.f32 %v5939_v54, %v3328_v24  ;;  %v4787_v5 = vpop.f32.mrb[31].mxu1  ;;  %v4798_v45 = vpop.f32.mrb[33].mxu0  ;;  %v3425_v3 = vadd.f32 %v6045_v23, %v3424_v10 }
0x1429   :  { %3340 = vrot.lane.b32.xlu1 %v3329_v43, %s5400_s14  ;;  %v3332_v56 = vadd.f32 %v3329_v43, %v3254_v53 }
0x142b   :  { %v4216_v63 = vmul.f32 -1.442695, %v3332_v56 }
0x142d   :  { %3153 = vrot.lane.b32.xlu1 %v3134_v48, %s5400_s14  ;;  %5295 = vpow2.f32 %v4216_v63 }
0x142e   :  { %v3499_v11 = vpop.f32.mrb[32].mxu1  ;;  %5297 = vpow2.f32 %v4213_v4 }
0x142f   :  { %v3500_v49 = vadd.f32 %v6033_v57, %v3499_v11  ;;  %v4809_v51 = vpop.f32.mrb[33].mxu1 }
0x1431   :  { %3511 = vrot.lane.b32.xlu0 %v3500_v49, %s5400_s14  ;;  %v3503_v20 = vadd.f32 %v3500_v49, %v3425_v3 }
0x1433   :  { %v4219_v9 = vmul.f32 -1.442695, %v3503_v20 }
0x1435   :  { %3151 = vrot.lane.b32.xlu0 %v3114_v42, %s5400_s14  ;;  %5299 = vpow2.f32 %v4219_v9 }
0x1436   :  { %5301 = vpow2.f32 %v4212_v14 }
0x1437   :  { %v5296_v15 = vpop.eup %5295 }
0x1438   :  { %v3336_v16 = vadd.f32 1.0, %v5296_v15  ;;  %v5298_v17 = vpop.eup %5297 }
0x1439   :  { %v3146_v35 = vadd.f32 1.0, %v5298_v17 }
0x143a   :  { %5303 = vrcp.f32 %v3336_v16 }
0x143b   :  { %5305 = vrcp.f32 %v3146_v35 }
0x143f   :  { %v5300_v26 = vpop.eup %5299 }
0x1440   :  { %v3507_v12 = vadd.f32 1.0, %v5300_v26  ;;  %v5302_v21 = vpop.eup %5301 }
0x1441   :  { %v3145_v55 = vadd.f32 1.0, %v5302_v21 }
0x1442   :  { %5307 = vrcp.f32 %v3507_v12 }
0x1443   :  { %5309 = vrcp.f32 %v3145_v55 }
0x1444   :  { %v5304_v22 = vpop.eup %5303 }
0x1445   :  { %v5306_v18 = vpop.eup %5305  ;;  %v3350_v49 = vsub.f32 1.0, %v5304_v22  ;;  %v3356_v52 = vmul.f32 %v5304_v22, %v6067_v31 }
0x1446   :  { %v3184_v0 = vmul.f32 %v5306_v18, %v6058_v34 }
0x144c   :  { %v5308_v28 = vpop.eup %5307 }
0x144d   :  { %v5310_v38 = vpop.eup %5309  ;;  %v3521_v62 = vsub.f32 1.0, %v5308_v28 }
0x144e   :  { %v3171_v31 = vsub.f32 1.0, %v5310_v38  ;;  %v3183_v9 = vmul.f32 %v5310_v38, %v6060_v25 }
0x149b   :  { %v3341_v61 = vpop.permute.xlu1 %3340 }
0x149c   :  { %v3343_v6 = vmul.f32 %v5304_v22, %v3341_v61 }
0x149e   :  { %3345 = vrot.lane.b32.xlu1 %v3343_v6, %s5400_s14 }
0x149f   :  { %v3154_v33 = vpop.permute.xlu1 %3153 }
0x14a0   :  { %v3158_v36 = vmul.f32 %v5306_v18, %v3154_v33 }
0x14a2   :  { %3163 = vrot.lane.b32.xlu1 %v3158_v36, %s5400_s14 }
0x14a3   :  { %v3512_v30 = vpop.permute.xlu0 %3511 }
0x14a4   :  { %v3514_v41 = vmul.f32 %v5308_v28, %v3512_v30 }
0x14a6   :  { %3516 = vrot.lane.b32.xlu0 %v3514_v41, %s5400_s14 }
0x14a7   :  { %v3152_v39 = vpop.permute.xlu0 %3151 }
0x14a8   :  { %v3157_v19 = vmul.f32 %v5310_v38, %v3152_v39 }
0x14aa   :  { %3161 = vrot.lane.b32.xlu0 %v3157_v19, %s5400_s14 }
0x1510   :  { %v3346_v47 = vpop.permute.xlu1 %3345 }
0x1511   :  { %v3348_v29 = vadd.f32 %v3346_v47, %v3254_v53 }
0x1513   :  { %5311 = vtanh.f32 %v3348_v29 }
0x1514   :  { %v3164_v7 = vpop.permute.xlu1 %3163 }
0x1515   :  { %v3168_v50 = vadd.f32 %v3164_v7, %v3132_v58  ;;  %v3172_v58 = vsub.f32 1.0, %v5306_v18 }
0x1517   :  { %5313 = vtanh.f32 %v3168_v50 }
0x1518   :  { %v3517_v24 = vpop.permute.xlu0 %3516 }
0x1519   :  { %v3519_v10 = vadd.f32 %v3517_v24, %v3425_v3  ;;  %v3527_v3 = vmul.f32 %v5308_v28, %v6075_v27 }
0x151b   :  { %5315 = vtanh.f32 %v3519_v10 }
0x151c   :  { %v3162_v42 = vpop.permute.xlu0 %3161 }
0x151d   :  { %v5312_v43 = vpop.eup %5311  ;;  %v3167_v5 = vadd.f32 %v3162_v42, %v3131_v13 }
0x151e   :  { %3352 = vrot.lane.b32.xlu1 %v5312_v43, %s5401_s18 }
0x151f   :  { %5317 = vtanh.f32 %v3167_v5 }
0x1521   :  { %v5314_v45 = vpop.eup %5313 }
0x1522   :  { %3177 = vrot.lane.b32.xlu1 %v5314_v45, %s5401_s18 }
0x1525   :  { %v5316_v48 = vpop.eup %5315 }
0x1526   :  { %3523 = vrot.lane.b32.xlu0 %v5316_v48, %s5401_s18 }
0x1529   :  { %v5318_v11 = vpop.eup %5317 }
0x152a   :  { %3175 = vrot.lane.b32.xlu0 %v5318_v11, %s5401_s18 }
0x1590   :  { %v3353_v51 = vpop.permute.xlu1 %3352 }
0x1591   :  { %v3355_v46 = vmul.f32 %v3353_v51, %v3350_v49 }
0x1593   :  { %v6139_v53 = vadd.f32 %v3356_v52, %v3355_v46 }
0x1594   :  { %v3178_v56 = vpop.permute.xlu1 %3177 }
0x1595   :  { %3608 = vrot.lane.b32.xlu1 %v6139_v53, %s5401_s18  ;;  %v3182_v60 = vmul.f32 %v3178_v56, %v3172_v58 }
0x1597   :  { %v3186_v20 = vadd.f32 %v3184_v0, %v3182_v60 }
0x1598   :  { %v3524_v63 = vpop.permute.xlu0 %3523 }
0x1599   :  { %v3526_v4 = vmul.f32 %v3524_v63, %v3521_v62  ;;  %v3531_v15 = vrot.slane %v3186_v20, 7 }
0x159b   :  { %v6145_v13 = vadd.f32 %v3527_v3, %v3526_v4 }
0x159c   :  { %v3176_v8 = vpop.permute.xlu0 %3175 }
0x159d   :  { %v3181_v14 = vmul.f32 %v3176_v8, %v3171_v31  ;;  %3779 = vrot.lane.b32.xlu0 %v6145_v13, %s5401_s18 }
0x159f   :  { %v3185_v16 = vadd.f32 %v3183_v9, %v3181_v14 }
0x15a1   :  { %v3532_v17 = vsel %vm258_vm1, %v3531_v15, %v3185_v16 }
0x15a2   :  { %3533 = vrot.lane.b32.xlu1 %v3532_v17, %s5401_s18 }
0x1607   :  { %v3609_v34 = vpop.permute.xlu1 %3608 }
0x1608   :  { %4830 = vmatmul.mubr.msk.f32.vlgmr.msra.gmra.mrb[34].mxu1 %vm99_vm2, %v3609_v34 }
0x1609   :  { %5111 = vmatpush3.bf16.msra.mxu1 %v5636_v40  ;;  %4851 = vmatprep.mubr.msk.f32.mxu1 %vm5397_vm0, %v5398_v2 }
0x160a   :  { %5112 = vmatprep.subr.bf16.mxu1 %v5396_v1 }
0x160d   :  { %5114 = vmatpush3.bf16.msra.mxu1 %v5643_v44 }
0x160e   :  { %5121 = vmatprep.subr.bf16.mxu1 %v5396_v1 }
0x160f   :  { %v3780_v25 = vpop.permute.xlu0 %3779 }
0x1610   :  { %4852 = vmatmul.mubr.msk.f32.vlgmr.msra.gmra.mrb[36].mxu1 %vm99_vm2, %v3780_v25  ;;  %v4057_v25 = vld [vmem:[%s6226_s6 + $0x10] sm:$0xff] }
0x1611   :  { %5123 = vmatpush3.bf16.msra.mxu1 %v5636_v40  ;;  %4873 = vmatprep.mubr.msk.f32.mxu1 %vm5397_vm0, %v5398_v2 }
0x1612   :  { %5124 = vmatprep.subr.bf16.mxu1 %v5396_v1 }
0x1614   :  { %v3534_v27 = vpop.permute.xlu1 %3533 }
0x1615   :  { %4819 = vmatmul.mubr.msk.f32.vlgmr.msra.gmra.mrb[34].mxu0 %vm99_vm2, %v3534_v27  ;;  %5126 = vmatpush3.bf16.msra.mxu1 %v5643_v44 }
0x1616   :  { %5105 = vmatpush3.bf16.msra.mxu0 %v5620_v32  ;;  %4840 = vmatprep.mubr.msk.f32.mxu0 %vm5397_vm0, %v5398_v2 }
0x1617   :  { %5106 = vmatprep.subr.bf16.mxu0 %v5396_v1 }
0x161a   :  { %5108 = vmatpush3.bf16.msra.mxu0 %v5626_v37 }
0x161b   :  { %5115 = vmatprep.subr.bf16.mxu0 %v5396_v1 }
0x161d   :  { %4841 = vmatmul.mubr.msk.f32.vlgmr.msra.gmra.mrb[36].mxu0 %vm99_vm2, %v3609_v34 }
0x161e   :  { %5117 = vmatpush3.bf16.msra.mxu0 %v5620_v32  ;;  %4862 = vmatprep.mubr.msk.f32.mxu0 %vm5397_vm0, %v5398_v2 }
0x161f   :  { %5118 = vmatprep.subr.bf16.mxu0 %v5396_v1 }
0x1622   :  { %5120 = vmatpush3.bf16.msra.mxu0 %v5626_v37 }
0x1623   :  { %5127 = vmatprep.subr.bf16.mxu0 %v5396_v1 }
0x16db   :  { %v3678_v40 = vpop.f32.mrb[34].mxu1 }
0x16dc   :  { %v3679_v44 = vadd.f32 %v5939_v54, %v3678_v40  ;;  %v4831_v35 = vpop.f32.mrb[35].mxu1  ;;  %v4058_v40 = vld [vmem:[%s6226_s6 + $0x18] sm:$0xff] }
0x16de   :  { %3690 = vrot.lane.b32.xlu1 %v3679_v44, %s5400_s14 }
0x16e3   :  { %v3849_v26 = vpop.f32.mrb[36].mxu1 }
0x16e4   :  { %v3850_v12 = vadd.f32 %v6033_v57, %v3849_v26  ;;  %v4853_v21 = vpop.f32.mrb[37].mxu1 }
0x16e6   :  { %3861 = vrot.lane.b32.xlu0 %v3850_v12, %s5400_s14 }
0x16e8   :  { %v3603_v32 = vpop.f32.mrb[34].mxu0 }
0x16e9   :  { %v4820_v55 = vpop.f32.mrb[35].mxu0  ;;  %v3604_v37 = vadd.f32 %v5952_v59, %v3603_v32 }
0x16eb   :  { %v3682_v6 = vadd.f32 %v3679_v44, %v3604_v37  ;;  %v5131_v44 = vpack.c.bf16 %v4058_v40, %v4057_v25 }
0x16ed   :  { %v4222_v18 = vmul.f32 -1.442695, %v3682_v6 }
0x16ef   :  { %5319 = vpow2.f32 %v4222_v18 }
0x16f0   :  { %v3774_v22 = vpop.f32.mrb[36].mxu0 }
0x16f1   :  { %v4842_v61 = vpop.f32.mrb[37].mxu0  ;;  %v3775_v33 = vadd.f32 %v6045_v23, %v3774_v22 }
0x16f2   :  { %v4229_v61 = vld [vmem:[#allocation2] ss:$0 sm:$0xff] }
0x16f3   :  { %v3853_v54 = vadd.f32 %v3850_v12, %v3775_v33 }
0x16f5   :  { %v4225_v36 = vmul.f32 -1.442695, %v3853_v54 }
0x16f7   :  { %5321 = vpow2.f32 %v4225_v36 }
0x16f9   :  { %v5320_v28 = vpop.eup %5319 }
0x16fa   :  { %v3686_v30 = vadd.f32 1.0, %v5320_v28 }
0x16fc   :  { %5323 = vrcp.f32 %v3686_v30 }
0x1701   :  { %v5322_v41 = vpop.eup %5321 }
0x1702   :  { %v3857_v38 = vadd.f32 1.0, %v5322_v41 }
0x1704   :  { %5325 = vrcp.f32 %v3857_v38 }
0x1706   :  { %v5324_v39 = vpop.eup %5323 }
0x1707   :  { %v3700_v45 = vsub.f32 1.0, %v5324_v39  ;;  %v3706_v11 = vmul.f32 %v5324_v39, %v6139_v53 }
0x170e   :  { %v5326_v59 = vpop.eup %5325 }
0x170f   :  { %v3871_v52 = vsub.f32 1.0, %v5326_v59  ;;  %v3877_v56 = vmul.f32 %v5326_v59, %v6145_v13 }
0x1750   :  { %v3691_v19 = vpop.permute.xlu1 %3690 }
0x1751   :  { %v3693_v47 = vmul.f32 %v5324_v39, %v3691_v19 }
0x1753   :  { %3695 = vrot.lane.b32.xlu1 %v3693_v47, %s5400_s14 }
0x1758   :  { %v3862_v29 = vpop.permute.xlu0 %3861 }
0x1759   :  { %v3864_v7 = vmul.f32 %v5326_v59, %v3862_v29 }
0x175b   :  { %3866 = vrot.lane.b32.xlu0 %v3864_v7, %s5400_s14 }
0x17c5   :  { %v3696_v50 = vpop.permute.xlu1 %3695 }
0x17c6   :  { %v3698_v24 = vadd.f32 %v3696_v50, %v3604_v37 }
0x17c8   :  { %5327 = vtanh.f32 %v3698_v24 }
0x17cd   :  { %v3867_v10 = vpop.permute.xlu0 %3866 }
0x17ce   :  { %v3869_v42 = vadd.f32 %v3867_v10, %v3775_v33 }
0x17d0   :  { %5329 = vtanh.f32 %v3869_v42 }
0x17d2   :  { %v5328_v43 = vpop.eup %5327 }
0x17d3   :  { %3702 = vrot.lane.b32.xlu1 %v5328_v43, %s5401_s18 }
0x17da   :  { %v5330_v5 = vpop.eup %5329 }
0x17db   :  { %3873 = vrot.lane.b32.xlu0 %v5330_v5, %s5401_s18 }
0x1845   :  { %v3703_v48 = vpop.permute.xlu1 %3702 }
0x1846   :  { %v3705_v49 = vmul.f32 %v3703_v48, %v3700_v45 }
0x1848   :  { %v3707_v51 = vadd.f32 %v3706_v11, %v3705_v49 }
0x184a   :  { %3880 = vrot.lane.b32.xlu1 %v3707_v51, %s5401_s18 }
0x184d   :  { %v3874_v46 = vpop.permute.xlu0 %3873 }
0x184e   :  { %v3876_v58 = vmul.f32 %v3874_v46, %v3871_v52 }
0x1850   :  { %v3878_v60 = vadd.f32 %v3877_v56, %v3876_v58 }
0x1852   :  { %3955 = vrot.lane.b32.xlu0 %v3878_v60, %s5401_s18 }
0x18bc   :  { %v3881_v62 = vpop.permute.xlu1 %3880 }
0x18bd   :  { %4863 = vmatmul.mubr.msk.f32.vlgmr.msra.gmra.mrb[38].mxu0 %vm99_vm2, %v3881_v62 }
0x18be   :  { %4884 = vmatprep.mubr.msk.f32.mxu0 %vm5397_vm0, %v5398_v2 }
0x18c4   :  { %v3956_v63 = vpop.permute.xlu0 %3955 }
0x18c5   :  { %4874 = vmatmul.mubr.msk.f32.vlgmr.msra.gmra.mrb[38].mxu1 %vm99_vm2, %v3956_v63 }
0x1990   :  { %v3950_v53 = vpop.f32.mrb[38].mxu0 }
0x1991   :  { %v4864_v0 = vpop.f32.mrb[39].mxu0  ;;  %v3951_v13 = vadd.f32 %v6045_v23, %v3950_v53  ;;  %v4056_v23 = vld [vmem:[%s6226_s6 + $0x8] sm:$0xff] }
0x1998   :  { %v4025_v3 = vpop.f32.mrb[38].mxu1 }
0x1999   :  { %v4026_v4 = vadd.f32 %v6033_v57, %v4025_v3  ;;  %v4875_v20 = vpop.f32.mrb[39].mxu1  ;;  %v4055_v57 = vld [vmem:[%s6226_s6] sm:$0xff] }
0x199a   :  { %v5128_v27 = vpack.c.bf16 %v4056_v23, %v4055_v57 }
0x199b   :  { %4037 = vrot.lane.b32.xlu0 %v4026_v4, %s5400_s14  ;;  %v4029_v31 = vadd.f32 %v4026_v4, %v3951_v13 }
0x199c   :  { %5129 = vmatpush3.bf16.msra.mxu0 %v5128_v27 }
0x199d   :  { %v4228_v8 = vmul.f32 -1.442695, %v4029_v31  ;;  %5130 = vmatprep.subr.bf16.mxu0 %v5396_v1 }
0x199f   :  { %5331 = vpow2.f32 %v4228_v8 }
0x19a0   :  { %5132 = vmatpush3.bf16.msra.mxu0 %v5131_v44 }
0x19a9   :  { %v5332_v9 = vpop.eup %5331 }
0x19aa   :  { %v4033_v14 = vadd.f32 1.0, %v5332_v9 }
0x19ac   :  { %5333 = vrcp.f32 %v4033_v14 }
0x19b6   :  { %v5334_v2 = vpop.eup %5333 }
0x19b7   :  { %v4047_v26 = vsub.f32 1.0, %v5334_v2  ;;  %v4053_v21 = vmul.f32 %v5334_v2, %v3878_v60 }
0x1a0d   :  { %v4038_v15 = vpop.permute.xlu0 %4037 }
0x1a0e   :  { %v4040_v16 = vmul.f32 %v5334_v2, %v4038_v15 }
0x1a10   :  { %4042 = vrot.lane.b32.xlu1 %v4040_v16, %s5400_s14 }
0x1a82   :  { %v4043_v17 = vpop.permute.xlu1 %4042 }
0x1a83   :  { %v4045_v34 = vadd.f32 %v4043_v17, %v3951_v13 }
0x1a85   :  { %5335 = vtanh.f32 %v4045_v34 }
0x1a8f   :  { %v5336_v35 = vpop.eup %5335 }
0x1a90   :  { %4049 = vrot.lane.b32.xlu0 %v5336_v35, %s5401_s18 }
0x1b02   :  { %v4050_v12 = vpop.permute.xlu0 %4049 }
0x1b03   :  { %v4052_v32 = vmul.f32 %v4050_v12, %v4047_v26 }
0x1b05   :  { %v4054_v55 = vadd.f32 %v4053_v21, %v4052_v32 }
0x1b07   :  { %4067 = vrot.lane.b32.xlu1 %v4054_v55, %s5401_s18 }
0x1b79   :  { %v4068_v22 = vpop.permute.xlu1 %4067 }
0x1b7a   :  { %4885 = vmatmul.mubr.msk.f32.vlgmr.msra.gmra.mrb[40].mxu0 %vm99_vm2, %v4068_v22 }
0x1c4d   :  { %v4137_v37 = vpop.f32.mrb[40].mxu0 }
0x1c4e   :  { %v4138_v6 = vadd.f32 %v4229_v61, %v4137_v37  ;;  %v4886_v18 = vpop.f32.mrb[41].mxu0 }
0x1c50   :  { %4142 = vst.msk [vmem:[%s6228_s8] sm:$0x3] %vm4141_vm3, %v4138_v6 }
0x1c51   :  { %4147 = vsyncpa [#allocation4], 1 }
0x1c52   :  { %4148 = vsyncpa [#allocation6], 1 }

</bundles_post_ra>
